<compile_context>
chip_gen: v6e
topology: v6e:2x2x1
jax: 0.10.0
libtpu: 0.0.40
codegen_flags: <defaults>
</compile_context>

<pallas_src>
import functools

import jax
import jax.numpy as jnp
from jax.experimental import pallas as pl
from jax.experimental.pallas import tpu as pltpu

LANE = 128            # TPU lane width; output channels padded to a multiple of this
BN_EPS = 1e-5         # PyTorch BatchNorm2d default
LEAK = 0.2            # LeakyReLU negative slope
TM_IDEAL = 1024       # target rows-per-tile for the memory-bound layers

_CompilerParams = getattr(pltpu, "CompilerParams", None) or getattr(
    pltpu, "TPUCompilerParams")


def _round_up(x, m):
    return (x + m - 1) // m * m


@functools.lru_cache(maxsize=1)
def _vmem_limit_bytes():
    """Generation-aware scoped-VMEM budget (v5e/v6e: 128 MiB phys; v7x: 64 MiB)."""
    cap = 64 * 1024 * 1024
    try:
        cap = int(pltpu.get_tpu_info().vmem_capacity_bytes)
    except Exception:
        pass
    return max(32 * 1024 * 1024, min(cap // 2, 96 * 1024 * 1024))


def _maybe_cost(flops, bytes_accessed, transcendentals=0):
    if hasattr(pl, "CostEstimate"):
        return {"cost_estimate": pl.CostEstimate(
            flops=int(flops), transcendentals=int(transcendentals),
            bytes_accessed=int(bytes_accessed))}
    return {}


def _tile_m(m, k, cout_pad, out_bytes, vmem_limit, ideal=TM_IDEAL):
    """Row-tile size with a cdiv grid (M padded to n_tiles*TM).

    Guarantees >= 2 tiles whenever m > 8 (so v7x's two TensorCores both get
    work) and keeps the double-buffered working set within ~half the scoped
    VMEM budget.
    """
    tm = min(ideal, _round_up(m, 8))
    if tm >= m and m > 8:
        tm = _round_up((m + 1) // 2, 8)

    def footprint(t):
        return (2 * t * k * 2            # double-buffered bf16 patch tiles
                + 2 * t * cout_pad * out_bytes   # double-buffered output tiles
                + 2 * k * cout_pad * 2)  # (double-buffered) bf16 weight block

    while tm > 8 and footprint(tm) > vmem_limit // 2:
        tm = max(8, _round_up(tm // 2, 8))
    n_tiles = -(-m // tm)
    return tm, n_tiles, n_tiles * tm


# ----------------------------------------------------------------------------
# Kernels
# ----------------------------------------------------------------------------
def _matmul_act_kernel(p_ref, w_ref, o_ref, *, leaky):
    """o = (p @ w) [+ LeakyReLU(0.2)]; bf16 operands, f32 accumulation on MXU."""
    y = jnp.dot(p_ref[...], w_ref[...], preferred_element_type=jnp.float32)
    if leaky:
        y = jnp.where(y > 0, y, LEAK * y)
    o_ref[...] = y.astype(o_ref.dtype)


def _matmul_stats_kernel(p_ref, w_ref, y_ref, stats_ref):
    """Phase 1 of conv+BN: y = p @ w (stored bf16) + f32 per-tile sum / sumsq."""
    y = jnp.dot(p_ref[...], w_ref[...], preferred_element_type=jnp.float32)
    y_ref[...] = y.astype(y_ref.dtype)              # bf16 store (halves HBM bytes)
    s = jnp.sum(y, axis=0, keepdims=True)           # (1, Cpad), exact f32 stats
    sq = jnp.sum(y * y, axis=0, keepdims=True)      # (1, Cpad)
    stats_ref[...] = jnp.concatenate([s, sq], axis=0).reshape(stats_ref.shape)


def _scale_shift_act_kernel(y_ref, scale_ref, shift_ref, o_ref, *, leaky):
    """Phase 2: out = y * scale + shift (+ LeakyReLU). scale/shift precomputed."""
    out = y_ref[...].astype(jnp.float32) * scale_ref[...] + shift_ref[...]
    if leaky:
        out = jnp.where(out > 0, out, LEAK * out)
    o_ref[...] = out.astype(o_ref.dtype)


# ----------------------------------------------------------------------------
# Glue: NHWC im2col (K ordered (kh, kw, c)) and weight re-layout/padding
# ----------------------------------------------------------------------------
def _im2col_nhwc(x, kh, kw, stride, pad):
    B, H, W, C = x.shape
    if pad:
        x = jnp.pad(x, ((0, 0), (pad, pad), (pad, pad), (0, 0)))
    OH = (H + 2 * pad - kh) // stride + 1
    OW = (W + 2 * pad - kw) // stride + 1
    cols = []
    for i in range(kh):
        for j in range(kw):
            cols.append(x[:, i:i + stride * OH:stride, j:j + stride * OW:stride, :])
    patches = jnp.concatenate(cols, axis=-1)        # (B, OH, OW, KH*KW*C)
    return patches.reshape(B * OH * OW, kh * kw * C), OH, OW


def _prep_weight(w, cout_pad):
    """(Cout, Cin, KH, KW) torch layout -> (KH*KW*Cin, cout_pad); pad Cout only."""
    Cout, Cin, KH, KW = w.shape
    w = jnp.transpose(w, (2, 3, 1, 0))              # (KH, KW, Cin, Cout)
    w = jnp.pad(w, ((0, 0), (0, 0), (0, 0), (0, cout_pad - Cout)))
    return w.reshape(KH * KW * Cin, cout_pad)


# ----------------------------------------------------------------------------
# One Conv(+BN)(+LeakyReLU) layer
# ----------------------------------------------------------------------------
def _conv_layer(x_nhwc, w, gamma=None, beta=None, *, stride, pad, use_bn, leaky,
                out_dtype=jnp.bfloat16):
    B = x_nhwc.shape[0]
    Cout, Cin, KH, KW = w.shape
    cout_pad = _round_up(Cout, LANE)

    # Only the REAL input channels feed the matmul K dim: the im2col concat
    # materializes a copy anyway, so this slice is free and keeps K = KH*KW*Cin
    # rather than KH*KW*(lane-padded Cin).
    x_real = x_nhwc[..., :Cin].astype(jnp.bfloat16)
    wmat = _prep_weight(w, cout_pad).astype(jnp.bfloat16)          # (K, cout_pad)
    patches, OH, OW = _im2col_nhwc(x_real, KH, KW, stride, pad)    # (M, K)
    M, K = patches.shape

    out_bytes = jnp.dtype(out_dtype).itemsize
    vmem_limit = _vmem_limit_bytes()
    TM, n_tiles, M_pad = _tile_m(M, K, cout_pad, out_bytes, vmem_limit)
    if M_pad != M:
        # Padded rows are exactly zero -> zero conv output -> contribute 0 to BN sums.
        patches = jnp.pad(patches, ((0, M_pad - M), (0, 0)))

    p_spec = pl.BlockSpec((TM, K), lambda i: (i, 0))
    # TODO(synk): single-buffer this constant weight stream (pl.Buffered(1)) and
    # add a cout grid axis for very wide configs on v7x's 64 MiB VMEM.
    w_spec = pl.BlockSpec((K, cout_pad), lambda i: (0, 0))
    o_spec = pl.BlockSpec((TM, cout_pad), lambda i: (i, 0))
    cparams = _CompilerParams(dimension_semantics=("parallel",),
                              vmem_limit_bytes=vmem_limit)
    mm_flops = 2 * M_pad * K * cout_pad

    if not use_bn:
        out = pl.pallas_call(
            functools.partial(_matmul_act_kernel, leaky=leaky),
            grid=(n_tiles,),
            in_specs=[p_spec, w_spec],
            out_specs=o_spec,
            out_shape=jax.ShapeDtypeStruct((M_pad, cout_pad), out_dtype),
            compiler_params=cparams,
            **_maybe_cost(mm_flops,
                          patches.size * 2 + wmat.size * 2
                          + M_pad * cout_pad * out_bytes),
        )(patches, wmat)
        return out[:M].reshape(B, OH, OW, cout_pad)

    # ---- phase 1: conv matmul (bf16 y) + f32 per-tile channel sum / sum-of-squares
    y, part = pl.pallas_call(
        _matmul_stats_kernel,
        grid=(n_tiles,),
        in_specs=[p_spec, w_spec],
        out_specs=[o_spec,
                   pl.BlockSpec((1, 2, cout_pad), lambda i: (i, 0, 0))],
        out_shape=[jax.ShapeDtypeStruct((M_pad, cout_pad), jnp.bfloat16),
                   jax.ShapeDtypeStruct((n_tiles, 2, cout_pad), jnp.float32)],
        compiler_params=cparams,
        **_maybe_cost(mm_flops,
                      patches.size * 2 + wmat.size * 2 + M_pad * cout_pad * 2
                      + n_tiles * 2 * cout_pad * 4),
    )(patches, wmat)

    # ---- tiny XLA finalize: exact batch stats -> per-channel scale / shift.
    # PyTorch training-mode BN: batch mean, biased variance, eps=1e-5.
    sums = jnp.sum(part, axis=0)                         # (2, cout_pad)
    mean = sums[0] / M
    var = jnp.maximum(sums[1] / M - mean * mean, 0.0)
    inv = jax.lax.rsqrt(var + BN_EPS)
    g = jnp.pad(gamma.astype(jnp.float32), (0, cout_pad - Cout))
    b = jnp.pad(beta.astype(jnp.float32), (0, cout_pad - Cout))
    scale = (g * inv).reshape(1, cout_pad)               # padded lanes: g=0 -> scale=0
    shift = (b - mean * g * inv).reshape(1, cout_pad)    # padded lanes: shift=0

    # ---- phase 2: single FMA + LeakyReLU, lane-dense store
    out = pl.pallas_call(
        functools.partial(_scale_shift_act_kernel, leaky=leaky),
        grid=(n_tiles,),
        in_specs=[o_spec,
                  pl.BlockSpec((1, cout_pad), lambda i: (0, 0)),
                  pl.BlockSpec((1, cout_pad), lambda i: (0, 0))],
        out_specs=pl.BlockSpec((TM, cout_pad), lambda i: (i, 0)),
        out_shape=jax.ShapeDtypeStruct((M_pad, cout_pad), out_dtype),
        compiler_params=cparams,
        **_maybe_cost(3 * M_pad * cout_pad,
                      M_pad * cout_pad * (2 + out_bytes) + 2 * cout_pad * 4),
    )(y, scale, shift)
    return out[:M].reshape(B, OH, OW, cout_pad)


# ----------------------------------------------------------------------------
# Discriminator forward (input NCHW (B, nc, 32, 32) -> output (B, 1, 1, 1))
# ----------------------------------------------------------------------------
@jax.jit
def discriminator_forward(x_nchw, params):
    x = jnp.transpose(x_nchw, (0, 2, 3, 1))         # NHWC once at the boundary
    # conv1: Conv(nc -> ndf, 4, 2, 1) + LeakyReLU
    h = _conv_layer(x, params["w1"], stride=2, pad=1, use_bn=False, leaky=True)
    # conv2..conv4: Conv + BN(train) + LeakyReLU
    h = _conv_layer(h, params["w2"], params["g2"], params["b2"],
                    stride=2, pad=1, use_bn=True, leaky=True)
    h = _conv_layer(h, params["w3"], params["g3"], params["b3"],
                    stride=2, pad=1, use_bn=True, leaky=True)
    h = _conv_layer(h, params["w4"], params["g4"], params["b4"],
                    stride=2, pad=1, use_bn=True, leaky=True)
    # conv5: Conv(8ndf -> 1, 2, 1, 0); im2col here is just a reshape (2x2 input)
    # TODO(synk): fuse conv4+conv5 (latency-bound tail) into one kernel.
    h = _conv_layer(h, params["w5"], stride=1, pad=0, use_bn=False, leaky=False,
                    out_dtype=jnp.float32)
    # (B, 1, 1, 128-padded) -> keep the single real channel, back to NCHW
    return jnp.transpose(h[..., :1], (0, 3, 1, 2))


def init_params(key, nc, ndf):
    ks = jax.random.split(key, 8)
    n = lambda k, shape: (0.02 * jax.random.normal(k, shape)).astype(jnp.float32)
    return {
        "w1": n(ks[0], (ndf, nc, 4, 4)),
        "w2": n(ks[1], (ndf * 2, ndf, 4, 4)),
        "w3": n(ks[2], (ndf * 4, ndf * 2, 4, 4)),
        "w4": n(ks[3], (ndf * 8, ndf * 4, 4, 4)),
        "w5": n(ks[4], (1, ndf * 8, 2, 2)),
        "g2": (1.0 + 0.02 * jax.random.normal(ks[5], (ndf * 2,))).astype(jnp.float32),
        "b2": jnp.zeros((ndf * 2,), jnp.float32),
        "g3": (1.0 + 0.02 * jax.random.normal(ks[6], (ndf * 4,))).astype(jnp.float32),
        "b3": jnp.zeros((ndf * 4,), jnp.float32),
        "g4": (1.0 + 0.02 * jax.random.normal(ks[7], (ndf * 8,))).astype(jnp.float32),
        "b4": jnp.zeros((ndf * 8,), jnp.float32),
    }


if __name__ == "__main__":
    # Small config consistent with the module: nc=1 (MNIST), ndf=8, 32x32 input.
    # B=16 so the M-tiled grid and cross-tile BN statistics paths are exercised.
    B, NC, NDF, H, W = 16, 1, 8, 32, 32

    key = jax.random.PRNGKey(0)
    k_x, k_p = jax.random.split(key)
    x = jax.random.normal(k_x, (B, NC, H, W), dtype=jnp.float32)
    params = init_params(k_p, NC, NDF)

    out = jax.block_until_ready(discriminator_forward(x, params))
    assert out.shape == (B, 1, 1, 1), out.shape
    assert bool(jnp.all(jnp.isfinite(out))), "non-finite output"
    print("KERNEL_OK")
</pallas_src>

<mosaic_0001>
module attributes {stable_mosaic.version = 11 : i64} {
  func.func @_matmul_act_kernel(%arg0: i32, %arg1: memref<1024x16xbf16, #tpu.memory_space<vmem>>, %arg2: memref<16x128xbf16, #tpu.memory_space<vmem>>, %arg3: memref<1024x128xbf16, #tpu.memory_space<vmem>>) attributes {dimension_semantics = [#tpu.dimension_semantics<parallel>], iteration_bounds = array<i64: 4>, scalar_prefetch = 0 : i64, scratch_operands = 0 : i64, tpu.core_type = #tpu.core_type<tc>, window_params = [{transform_indices = @transform_0, window_bounds = array<i64: 1024, 16>}, {pipeline_mode = #tpu.pipeline_mode<synchronous>, transform_indices = @transform_1, window_bounds = array<i64: 16, 128>}, {transform_indices = @transform_2, window_bounds = array<i64: 1024, 128>}]} {
    %c0 = arith.constant 0 : index
    %c0_0 = arith.constant 0 : index
    %0 = vector.load %arg1[%c0, %c0_0] : memref<1024x16xbf16, #tpu.memory_space<vmem>>, vector<1024x16xbf16>
    %c0_1 = arith.constant 0 : index
    %c0_2 = arith.constant 0 : index
    %1 = vector.load %arg2[%c0_1, %c0_2] : memref<16x128xbf16, #tpu.memory_space<vmem>>, vector<16x128xbf16>
    %cst = arith.constant dense<0.000000e+00> : vector<1024x128xf32>
    %2 = tpu.matmul %0, %1, %cst {dimension_numbers = #tpu.dot_dimension_numbers<[1], [0], [0], [1], [0, 0, 1, 1], [], []>} : vector<1024x16xbf16>, vector<16x128xbf16>, vector<1024x128xf32> -> vector<1024x128xf32>
    %cst_3 = arith.constant 0.000000e+00 : f32
    %3 = vector.broadcast %cst_3 : f32 to vector<1024x128xf32>
    %4 = arith.cmpf ogt, %2, %3 : vector<1024x128xf32>
    %cst_4 = arith.constant 2.000000e-01 : f32
    %5 = vector.broadcast %cst_4 : f32 to vector<1024x128xf32>
    %6 = arith.mulf %5, %2 : vector<1024x128xf32>
    %7 = arith.select %4, %2, %6 : vector<1024x128xi1>, vector<1024x128xf32>
    %8 = arith.truncf %7 : vector<1024x128xf32> to vector<1024x128xbf16>
    %c0_5 = arith.constant 0 : index
    %c0_6 = arith.constant 0 : index
    %9 = vector.load %arg3[%c0_5, %c0_6] : memref<1024x128xbf16, #tpu.memory_space<vmem>>, vector<1024x128xbf16>
    tpu.vector_store %arg3[%c0_5, %c0_6], %8 {strides = array<i32>} : memref<1024x128xbf16, #tpu.memory_space<vmem>>, vector<1024x128xbf16>,
    return
  }
  func.func @transform_0(%arg0: i32) -> (i32, i32) {
    %c0_i32 = arith.constant 0 : i32
    %c0_i32_0 = arith.constant 0 : i32
    return %arg0, %c0_i32 : i32, i32
  }
  func.func @transform_1(%arg0: i32) -> (i32, i32) {
    %c0_i32 = arith.constant 0 : i32
    %c0_i32_0 = arith.constant 0 : i32
    %c0_i32_1 = arith.constant 0 : i32
    return %c0_i32, %c0_i32_0 : i32, i32
  }
  func.func @transform_2(%arg0: i32) -> (i32, i32) {
    %c0_i32 = arith.constant 0 : i32
    %c0_i32_0 = arith.constant 0 : i32
    return %arg0, %c0_i32 : i32, i32
  }
}

module attributes {stable_mosaic.version = 11 : i64} {
  func.func @_matmul_stats_kernel(%arg0: i32, %arg1: memref<512x128xbf16, #tpu.memory_space<vmem>>, %arg2: memref<128x128xbf16, #tpu.memory_space<vmem>>, %arg3: memref<512x128xbf16, #tpu.memory_space<vmem>>, %arg4: memref<1x2x128xf32, #tpu.memory_space<vmem>>) attributes {dimension_semantics = [#tpu.dimension_semantics<parallel>], iteration_bounds = array<i64: 2>, scalar_prefetch = 0 : i64, scratch_operands = 0 : i64, tpu.core_type = #tpu.core_type<tc>, window_params = [{transform_indices = @transform_0, window_bounds = array<i64: 512, 128>}, {pipeline_mode = #tpu.pipeline_mode<synchronous>, transform_indices = @transform_1, window_bounds = array<i64: 128, 128>}, {transform_indices = @transform_2, window_bounds = array<i64: 512, 128>}, {transform_indices = @transform_3, window_bounds = array<i64: 1, 2, 128>}]} {
    %c0 = arith.constant 0 : index
    %c0_0 = arith.constant 0 : index
    %0 = vector.load %arg1[%c0, %c0_0] : memref<512x128xbf16, #tpu.memory_space<vmem>>, vector<512x128xbf16>
    %c0_1 = arith.constant 0 : index
    %c0_2 = arith.constant 0 : index
    %1 = vector.load %arg2[%c0_1, %c0_2] : memref<128x128xbf16, #tpu.memory_space<vmem>>, vector<128x128xbf16>
    %cst = arith.constant dense<0.000000e+00> : vector<512x128xf32>
    %2 = tpu.matmul %0, %1, %cst {dimension_numbers = #tpu.dot_dimension_numbers<[1], [0], [0], [1], [0, 0, 1, 1], [], []>} : vector<512x128xbf16>, vector<128x128xbf16>, vector<512x128xf32> -> vector<512x128xf32>
    %3 = arith.truncf %2 : vector<512x128xf32> to vector<512x128xbf16>
    %c0_3 = arith.constant 0 : index
    %c0_4 = arith.constant 0 : index
    %4 = vector.load %arg3[%c0_3, %c0_4] : memref<512x128xbf16, #tpu.memory_space<vmem>>, vector<512x128xbf16>
    tpu.vector_store %arg3[%c0_3, %c0_4], %3 {strides = array<i32>} : memref<512x128xbf16, #tpu.memory_space<vmem>>, vector<512x128xbf16>,
    %cst_5 = arith.constant dense<0.000000e+00> : vector<128xf32>
    %5 = vector.multi_reduction <add>, %2, %cst_5 [0] : vector<512x128xf32> to vector<128xf32>
    %6 = vector.shape_cast %5 : vector<128xf32> to vector<1x128xf32>
    %7 = arith.mulf %2, %2 : vector<512x128xf32>
    %cst_6 = arith.constant dense<0.000000e+00> : vector<128xf32>
    %8 = vector.multi_reduction <add>, %7, %cst_6 [0] : vector<512x128xf32> to vector<128xf32>
    %9 = vector.shape_cast %8 : vector<128xf32> to vector<1x128xf32>
    %10 = tpu.concatenate %6, %9 in 0 : vector<1x128xf32>, vector<1x128xf32> -> vector<2x128xf32>
    %11 = vector.shape_cast %10 : vector<2x128xf32> to vector<1x2x128xf32>
    %c0_7 = arith.constant 0 : index
    %c0_8 = arith.constant 0 : index
    %c0_9 = arith.constant 0 : index
    %12 = vector.load %arg4[%c0_7, %c0_8, %c0_9] : memref<1x2x128xf32, #tpu.memory_space<vmem>>, vector<1x2x128xf32>
    tpu.vector_store %arg4[%c0_7, %c0_8, %c0_9], %11 {strides = array<i32>} : memref<1x2x128xf32, #tpu.memory_space<vmem>>, vector<1x2x128xf32>,
    return
  }
  func.func @transform_0(%arg0: i32) -> (i32, i32) {
    %c0_i32 = arith.constant 0 : i32
    %c0_i32_0 = arith.constant 0 : i32
    return %arg0, %c0_i32 : i32, i32
  }
  func.func @transform_1(%arg0: i32) -> (i32, i32) {
    %c0_i32 = arith.constant 0 : i32
    %c0_i32_0 = arith.constant 0 : i32
    %c0_i32_1 = arith.constant 0 : i32
    return %c0_i32, %c0_i32_0 : i32, i32
  }
  func.func @transform_2(%arg0: i32) -> (i32, i32) {
    %c0_i32 = arith.constant 0 : i32
    %c0_i32_0 = arith.constant 0 : i32
    return %arg0, %c0_i32 : i32, i32
  }
  func.func @transform_3(%arg0: i32) -> (i32, i32, i32) {
    %c0_i32 = arith.constant 0 : i32
    %c0_i32_0 = arith.constant 0 : i32
    %c0_i32_1 = arith.constant 0 : i32
    return %arg0, %c0_i32, %c0_i32_0 : i32, i32, i32
  }
}

module attributes {stable_mosaic.version = 11 : i64} {
  func.func @_scale_shift_act_kernel(%arg0: i32, %arg1: memref<512x128xbf16, #tpu.memory_space<vmem>>, %arg2: memref<1x128xf32, #tpu.memory_space<vmem>>, %arg3: memref<1x128xf32, #tpu.memory_space<vmem>>, %arg4: memref<512x128xbf16, #tpu.memory_space<vmem>>) attributes {dimension_semantics = [#tpu.dimension_semantics<parallel>], iteration_bounds = array<i64: 2>, scalar_prefetch = 0 : i64, scratch_operands = 0 : i64, tpu.core_type = #tpu.core_type<tc>, window_params = [{transform_indices = @transform_0, window_bounds = array<i64: 512, 128>}, {pipeline_mode = #tpu.pipeline_mode<synchronous>, transform_indices = @transform_1, window_bounds = array<i64: 1, 128>}, {pipeline_mode = #tpu.pipeline_mode<synchronous>, transform_indices = @transform_2, window_bounds = array<i64: 1, 128>}, {transform_indices = @transform_3, window_bounds = array<i64: 512, 128>}]} {
    %c0 = arith.constant 0 : index
    %c0_0 = arith.constant 0 : index
    %0 = vector.load %arg1[%c0, %c0_0] : memref<512x128xbf16, #tpu.memory_space<vmem>>, vector<512x128xbf16>
    %1 = arith.extf %0 : vector<512x128xbf16> to vector<512x128xf32>
    %c0_1 = arith.constant 0 : index
    %c0_2 = arith.constant 0 : index
    %2 = vector.load %arg2[%c0_1, %c0_2] : memref<1x128xf32, #tpu.memory_space<vmem>>, vector<1x128xf32>
    %3 = vector.broadcast %2 : vector<1x128xf32> to vector<512x128xf32>
    %4 = arith.mulf %1, %3 : vector<512x128xf32>
    %c0_3 = arith.constant 0 : index
    %c0_4 = arith.constant 0 : index
    %5 = vector.load %arg3[%c0_3, %c0_4] : memref<1x128xf32, #tpu.memory_space<vmem>>, vector<1x128xf32>
    %6 = vector.broadcast %5 : vector<1x128xf32> to vector<512x128xf32>
    %7 = arith.addf %4, %6 : vector<512x128xf32>
    %cst = arith.constant 0.000000e+00 : f32
    %8 = vector.broadcast %cst : f32 to vector<512x128xf32>
    %9 = arith.cmpf ogt, %7, %8 : vector<512x128xf32>
    %cst_5 = arith.constant 2.000000e-01 : f32
    %10 = vector.broadcast %cst_5 : f32 to vector<512x128xf32>
    %11 = arith.mulf %10, %7 : vector<512x128xf32>
    %12 = arith.select %9, %7, %11 : vector<512x128xi1>, vector<512x128xf32>
    %13 = arith.truncf %12 : vector<512x128xf32> to vector<512x128xbf16>
    %c0_6 = arith.constant 0 : index
    %c0_7 = arith.constant 0 : index
    %14 = vector.load %arg4[%c0_6, %c0_7] : memref<512x128xbf16, #tpu.memory_space<vmem>>, vector<512x128xbf16>
    tpu.vector_store %arg4[%c0_6, %c0_7], %13 {strides = array<i32>} : memref<512x128xbf16, #tpu.memory_space<vmem>>, vector<512x128xbf16>,
    return
  }
  func.func @transform_0(%arg0: i32) -> (i32, i32) {
    %c0_i32 = arith.constant 0 : i32
    %c0_i32_0 = arith.constant 0 : i32
    return %arg0, %c0_i32 : i32, i32
  }
  func.func @transform_1(%arg0: i32) -> (i32, i32) {
    %c0_i32 = arith.constant 0 : i32
    %c0_i32_0 = arith.constant 0 : i32
    %c0_i32_1 = arith.constant 0 : i32
    return %c0_i32, %c0_i32_0 : i32, i32
  }
  func.func @transform_2(%arg0: i32) -> (i32, i32) {
    %c0_i32 = arith.constant 0 : i32
    %c0_i32_0 = arith.constant 0 : i32
    %c0_i32_1 = arith.constant 0 : i32
    return %c0_i32, %c0_i32_0 : i32, i32
  }
  func.func @transform_3(%arg0: i32) -> (i32, i32) {
    %c0_i32 = arith.constant 0 : i32
    %c0_i32_0 = arith.constant 0 : i32
    return %arg0, %c0_i32 : i32, i32
  }
}

module attributes {stable_mosaic.version = 11 : i64} {
  func.func @_scale_shift_act_kernel(%arg0: i32, %arg1: memref<128x128xbf16, #tpu.memory_space<vmem>>, %arg2: memref<1x128xf32, #tpu.memory_space<vmem>>, %arg3: memref<1x128xf32, #tpu.memory_space<vmem>>, %arg4: memref<128x128xbf16, #tpu.memory_space<vmem>>) attributes {dimension_semantics = [#tpu.dimension_semantics<parallel>], iteration_bounds = array<i64: 2>, scalar_prefetch = 0 : i64, scratch_operands = 0 : i64, tpu.core_type = #tpu.core_type<tc>, window_params = [{transform_indices = @transform_0, window_bounds = array<i64: 128, 128>}, {pipeline_mode = #tpu.pipeline_mode<synchronous>, transform_indices = @transform_1, window_bounds = array<i64: 1, 128>}, {pipeline_mode = #tpu.pipeline_mode<synchronous>, transform_indices = @transform_2, window_bounds = array<i64: 1, 128>}, {transform_indices = @transform_3, window_bounds = array<i64: 128, 128>}]} {
    %c0 = arith.constant 0 : index
    %c0_0 = arith.constant 0 : index
    %0 = vector.load %arg1[%c0, %c0_0] : memref<128x128xbf16, #tpu.memory_space<vmem>>, vector<128x128xbf16>
    %1 = arith.extf %0 : vector<128x128xbf16> to vector<128x128xf32>
    %c0_1 = arith.constant 0 : index
    %c0_2 = arith.constant 0 : index
    %2 = vector.load %arg2[%c0_1, %c0_2] : memref<1x128xf32, #tpu.memory_space<vmem>>, vector<1x128xf32>
    %3 = vector.broadcast %2 : vector<1x128xf32> to vector<128x128xf32>
    %4 = arith.mulf %1, %3 : vector<128x128xf32>
    %c0_3 = arith.constant 0 : index
    %c0_4 = arith.constant 0 : index
    %5 = vector.load %arg3[%c0_3, %c0_4] : memref<1x128xf32, #tpu.memory_space<vmem>>, vector<1x128xf32>
    %6 = vector.broadcast %5 : vector<1x128xf32> to vector<128x128xf32>
    %7 = arith.addf %4, %6 : vector<128x128xf32>
    %cst = arith.constant 0.000000e+00 : f32
    %8 = vector.broadcast %cst : f32 to vector<128x128xf32>
    %9 = arith.cmpf ogt, %7, %8 : vector<128x128xf32>
    %cst_5 = arith.constant 2.000000e-01 : f32
    %10 = vector.broadcast %cst_5 : f32 to vector<128x128xf32>
    %11 = arith.mulf %10, %7 : vector<128x128xf32>
    %12 = arith.select %9, %7, %11 : vector<128x128xi1>, vector<128x128xf32>
    %13 = arith.truncf %12 : vector<128x128xf32> to vector<128x128xbf16>
    %c0_6 = arith.constant 0 : index
    %c0_7 = arith.constant 0 : index
    %14 = vector.load %arg4[%c0_6, %c0_7] : memref<128x128xbf16, #tpu.memory_space<vmem>>, vector<128x128xbf16>
    tpu.vector_store %arg4[%c0_6, %c0_7], %13 {strides = array<i32>} : memref<128x128xbf16, #tpu.memory_space<vmem>>, vector<128x128xbf16>,
    return
  }
  func.func @transform_0(%arg0: i32) -> (i32, i32) {
    %c0_i32 = arith.constant 0 : i32
    %c0_i32_0 = arith.constant 0 : i32
    return %arg0, %c0_i32 : i32, i32
  }
  func.func @transform_1(%arg0: i32) -> (i32, i32) {
    %c0_i32 = arith.constant 0 : i32
    %c0_i32_0 = arith.constant 0 : i32
    %c0_i32_1 = arith.constant 0 : i32
    return %c0_i32, %c0_i32_0 : i32, i32
  }
  func.func @transform_2(%arg0: i32) -> (i32, i32) {
    %c0_i32 = arith.constant 0 : i32
    %c0_i32_0 = arith.constant 0 : i32
    %c0_i32_1 = arith.constant 0 : i32
    return %c0_i32, %c0_i32_0 : i32, i32
  }
  func.func @transform_3(%arg0: i32) -> (i32, i32) {
    %c0_i32 = arith.constant 0 : i32
    %c0_i32_0 = arith.constant 0 : i32
    return %arg0, %c0_i32 : i32, i32
  }
}

module attributes {stable_mosaic.version = 11 : i64} {
  func.func @_matmul_stats_kernel(%arg0: i32, %arg1: memref<128x256xbf16, #tpu.memory_space<vmem>>, %arg2: memref<256x128xbf16, #tpu.memory_space<vmem>>, %arg3: memref<128x128xbf16, #tpu.memory_space<vmem>>, %arg4: memref<1x2x128xf32, #tpu.memory_space<vmem>>) attributes {dimension_semantics = [#tpu.dimension_semantics<parallel>], iteration_bounds = array<i64: 2>, scalar_prefetch = 0 : i64, scratch_operands = 0 : i64, tpu.core_type = #tpu.core_type<tc>, window_params = [{transform_indices = @transform_0, window_bounds = array<i64: 128, 256>}, {pipeline_mode = #tpu.pipeline_mode<synchronous>, transform_indices = @transform_1, window_bounds = array<i64: 256, 128>}, {transform_indices = @transform_2, window_bounds = array<i64: 128, 128>}, {transform_indices = @transform_3, window_bounds = array<i64: 1, 2, 128>}]} {
    %c0 = arith.constant 0 : index
    %c0_0 = arith.constant 0 : index
    %0 = vector.load %arg1[%c0, %c0_0] : memref<128x256xbf16, #tpu.memory_space<vmem>>, vector<128x256xbf16>
    %c0_1 = arith.constant 0 : index
    %c0_2 = arith.constant 0 : index
    %1 = vector.load %arg2[%c0_1, %c0_2] : memref<256x128xbf16, #tpu.memory_space<vmem>>, vector<256x128xbf16>
    %cst = arith.constant dense<0.000000e+00> : vector<128x128xf32>
    %2 = tpu.matmul %0, %1, %cst {dimension_numbers = #tpu.dot_dimension_numbers<[1], [0], [0], [1], [0, 0, 1, 1], [], []>} : vector<128x256xbf16>, vector<256x128xbf16>, vector<128x128xf32> -> vector<128x128xf32>
    %3 = arith.truncf %2 : vector<128x128xf32> to vector<128x128xbf16>
    %c0_3 = arith.constant 0 : index
    %c0_4 = arith.constant 0 : index
    %4 = vector.load %arg3[%c0_3, %c0_4] : memref<128x128xbf16, #tpu.memory_space<vmem>>, vector<128x128xbf16>
    tpu.vector_store %arg3[%c0_3, %c0_4], %3 {strides = array<i32>} : memref<128x128xbf16, #tpu.memory_space<vmem>>, vector<128x128xbf16>,
    %cst_5 = arith.constant dense<0.000000e+00> : vector<128xf32>
    %5 = vector.multi_reduction <add>, %2, %cst_5 [0] : vector<128x128xf32> to vector<128xf32>
    %6 = vector.shape_cast %5 : vector<128xf32> to vector<1x128xf32>
    %7 = arith.mulf %2, %2 : vector<128x128xf32>
    %cst_6 = arith.constant dense<0.000000e+00> : vector<128xf32>
    %8 = vector.multi_reduction <add>, %7, %cst_6 [0] : vector<128x128xf32> to vector<128xf32>
    %9 = vector.shape_cast %8 : vector<128xf32> to vector<1x128xf32>
    %10 = tpu.concatenate %6, %9 in 0 : vector<1x128xf32>, vector<1x128xf32> -> vector<2x128xf32>
    %11 = vector.shape_cast %10 : vector<2x128xf32> to vector<1x2x128xf32>
    %c0_7 = arith.constant 0 : index
    %c0_8 = arith.constant 0 : index
    %c0_9 = arith.constant 0 : index
    %12 = vector.load %arg4[%c0_7, %c0_8, %c0_9] : memref<1x2x128xf32, #tpu.memory_space<vmem>>, vector<1x2x128xf32>
    tpu.vector_store %arg4[%c0_7, %c0_8, %c0_9], %11 {strides = array<i32>} : memref<1x2x128xf32, #tpu.memory_space<vmem>>, vector<1x2x128xf32>,
    return
  }
  func.func @transform_0(%arg0: i32) -> (i32, i32) {
    %c0_i32 = arith.constant 0 : i32
    %c0_i32_0 = arith.constant 0 : i32
    return %arg0, %c0_i32 : i32, i32
  }
  func.func @transform_1(%arg0: i32) -> (i32, i32) {
    %c0_i32 = arith.constant 0 : i32
    %c0_i32_0 = arith.constant 0 : i32
    %c0_i32_1 = arith.constant 0 : i32
    return %c0_i32, %c0_i32_0 : i32, i32
  }
  func.func @transform_2(%arg0: i32) -> (i32, i32) {
    %c0_i32 = arith.constant 0 : i32
    %c0_i32_0 = arith.constant 0 : i32
    return %arg0, %c0_i32 : i32, i32
  }
  func.func @transform_3(%arg0: i32) -> (i32, i32, i32) {
    %c0_i32 = arith.constant 0 : i32
    %c0_i32_0 = arith.constant 0 : i32
    %c0_i32_1 = arith.constant 0 : i32
    return %arg0, %c0_i32, %c0_i32_0 : i32, i32, i32
  }
}

module attributes {stable_mosaic.version = 11 : i64} {
  func.func @_matmul_stats_kernel(%arg0: i32, %arg1: memref<32x512xbf16, #tpu.memory_space<vmem>>, %arg2: memref<512x128xbf16, #tpu.memory_space<vmem>>, %arg3: memref<32x128xbf16, #tpu.memory_space<vmem>>, %arg4: memref<1x2x128xf32, #tpu.memory_space<vmem>>) attributes {dimension_semantics = [#tpu.dimension_semantics<parallel>], iteration_bounds = array<i64: 2>, scalar_prefetch = 0 : i64, scratch_operands = 0 : i64, tpu.core_type = #tpu.core_type<tc>, window_params = [{transform_indices = @transform_0, window_bounds = array<i64: 32, 512>}, {pipeline_mode = #tpu.pipeline_mode<synchronous>, transform_indices = @transform_1, window_bounds = array<i64: 512, 128>}, {transform_indices = @transform_2, window_bounds = array<i64: 32, 128>}, {transform_indices = @transform_3, window_bounds = array<i64: 1, 2, 128>}]} {
    %c0 = arith.constant 0 : index
    %c0_0 = arith.constant 0 : index
    %0 = vector.load %arg1[%c0, %c0_0] : memref<32x512xbf16, #tpu.memory_space<vmem>>, vector<32x512xbf16>
    %c0_1 = arith.constant 0 : index
    %c0_2 = arith.constant 0 : index
    %1 = vector.load %arg2[%c0_1, %c0_2] : memref<512x128xbf16, #tpu.memory_space<vmem>>, vector<512x128xbf16>
    %cst = arith.constant dense<0.000000e+00> : vector<32x128xf32>
    %2 = tpu.matmul %0, %1, %cst {dimension_numbers = #tpu.dot_dimension_numbers<[1], [0], [0], [1], [0, 0, 1, 1], [], []>} : vector<32x512xbf16>, vector<512x128xbf16>, vector<32x128xf32> -> vector<32x128xf32>
    %3 = arith.truncf %2 : vector<32x128xf32> to vector<32x128xbf16>
    %c0_3 = arith.constant 0 : index
    %c0_4 = arith.constant 0 : index
    %4 = vector.load %arg3[%c0_3, %c0_4] : memref<32x128xbf16, #tpu.memory_space<vmem>>, vector<32x128xbf16>
    tpu.vector_store %arg3[%c0_3, %c0_4], %3 {strides = array<i32>} : memref<32x128xbf16, #tpu.memory_space<vmem>>, vector<32x128xbf16>,
    %cst_5 = arith.constant dense<0.000000e+00> : vector<128xf32>
    %5 = vector.multi_reduction <add>, %2, %cst_5 [0] : vector<32x128xf32> to vector<128xf32>
    %6 = vector.shape_cast %5 : vector<128xf32> to vector<1x128xf32>
    %7 = arith.mulf %2, %2 : vector<32x128xf32>
    %cst_6 = arith.constant dense<0.000000e+00> : vector<128xf32>
    %8 = vector.multi_reduction <add>, %7, %cst_6 [0] : vector<32x128xf32> to vector<128xf32>
    %9 = vector.shape_cast %8 : vector<128xf32> to vector<1x128xf32>
    %10 = tpu.concatenate %6, %9 in 0 : vector<1x128xf32>, vector<1x128xf32> -> vector<2x128xf32>
    %11 = vector.shape_cast %10 : vector<2x128xf32> to vector<1x2x128xf32>
    %c0_7 = arith.constant 0 : index
    %c0_8 = arith.constant 0 : index
    %c0_9 = arith.constant 0 : index
    %12 = vector.load %arg4[%c0_7, %c0_8, %c0_9] : memref<1x2x128xf32, #tpu.memory_space<vmem>>, vector<1x2x128xf32>
    tpu.vector_store %arg4[%c0_7, %c0_8, %c0_9], %11 {strides = array<i32>} : memref<1x2x128xf32, #tpu.memory_space<vmem>>, vector<1x2x128xf32>,
    return
  }
  func.func @transform_0(%arg0: i32) -> (i32, i32) {
    %c0_i32 = arith.constant 0 : i32
    %c0_i32_0 = arith.constant 0 : i32
    return %arg0, %c0_i32 : i32, i32
  }
  func.func @transform_1(%arg0: i32) -> (i32, i32) {
    %c0_i32 = arith.constant 0 : i32
    %c0_i32_0 = arith.constant 0 : i32
    %c0_i32_1 = arith.constant 0 : i32
    return %c0_i32, %c0_i32_0 : i32, i32
  }
  func.func @transform_2(%arg0: i32) -> (i32, i32) {
    %c0_i32 = arith.constant 0 : i32
    %c0_i32_0 = arith.constant 0 : i32
    return %arg0, %c0_i32 : i32, i32
  }
  func.func @transform_3(%arg0: i32) -> (i32, i32, i32) {
    %c0_i32 = arith.constant 0 : i32
    %c0_i32_0 = arith.constant 0 : i32
    %c0_i32_1 = arith.constant 0 : i32
    return %arg0, %c0_i32, %c0_i32_0 : i32, i32, i32
  }
}

module attributes {stable_mosaic.version = 11 : i64} {
  func.func @_scale_shift_act_kernel(%arg0: i32, %arg1: memref<32x128xbf16, #tpu.memory_space<vmem>>, %arg2: memref<1x128xf32, #tpu.memory_space<vmem>>, %arg3: memref<1x128xf32, #tpu.memory_space<vmem>>, %arg4: memref<32x128xbf16, #tpu.memory_space<vmem>>) attributes {dimension_semantics = [#tpu.dimension_semantics<parallel>], iteration_bounds = array<i64: 2>, scalar_prefetch = 0 : i64, scratch_operands = 0 : i64, tpu.core_type = #tpu.core_type<tc>, window_params = [{transform_indices = @transform_0, window_bounds = array<i64: 32, 128>}, {pipeline_mode = #tpu.pipeline_mode<synchronous>, transform_indices = @transform_1, window_bounds = array<i64: 1, 128>}, {pipeline_mode = #tpu.pipeline_mode<synchronous>, transform_indices = @transform_2, window_bounds = array<i64: 1, 128>}, {transform_indices = @transform_3, window_bounds = array<i64: 32, 128>}]} {
    %c0 = arith.constant 0 : index
    %c0_0 = arith.constant 0 : index
    %0 = vector.load %arg1[%c0, %c0_0] : memref<32x128xbf16, #tpu.memory_space<vmem>>, vector<32x128xbf16>
    %1 = arith.extf %0 : vector<32x128xbf16> to vector<32x128xf32>
    %c0_1 = arith.constant 0 : index
    %c0_2 = arith.constant 0 : index
    %2 = vector.load %arg2[%c0_1, %c0_2] : memref<1x128xf32, #tpu.memory_space<vmem>>, vector<1x128xf32>
    %3 = vector.broadcast %2 : vector<1x128xf32> to vector<32x128xf32>
    %4 = arith.mulf %1, %3 : vector<32x128xf32>
    %c0_3 = arith.constant 0 : index
    %c0_4 = arith.constant 0 : index
    %5 = vector.load %arg3[%c0_3, %c0_4] : memref<1x128xf32, #tpu.memory_space<vmem>>, vector<1x128xf32>
    %6 = vector.broadcast %5 : vector<1x128xf32> to vector<32x128xf32>
    %7 = arith.addf %4, %6 : vector<32x128xf32>
    %cst = arith.constant 0.000000e+00 : f32
    %8 = vector.broadcast %cst : f32 to vector<32x128xf32>
    %9 = arith.cmpf ogt, %7, %8 : vector<32x128xf32>
    %cst_5 = arith.constant 2.000000e-01 : f32
    %10 = vector.broadcast %cst_5 : f32 to vector<32x128xf32>
    %11 = arith.mulf %10, %7 : vector<32x128xf32>
    %12 = arith.select %9, %7, %11 : vector<32x128xi1>, vector<32x128xf32>
    %13 = arith.truncf %12 : vector<32x128xf32> to vector<32x128xbf16>
    %c0_6 = arith.constant 0 : index
    %c0_7 = arith.constant 0 : index
    %14 = vector.load %arg4[%c0_6, %c0_7] : memref<32x128xbf16, #tpu.memory_space<vmem>>, vector<32x128xbf16>
    tpu.vector_store %arg4[%c0_6, %c0_7], %13 {strides = array<i32>} : memref<32x128xbf16, #tpu.memory_space<vmem>>, vector<32x128xbf16>,
    return
  }
  func.func @transform_0(%arg0: i32) -> (i32, i32) {
    %c0_i32 = arith.constant 0 : i32
    %c0_i32_0 = arith.constant 0 : i32
    return %arg0, %c0_i32 : i32, i32
  }
  func.func @transform_1(%arg0: i32) -> (i32, i32) {
    %c0_i32 = arith.constant 0 : i32
    %c0_i32_0 = arith.constant 0 : i32
    %c0_i32_1 = arith.constant 0 : i32
    return %c0_i32, %c0_i32_0 : i32, i32
  }
  func.func @transform_2(%arg0: i32) -> (i32, i32) {
    %c0_i32 = arith.constant 0 : i32
    %c0_i32_0 = arith.constant 0 : i32
    %c0_i32_1 = arith.constant 0 : i32
    return %c0_i32, %c0_i32_0 : i32, i32
  }
  func.func @transform_3(%arg0: i32) -> (i32, i32) {
    %c0_i32 = arith.constant 0 : i32
    %c0_i32_0 = arith.constant 0 : i32
    return %arg0, %c0_i32 : i32, i32
  }
}

module attributes {stable_mosaic.version = 11 : i64} {
  func.func @_matmul_act_kernel(%arg0: i32, %arg1: memref<8x256xbf16, #tpu.memory_space<vmem>>, %arg2: memref<256x128xbf16, #tpu.memory_space<vmem>>, %arg3: memref<8x128xf32, #tpu.memory_space<vmem>>) attributes {dimension_semantics = [#tpu.dimension_semantics<parallel>], iteration_bounds = array<i64: 2>, scalar_prefetch = 0 : i64, scratch_operands = 0 : i64, tpu.core_type = #tpu.core_type<tc>, window_params = [{transform_indices = @transform_0, window_bounds = array<i64: 8, 256>}, {pipeline_mode = #tpu.pipeline_mode<synchronous>, transform_indices = @transform_1, window_bounds = array<i64: 256, 128>}, {transform_indices = @transform_2, window_bounds = array<i64: 8, 128>}]} {
    %c0 = arith.constant 0 : index
    %c0_0 = arith.constant 0 : index
    %0 = vector.load %arg1[%c0, %c0_0] : memref<8x256xbf16, #tpu.memory_space<vmem>>, vector<8x256xbf16>
    %c0_1 = arith.constant 0 : index
    %c0_2 = arith.constant 0 : index
    %1 = vector.load %arg2[%c0_1, %c0_2] : memref<256x128xbf16, #tpu.memory_space<vmem>>, vector<256x128xbf16>
    %cst = arith.constant dense<0.000000e+00> : vector<8x128xf32>
    %2 = tpu.matmul %0, %1, %cst {dimension_numbers = #tpu.dot_dimension_numbers<[1], [0], [0], [1], [0, 0, 1, 1], [], []>} : vector<8x256xbf16>, vector<256x128xbf16>, vector<8x128xf32> -> vector<8x128xf32>
    %c0_3 = arith.constant 0 : index
    %c0_4 = arith.constant 0 : index
    %3 = vector.load %arg3[%c0_3, %c0_4] : memref<8x128xf32, #tpu.memory_space<vmem>>, vector<8x128xf32>
    tpu.vector_store %arg3[%c0_3, %c0_4], %2 {strides = array<i32>} : memref<8x128xf32, #tpu.memory_space<vmem>>, vector<8x128xf32>,
    return
  }
  func.func @transform_0(%arg0: i32) -> (i32, i32) {
    %c0_i32 = arith.constant 0 : i32
    %c0_i32_0 = arith.constant 0 : i32
    return %arg0, %c0_i32 : i32, i32
  }
  func.func @transform_1(%arg0: i32) -> (i32, i32) {
    %c0_i32 = arith.constant 0 : i32
    %c0_i32_0 = arith.constant 0 : i32
    %c0_i32_1 = arith.constant 0 : i32
    return %c0_i32, %c0_i32_0 : i32, i32
  }
  func.func @transform_2(%arg0: i32) -> (i32, i32) {
    %c0_i32 = arith.constant 0 : i32
    %c0_i32_0 = arith.constant 0 : i32
    return %arg0, %c0_i32 : i32, i32
  }
}

</mosaic_0001>

<bundles_post_ra>
// kernel: discriminator_forward.8
= control target key start
LH: loop header
LB: loop body
LE: loop exit
PB: predicated region body
PF: predicated region fallthrough
CT: control target
= control target key end

     0   :  { %s3494_s9 = smov 0   ;;  %s3720_s0 = inlined_call_operand.vmem [shape: bf16[4096,16], index: 0, kind: input, shape index: {}]   ;;  %s3721_s1 = inlined_call_operand.vmem [shape: bf16[16,128], index: 1, kind: input, shape index: {}]   ;;  %s3722_s2 = inlined_call_operand.vmem [shape: bf16[4096,128], index: 2, kind: output, shape index: {}]  }
   0x1 LB: > { %s2422_s10 = sadd.s32 4294967295, %s3477_s9   ;;  %p2426_p0 = scmp.ge.s32.totalorder %s3477_s9, 1  ;;  %s3477_s9 = sphi %s3494_s9, %s12_s9  }
   0x2   : > { %p113_p1 = scmp.lt.s32.totalorder %s3477_s9, 5 }
   0x4   : > { %p114_p2 = pnand %p2426_p0, %p113_p1 }
   0x5   : > { %s2427_s13 = sshll.u32 (!%p114_p2), %s2422_s10, 7 }
   0x6   : > { %117 = sbr.rel (%p114_p2) target bundleno = 342 (0x156), region = 28  ;;  %p136_p3 = scmp.lt.s32.totalorder (!%p114_p2), %s2427_s13, 511 }
   0xb   : > { %v3406_v0 = vld [vmem:[%s3721_s1] sm:$0xff]   ;;  %s3724_s13 = smov (!%p136_p3, %s2427_s13), 511  ;;  %vm604_vm0 = vcmask 130048  }
   0xc   : > { %3266 = vmatprep.subr.bf16.mxu0 %v3406_v0  ;;  %3396 = vmatprep.subr.bf16.mxu1 %v3406_v0  ;;  %s2428_s14 = sshll.u32 %s3724_s13, 2 }
   0xd   : > { %3267 = vmatpush3.bf16.msra.mxu0 %v3406_v0  ;;  %3397 = vmatpush3.bf16.msra.mxu1 %v3406_v0  ;;  %s3513_s17 = scalar_lea.vmem %s3720_s0, %s2428_s14  ;;  %s3648_s20 = scalar_lea.vmem %s3722_s2, %s2428_s14 }
   0xe   : > { %v3407_v1 = vld [vmem:[%s3513_s17] sm:$0xff]   ;;  %v3409_v3 = vld [vmem:[%s3513_s17 + $0x8] sm:$0xff]   ;;  %v3411_v5 = vld [vmem:[%s3513_s17 + $0x10] sm:$0xff]  }
   0xf   : > { %v3408_v2 = vld [vmem:[%s3513_s17 + $0x100] sm:$0xff]   ;;  %3268 = vmatprep.mubr.msk.bf16.mxu0 %vm604_vm0, %v3407_v1  ;;  %v3410_v4 = vld [vmem:[%s3513_s17 + $0x108] sm:$0xff]   ;;  %v3412_v6 = vld [vmem:[%s3513_s17 + $0x110] sm:$0xff]  }
  0x10   : > { %3332 = vmatprep.mubr.msk.bf16.mxu1 %vm604_vm0, %v3408_v2  ;;  %3269 = vmatmul.mubr.msk.bf16.vlgmr.msra.gmra.mxu0 %vm604_vm0, %v3409_v3  ;;  %v3413_v7 = vld [vmem:[%s3513_s17 + $0x18] sm:$0xff]   ;;  %v3415_v9 = vld [vmem:[%s3513_s17 + $0x20] sm:$0xff]   ;;  %v3417_v11 = vld [vmem:[%s3513_s17 + $0x28] sm:$0xff]  }
  0x11   : > { %3333 = vmatmul.mubr.msk.bf16.vlgmr.msra.gmra.mxu1 %vm604_vm0, %v3410_v4  ;;  %3272 = vmatprep.mubr.msk.bf16.mxu0 %vm604_vm0, %v3411_v5  ;;  %v3414_v8 = vld [vmem:[%s3513_s17 + $0x118] sm:$0xff]   ;;  %v3416_v10 = vld [vmem:[%s3513_s17 + $0x120] sm:$0xff]   ;;  %v3418_v12 = vld [vmem:[%s3513_s17 + $0x128] sm:$0xff]  }
  0x12   : > { %3336 = vmatprep.mubr.msk.bf16.mxu1 %vm604_vm0, %v3412_v6  ;;  %v3419_v13 = vld [vmem:[%s3513_s17 + $0x30] sm:$0xff]   ;;  %v3421_v15 = vld [vmem:[%s3513_s17 + $0x38] sm:$0xff]   ;;  %v3423_v17 = vld [vmem:[%s3513_s17 + $0x40] sm:$0xff]  }
  0x13   : > { %v3420_v14 = vld [vmem:[%s3513_s17 + $0x130] sm:$0xff]   ;;  %v3422_v16 = vld [vmem:[%s3513_s17 + $0x138] sm:$0xff]   ;;  %v3424_v18 = vld [vmem:[%s3513_s17 + $0x140] sm:$0xff]  }
  0x14   : > { %v3425_v19 = vld [vmem:[%s3513_s17 + $0x48] sm:$0xff]   ;;  %v3427_v21 = vld [vmem:[%s3513_s17 + $0x50] sm:$0xff]   ;;  %v3429_v23 = vld [vmem:[%s3513_s17 + $0x58] sm:$0xff]  }
  0x15   : > { %v3426_v20 = vld [vmem:[%s3513_s17 + $0x148] sm:$0xff]   ;;  %v3428_v22 = vld [vmem:[%s3513_s17 + $0x150] sm:$0xff]   ;;  %v3430_v24 = vld [vmem:[%s3513_s17 + $0x158] sm:$0xff]  }
  0x16   : > { %v3431_v25 = vld [vmem:[%s3513_s17 + $0x60] sm:$0xff]   ;;  %v3433_v27 = vld [vmem:[%s3513_s17 + $0x68] sm:$0xff]   ;;  %v3435_v29 = vld [vmem:[%s3513_s17 + $0x70] sm:$0xff]  }
  0x17   : > { %v3432_v26 = vld [vmem:[%s3513_s17 + $0x160] sm:$0xff]   ;;  %v3434_v28 = vld [vmem:[%s3513_s17 + $0x168] sm:$0xff]   ;;  %v3436_v30 = vld [vmem:[%s3513_s17 + $0x170] sm:$0xff]  }
  0x18   : > { %3273 = vmatmul.mubr.msk.bf16.gmra.mxu0 %vm604_vm0, %v3413_v7  ;;  %v3437_v31 = vld [vmem:[%s3513_s17 + $0x78] sm:$0xff]   ;;  %v3439_v33 = vld [vmem:[%s3513_s17 + $0x80] sm:$0xff]   ;;  %v3441_v35 = vld [vmem:[%s3513_s17 + $0x88] sm:$0xff]  }
  0x19   : > { %3337 = vmatmul.mubr.msk.bf16.gmra.mxu1 %vm604_vm0, %v3414_v8  ;;  %3276 = vmatprep.mubr.msk.bf16.mxu0 %vm604_vm0, %v3415_v9  ;;  %v3438_v32 = vld [vmem:[%s3513_s17 + $0x178] sm:$0xff]   ;;  %v3440_v34 = vld [vmem:[%s3513_s17 + $0x180] sm:$0xff]   ;;  %v3442_v36 = vld [vmem:[%s3513_s17 + $0x188] sm:$0xff]  }
  0x1a   : > { %3340 = vmatprep.mubr.msk.bf16.mxu1 %vm604_vm0, %v3416_v10  ;;  %v3443_v37 = vld [vmem:[%s3513_s17 + $0x90] sm:$0xff]   ;;  %v3445_v39 = vld [vmem:[%s3513_s17 + $0x98] sm:$0xff]   ;;  %v3447_v41 = vld [vmem:[%s3513_s17 + $0xa0] sm:$0xff]  }
  0x1b   : > { %v3444_v38 = vld [vmem:[%s3513_s17 + $0x190] sm:$0xff]   ;;  %v3446_v40 = vld [vmem:[%s3513_s17 + $0x198] sm:$0xff]   ;;  %v3448_v42 = vld [vmem:[%s3513_s17 + $0x1a0] sm:$0xff]  }
  0x1c   : > { %v3449_v43 = vld [vmem:[%s3513_s17 + $0xa8] sm:$0xff]   ;;  %v3451_v45 = vld [vmem:[%s3513_s17 + $0xb0] sm:$0xff]   ;;  %v3453_v47 = vld [vmem:[%s3513_s17 + $0xb8] sm:$0xff]  }
  0x1d   : > { %v3450_v44 = vld [vmem:[%s3513_s17 + $0x1a8] sm:$0xff]   ;;  %v3452_v46 = vld [vmem:[%s3513_s17 + $0x1b0] sm:$0xff]   ;;  %v3454_v48 = vld [vmem:[%s3513_s17 + $0x1b8] sm:$0xff]  }
  0x1e   : > { %v3455_v49 = vld [vmem:[%s3513_s17 + $0xc0] sm:$0xff]   ;;  %v3457_v51 = vld [vmem:[%s3513_s17 + $0xc8] sm:$0xff]   ;;  %v3459_v53 = vld [vmem:[%s3513_s17 + $0xd0] sm:$0xff]  }
  0x1f   : > { %v3456_v50 = vld [vmem:[%s3513_s17 + $0x1c0] sm:$0xff]   ;;  %v3458_v52 = vld [vmem:[%s3513_s17 + $0x1c8] sm:$0xff]   ;;  %v3460_v54 = vld [vmem:[%s3513_s17 + $0x1d0] sm:$0xff]  }
  0x20   : > { %3277 = vmatmul.mubr.msk.bf16.gmra.mxu0 %vm604_vm0, %v3417_v11  ;;  %v3461_v55 = vld [vmem:[%s3513_s17 + $0xd8] sm:$0xff]   ;;  %v3463_v57 = vld [vmem:[%s3513_s17 + $0xe0] sm:$0xff]   ;;  %v3465_v59 = vld [vmem:[%s3513_s17 + $0xe8] sm:$0xff]  }
  0x21   : > { %3341 = vmatmul.mubr.msk.bf16.gmra.mxu1 %vm604_vm0, %v3418_v12  ;;  %3280 = vmatprep.mubr.msk.bf16.mxu0 %vm604_vm0, %v3419_v13  ;;  %v3462_v56 = vld [vmem:[%s3513_s17 + $0x1d8] sm:$0xff]   ;;  %v3464_v58 = vld [vmem:[%s3513_s17 + $0x1e0] sm:$0xff]   ;;  %v3466_v60 = vld [vmem:[%s3513_s17 + $0x1e8] sm:$0xff]  }
  0x22   : > { %3344 = vmatprep.mubr.msk.bf16.mxu1 %vm604_vm0, %v3420_v14  ;;  %v3467_v61 = vld [vmem:[%s3513_s17 + $0xf0] sm:$0xff]   ;;  %v3469_v63 = vld [vmem:[%s3513_s17 + $0xf8] sm:$0xff]  }
  0x23   : > { %v3468_v62 = vld [vmem:[%s3513_s17 + $0x1f0] sm:$0xff]   ;;  %v3470_v0 = vld [vmem:[%s3513_s17 + $0x1f8] sm:$0xff]  }
  0x28   : > { %3281 = vmatmul.mubr.msk.bf16.gmra.mxu0 %vm604_vm0, %v3421_v15 }
  0x29   : > { %3345 = vmatmul.mubr.msk.bf16.gmra.mxu1 %vm604_vm0, %v3422_v16  ;;  %3284 = vmatprep.mubr.msk.bf16.mxu0 %vm604_vm0, %v3423_v17 }
  0x2a   : > { %3348 = vmatprep.mubr.msk.bf16.mxu1 %vm604_vm0, %v3424_v18 }
  0x30   : > { %3285 = vmatmul.mubr.msk.bf16.gmra.mxu0 %vm604_vm0, %v3425_v19 }
  0x31   : > { %3349 = vmatmul.mubr.msk.bf16.gmra.mxu1 %vm604_vm0, %v3426_v20  ;;  %3288 = vmatprep.mubr.msk.bf16.mxu0 %vm604_vm0, %v3427_v21 }
  0x32   : > { %3352 = vmatprep.mubr.msk.bf16.mxu1 %vm604_vm0, %v3428_v22 }
  0x38   : > { %3289 = vmatmul.mubr.msk.bf16.gmra.mxu0 %vm604_vm0, %v3429_v23 }
  0x39   : > { %3353 = vmatmul.mubr.msk.bf16.gmra.mxu1 %vm604_vm0, %v3430_v24  ;;  %3292 = vmatprep.mubr.msk.bf16.mxu0 %vm604_vm0, %v3431_v25 }
  0x3a   : > { %3356 = vmatprep.mubr.msk.bf16.mxu1 %vm604_vm0, %v3432_v26 }
  0x40   : > { %3293 = vmatmul.mubr.msk.bf16.gmra.mxu0 %vm604_vm0, %v3433_v27 }
  0x41   : > { %3357 = vmatmul.mubr.msk.bf16.gmra.mxu1 %vm604_vm0, %v3434_v28  ;;  %3296 = vmatprep.mubr.msk.bf16.mxu0 %vm604_vm0, %v3435_v29 }
  0x42   : > { %3360 = vmatprep.mubr.msk.bf16.mxu1 %vm604_vm0, %v3436_v30 }
  0x48   : > { %3297 = vmatmul.mubr.msk.bf16.gmra.mxu0 %vm604_vm0, %v3437_v31 }
  0x49   : > { %3361 = vmatmul.mubr.msk.bf16.gmra.mxu1 %vm604_vm0, %v3438_v32  ;;  %3300 = vmatprep.mubr.msk.bf16.mxu0 %vm604_vm0, %v3439_v33 }
  0x4a   : > { %3364 = vmatprep.mubr.msk.bf16.mxu1 %vm604_vm0, %v3440_v34 }
  0x50   : > { %3301 = vmatmul.mubr.msk.bf16.gmra.mxu0 %vm604_vm0, %v3441_v35 }
  0x51   : > { %3365 = vmatmul.mubr.msk.bf16.gmra.mxu1 %vm604_vm0, %v3442_v36  ;;  %3304 = vmatprep.mubr.msk.bf16.mxu0 %vm604_vm0, %v3443_v37 }
  0x52   : > { %3368 = vmatprep.mubr.msk.bf16.mxu1 %vm604_vm0, %v3444_v38 }
  0x58   : > { %3305 = vmatmul.mubr.msk.bf16.gmra.mxu0 %vm604_vm0, %v3445_v39 }
  0x59   : > { %3369 = vmatmul.mubr.msk.bf16.gmra.mxu1 %vm604_vm0, %v3446_v40  ;;  %3308 = vmatprep.mubr.msk.bf16.mxu0 %vm604_vm0, %v3447_v41 }
  0x5a   : > { %3372 = vmatprep.mubr.msk.bf16.mxu1 %vm604_vm0, %v3448_v42 }
  0x60   : > { %3309 = vmatmul.mubr.msk.bf16.gmra.mxu0 %vm604_vm0, %v3449_v43 }
  0x61   : > { %3373 = vmatmul.mubr.msk.bf16.gmra.mxu1 %vm604_vm0, %v3450_v44  ;;  %3312 = vmatprep.mubr.msk.bf16.mxu0 %vm604_vm0, %v3451_v45 }
  0x62   : > { %3376 = vmatprep.mubr.msk.bf16.mxu1 %vm604_vm0, %v3452_v46 }
  0x68   : > { %3313 = vmatmul.mubr.msk.bf16.gmra.mxu0 %vm604_vm0, %v3453_v47 }
  0x69   : > { %3377 = vmatmul.mubr.msk.bf16.gmra.mxu1 %vm604_vm0, %v3454_v48  ;;  %3316 = vmatprep.mubr.msk.bf16.mxu0 %vm604_vm0, %v3455_v49 }
  0x6a   : > { %3380 = vmatprep.mubr.msk.bf16.mxu1 %vm604_vm0, %v3456_v50 }
  0x70   : > { %3317 = vmatmul.mubr.msk.bf16.gmra.mxu0 %vm604_vm0, %v3457_v51 }
  0x71   : > { %3381 = vmatmul.mubr.msk.bf16.gmra.mxu1 %vm604_vm0, %v3458_v52  ;;  %3320 = vmatprep.mubr.msk.bf16.mxu0 %vm604_vm0, %v3459_v53 }
  0x72   : > { %3384 = vmatprep.mubr.msk.bf16.mxu1 %vm604_vm0, %v3460_v54 }
  0x78   : > { %3321 = vmatmul.mubr.msk.bf16.gmra.mxu0 %vm604_vm0, %v3461_v55 }
  0x79   : > { %3385 = vmatmul.mubr.msk.bf16.gmra.mxu1 %vm604_vm0, %v3462_v56  ;;  %3324 = vmatprep.mubr.msk.bf16.mxu0 %vm604_vm0, %v3463_v57 }
  0x7a   : > { %3388 = vmatprep.mubr.msk.bf16.mxu1 %vm604_vm0, %v3464_v58 }
  0x80   : > { %3325 = vmatmul.mubr.msk.bf16.gmra.mxu0 %vm604_vm0, %v3465_v59 }
  0x81   : > { %3389 = vmatmul.mubr.msk.bf16.gmra.mxu1 %vm604_vm0, %v3466_v60  ;;  %3328 = vmatprep.mubr.msk.bf16.mxu0 %vm604_vm0, %v3467_v61 }
  0x82   : > { %3392 = vmatprep.mubr.msk.bf16.mxu1 %vm604_vm0, %v3468_v62 }
  0x88   : > { %3329 = vmatmul.mubr.msk.bf16.gmra.mxu0 %vm604_vm0, %v3469_v63 }
  0x89   : > { %3393 = vmatmul.mubr.msk.bf16.gmra.mxu1 %vm604_vm0, %v3470_v0 }
  0xd0   : > { %v3270_v1 = vpop.f32.mrf.mxu0 }
  0xd1   : > { %v1472_v2 = vmul.f32 0.2, %v3270_v1  ;;  %v3334_v3 = vpop.f32.mrf.mxu1  ;;  %vm1344_vm1 = vcmp.gt.f32.partialorder %v3270_v1, 0.0 }
  0xd2   : > { %v1536_v4 = vmul.f32 0.2, %v3334_v3  ;;  %v831_v5 = vpop.f32.mrf.mxu0  ;;  %vm1408_vm2 = vcmp.gt.f32.partialorder %v3334_v3, 0.0 }
  0xd3   : > { %v1470_v6 = vmul.f32 0.2, %v831_v5  ;;  %v1087_v7 = vpop.f32.mrf.mxu1  ;;  %vm1342_vm3 = vcmp.gt.f32.partialorder %v831_v5, 0.0  ;;  %v1600_v9 = vsel %vm1344_vm1, %v3270_v1, %v1472_v2 }
  0xd4   : > { %v3271_v8 = vpop.f32.mrf.mxu0  ;;  %v1534_v10 = vmul.f32 0.2, %v1087_v7  ;;  %v1664_v13 = vsel %vm1408_vm2, %v3334_v3, %v1536_v4  ;;  %vm1406_vm5 = vcmp.gt.f32.partialorder %v1087_v7, 0.0 }
  0xd5   : > { %vm1345_vm4 = vcmp.gt.f32.partialorder %v3271_v8, 0.0  ;;  %v1473_v11 = vmul.f32 0.2, %v3271_v8  ;;  %v3335_v12 = vpop.f32.mrf.mxu1  ;;  %v1598_v16 = vsel %vm1342_vm3, %v831_v5, %v1470_v6 }
  0xd6   : > { %vm1409_vm6 = vcmp.gt.f32.partialorder %v3335_v12, 0.0  ;;  %v1537_v14 = vmul.f32 0.2, %v3335_v12  ;;  %v834_v15 = vpop.f32.mrf.mxu0  ;;  %v1662_v24 = vsel %vm1406_vm5, %v1087_v7, %v1534_v10 }
  0xd7   : > { %v1601_v17 = vsel %vm1345_vm4, %v3271_v8, %v1473_v11  ;;  %vm1343_vm7 = vcmp.gt.f32.partialorder %v834_v15, 0.0  ;;  %v1471_v18 = vmul.f32 0.2, %v834_v15  ;;  %v1090_v19 = vpop.f32.mrf.mxu1 }
  0xd8   : > { %v2826_v20 = vpack.c.bf16 %v1601_v17, %v1600_v9  ;;  %v1665_v21 = vsel %vm1409_vm6, %v3335_v12, %v1537_v14  ;;  %vm1407_vm8 = vcmp.gt.f32.partialorder %v1090_v19, 0.0  ;;  %v1535_v22 = vmul.f32 0.2, %v1090_v19  ;;  %v3274_v23 = vpop.f32.mrf.mxu0 }
  0xd9   : > { %v2986_v25 = vpack.c.bf16 %v1665_v21, %v1664_v13  ;;  %v1599_v26 = vsel %vm1343_vm7, %v834_v15, %v1471_v18  ;;  %v1476_v27 = vmul.f32 0.2, %v3274_v23  ;;  %v3338_v28 = vpop.f32.mrf.mxu1  ;;  %vm1348_vm9 = vcmp.gt.f32.partialorder %v3274_v23, 0.0 }
  0xda   : > { %3138 = vst [vmem:[%s3648_s20 + $0x8] sm:$0xff] %v2826_v20   ;;  %v2821_v29 = vpack.c.bf16 %v1599_v26, %v1598_v16  ;;  %v1663_v30 = vsel %vm1407_vm8, %v1090_v19, %v1535_v22  ;;  %v1540_v31 = vmul.f32 0.2, %v3338_v28  ;;  %v847_v32 = vpop.f32.mrf.mxu0  ;;  %vm1412_vm10 = vcmp.gt.f32.partialorder %v3338_v28, 0.0 }
  0xdb   : > { %3170 = vst [vmem:[%s3648_s20 + $0x108] sm:$0xff] %v2986_v25   ;;  %v2981_v33 = vpack.c.bf16 %v1663_v30, %v1662_v24  ;;  %v1474_v34 = vmul.f32 0.2, %v847_v32  ;;  %v1103_v35 = vpop.f32.mrf.mxu1  ;;  %vm1346_vm11 = vcmp.gt.f32.partialorder %v847_v32, 0.0  ;;  %v1604_v37 = vsel %vm1348_vm9, %v3274_v23, %v1476_v27 }
  0xdc   : > { %2822 = vst [vmem:[%s3648_s20] sm:$0xff] %v2821_v29   ;;  %v3275_v36 = vpop.f32.mrf.mxu0  ;;  %v1538_v38 = vmul.f32 0.2, %v1103_v35  ;;  %v1668_v41 = vsel %vm1412_vm10, %v3338_v28, %v1540_v31  ;;  %vm1410_vm13 = vcmp.gt.f32.partialorder %v1103_v35, 0.0 }
  0xdd   : > { %3169 = vst [vmem:[%s3648_s20 + $0x100] sm:$0xff] %v2981_v33   ;;  %vm1349_vm12 = vcmp.gt.f32.partialorder %v3275_v36, 0.0  ;;  %v1477_v39 = vmul.f32 0.2, %v3275_v36  ;;  %v3339_v40 = vpop.f32.mrf.mxu1  ;;  %v1602_v44 = vsel %vm1346_vm11, %v847_v32, %v1474_v34 }
  0xde   : > { %vm1413_vm14 = vcmp.gt.f32.partialorder %v3339_v40, 0.0  ;;  %v1541_v42 = vmul.f32 0.2, %v3339_v40  ;;  %v850_v43 = vpop.f32.mrf.mxu0  ;;  %v1666_v52 = vsel %vm1410_vm13, %v1103_v35, %v1538_v38 }
  0xdf   : > { %v1605_v45 = vsel %vm1349_vm12, %v3275_v36, %v1477_v39  ;;  %vm1347_vm15 = vcmp.gt.f32.partialorder %v850_v43, 0.0  ;;  %v1475_v46 = vmul.f32 0.2, %v850_v43  ;;  %v1106_v47 = vpop.f32.mrf.mxu1 }
  0xe0   : > { %v2836_v48 = vpack.c.bf16 %v1605_v45, %v1604_v37  ;;  %v1669_v49 = vsel %vm1413_vm14, %v3339_v40, %v1541_v42  ;;  %vm1411_vm0 = vcmp.gt.f32.partialorder %v1106_v47, 0.0  ;;  %v1539_v50 = vmul.f32 0.2, %v1106_v47  ;;  %v3278_v51 = vpop.f32.mrf.mxu0 }
  0xe1   : > { %v2996_v53 = vpack.c.bf16 %v1669_v49, %v1668_v41  ;;  %v1603_v54 = vsel %vm1347_vm15, %v850_v43, %v1475_v46  ;;  %v1480_v55 = vmul.f32 0.2, %v3278_v51  ;;  %v3342_v56 = vpop.f32.mrf.mxu1  ;;  %vm1352_vm1 = vcmp.gt.f32.partialorder %v3278_v51, 0.0 }
  0xe2   : > { %3140 = vst [vmem:[%s3648_s20 + $0x18] sm:$0xff] %v2836_v48   ;;  %v2831_v57 = vpack.c.bf16 %v1603_v54, %v1602_v44  ;;  %v1667_v58 = vsel %vm1411_vm0, %v1106_v47, %v1539_v50  ;;  %v1544_v59 = vmul.f32 0.2, %v3342_v56  ;;  %v863_v60 = vpop.f32.mrf.mxu0  ;;  %vm1416_vm2 = vcmp.gt.f32.partialorder %v3342_v56, 0.0 }
  0xe3   : > { %3172 = vst [vmem:[%s3648_s20 + $0x118] sm:$0xff] %v2996_v53   ;;  %v2991_v61 = vpack.c.bf16 %v1667_v58, %v1666_v52  ;;  %v1478_v62 = vmul.f32 0.2, %v863_v60  ;;  %v1119_v63 = vpop.f32.mrf.mxu1  ;;  %vm1350_vm3 = vcmp.gt.f32.partialorder %v863_v60, 0.0  ;;  %v1608_v1 = vsel %vm1352_vm1, %v3278_v51, %v1480_v55 }
  0xe4   : > { %3139 = vst [vmem:[%s3648_s20 + $0x10] sm:$0xff] %v2831_v57   ;;  %v3279_v0 = vpop.f32.mrf.mxu0  ;;  %v1542_v2 = vmul.f32 0.2, %v1119_v63  ;;  %v1672_v5 = vsel %vm1416_vm2, %v3342_v56, %v1544_v59  ;;  %vm1414_vm5 = vcmp.gt.f32.partialorder %v1119_v63, 0.0 }
  0xe5   : > { %3171 = vst [vmem:[%s3648_s20 + $0x110] sm:$0xff] %v2991_v61   ;;  %vm1353_vm4 = vcmp.gt.f32.partialorder %v3279_v0, 0.0  ;;  %v1481_v3 = vmul.f32 0.2, %v3279_v0  ;;  %v3343_v4 = vpop.f32.mrf.mxu1  ;;  %v1606_v8 = vsel %vm1350_vm3, %v863_v60, %v1478_v62 }
  0xe6   : > { %vm1417_vm6 = vcmp.gt.f32.partialorder %v3343_v4, 0.0  ;;  %v1545_v6 = vmul.f32 0.2, %v3343_v4  ;;  %v866_v7 = vpop.f32.mrf.mxu0  ;;  %v1670_v16 = vsel %vm1414_vm5, %v1119_v63, %v1542_v2 }
  0xe7   : > { %v1609_v9 = vsel %vm1353_vm4, %v3279_v0, %v1481_v3  ;;  %vm1351_vm7 = vcmp.gt.f32.partialorder %v866_v7, 0.0  ;;  %v1479_v10 = vmul.f32 0.2, %v866_v7  ;;  %v1122_v11 = vpop.f32.mrf.mxu1 }
  0xe8   : > { %v2846_v12 = vpack.c.bf16 %v1609_v9, %v1608_v1  ;;  %v1673_v13 = vsel %vm1417_vm6, %v3343_v4, %v1545_v6  ;;  %vm1415_vm8 = vcmp.gt.f32.partialorder %v1122_v11, 0.0  ;;  %v1543_v14 = vmul.f32 0.2, %v1122_v11  ;;  %v3282_v15 = vpop.f32.mrf.mxu0 }
  0xe9   : > { %v3006_v17 = vpack.c.bf16 %v1673_v13, %v1672_v5  ;;  %v1607_v18 = vsel %vm1351_vm7, %v866_v7, %v1479_v10  ;;  %v1484_v19 = vmul.f32 0.2, %v3282_v15  ;;  %v3346_v20 = vpop.f32.mrf.mxu1  ;;  %vm1356_vm9 = vcmp.gt.f32.partialorder %v3282_v15, 0.0 }
  0xea   : > { %3142 = vst [vmem:[%s3648_s20 + $0x28] sm:$0xff] %v2846_v12   ;;  %v2841_v21 = vpack.c.bf16 %v1607_v18, %v1606_v8  ;;  %v1671_v22 = vsel %vm1415_vm8, %v1122_v11, %v1543_v14  ;;  %v1548_v23 = vmul.f32 0.2, %v3346_v20  ;;  %v879_v24 = vpop.f32.mrf.mxu0  ;;  %vm1420_vm10 = vcmp.gt.f32.partialorder %v3346_v20, 0.0 }
  0xeb   : > { %3174 = vst [vmem:[%s3648_s20 + $0x128] sm:$0xff] %v3006_v17   ;;  %v3001_v25 = vpack.c.bf16 %v1671_v22, %v1670_v16  ;;  %v1482_v26 = vmul.f32 0.2, %v879_v24  ;;  %v1135_v27 = vpop.f32.mrf.mxu1  ;;  %vm1354_vm11 = vcmp.gt.f32.partialorder %v879_v24, 0.0  ;;  %v1612_v29 = vsel %vm1356_vm9, %v3282_v15, %v1484_v19 }
  0xec   : > { %3141 = vst [vmem:[%s3648_s20 + $0x20] sm:$0xff] %v2841_v21   ;;  %v3283_v28 = vpop.f32.mrf.mxu0  ;;  %v1546_v30 = vmul.f32 0.2, %v1135_v27  ;;  %v1676_v33 = vsel %vm1420_vm10, %v3346_v20, %v1548_v23  ;;  %vm1418_vm13 = vcmp.gt.f32.partialorder %v1135_v27, 0.0 }
  0xed   : > { %3173 = vst [vmem:[%s3648_s20 + $0x120] sm:$0xff] %v3001_v25   ;;  %vm1357_vm12 = vcmp.gt.f32.partialorder %v3283_v28, 0.0  ;;  %v1485_v31 = vmul.f32 0.2, %v3283_v28  ;;  %v3347_v32 = vpop.f32.mrf.mxu1  ;;  %v1610_v36 = vsel %vm1354_vm11, %v879_v24, %v1482_v26 }
  0xee   : > { %vm1421_vm14 = vcmp.gt.f32.partialorder %v3347_v32, 0.0  ;;  %v1549_v34 = vmul.f32 0.2, %v3347_v32  ;;  %v882_v35 = vpop.f32.mrf.mxu0  ;;  %v1674_v44 = vsel %vm1418_vm13, %v1135_v27, %v1546_v30 }
  0xef   : > { %v1613_v37 = vsel %vm1357_vm12, %v3283_v28, %v1485_v31  ;;  %vm1355_vm15 = vcmp.gt.f32.partialorder %v882_v35, 0.0  ;;  %v1483_v38 = vmul.f32 0.2, %v882_v35  ;;  %v1138_v39 = vpop.f32.mrf.mxu1 }
  0xf0   : > { %v2856_v40 = vpack.c.bf16 %v1613_v37, %v1612_v29  ;;  %v1677_v41 = vsel %vm1421_vm14, %v3347_v32, %v1549_v34  ;;  %vm1419_vm0 = vcmp.gt.f32.partialorder %v1138_v39, 0.0  ;;  %v1547_v42 = vmul.f32 0.2, %v1138_v39  ;;  %v3286_v43 = vpop.f32.mrf.mxu0 }
  0xf1   : > { %v3016_v45 = vpack.c.bf16 %v1677_v41, %v1676_v33  ;;  %v1611_v46 = vsel %vm1355_vm15, %v882_v35, %v1483_v38  ;;  %v1488_v47 = vmul.f32 0.2, %v3286_v43  ;;  %v3350_v48 = vpop.f32.mrf.mxu1  ;;  %vm1360_vm1 = vcmp.gt.f32.partialorder %v3286_v43, 0.0 }
  0xf2   : > { %3144 = vst [vmem:[%s3648_s20 + $0x38] sm:$0xff] %v2856_v40   ;;  %v2851_v49 = vpack.c.bf16 %v1611_v46, %v1610_v36  ;;  %v1675_v50 = vsel %vm1419_vm0, %v1138_v39, %v1547_v42  ;;  %v1552_v51 = vmul.f32 0.2, %v3350_v48  ;;  %v895_v52 = vpop.f32.mrf.mxu0  ;;  %vm1424_vm2 = vcmp.gt.f32.partialorder %v3350_v48, 0.0 }
  0xf3   : > { %3176 = vst [vmem:[%s3648_s20 + $0x138] sm:$0xff] %v3016_v45   ;;  %v3011_v53 = vpack.c.bf16 %v1675_v50, %v1674_v44  ;;  %v1486_v54 = vmul.f32 0.2, %v895_v52  ;;  %v1151_v55 = vpop.f32.mrf.mxu1  ;;  %vm1358_vm3 = vcmp.gt.f32.partialorder %v895_v52, 0.0  ;;  %v1616_v57 = vsel %vm1360_vm1, %v3286_v43, %v1488_v47 }
  0xf4   : > { %3143 = vst [vmem:[%s3648_s20 + $0x30] sm:$0xff] %v2851_v49   ;;  %v3287_v56 = vpop.f32.mrf.mxu0  ;;  %v1550_v58 = vmul.f32 0.2, %v1151_v55  ;;  %v1680_v61 = vsel %vm1424_vm2, %v3350_v48, %v1552_v51  ;;  %vm1422_vm5 = vcmp.gt.f32.partialorder %v1151_v55, 0.0 }
  0xf5   : > { %3175 = vst [vmem:[%s3648_s20 + $0x130] sm:$0xff] %v3011_v53   ;;  %vm1361_vm4 = vcmp.gt.f32.partialorder %v3287_v56, 0.0  ;;  %v1489_v59 = vmul.f32 0.2, %v3287_v56  ;;  %v3351_v60 = vpop.f32.mrf.mxu1  ;;  %v1614_v0 = vsel %vm1358_vm3, %v895_v52, %v1486_v54 }
  0xf6   : > { %vm1425_vm6 = vcmp.gt.f32.partialorder %v3351_v60, 0.0  ;;  %v1553_v62 = vmul.f32 0.2, %v3351_v60  ;;  %v898_v63 = vpop.f32.mrf.mxu0  ;;  %v1678_v8 = vsel %vm1422_vm5, %v1151_v55, %v1550_v58 }
  0xf7   : > { %v1617_v1 = vsel %vm1361_vm4, %v3287_v56, %v1489_v59  ;;  %vm1359_vm7 = vcmp.gt.f32.partialorder %v898_v63, 0.0  ;;  %v1487_v2 = vmul.f32 0.2, %v898_v63  ;;  %v1154_v3 = vpop.f32.mrf.mxu1 }
  0xf8   : > { %v2866_v4 = vpack.c.bf16 %v1617_v1, %v1616_v57  ;;  %v1681_v5 = vsel %vm1425_vm6, %v3351_v60, %v1553_v62  ;;  %vm1423_vm8 = vcmp.gt.f32.partialorder %v1154_v3, 0.0  ;;  %v1551_v6 = vmul.f32 0.2, %v1154_v3  ;;  %v3290_v7 = vpop.f32.mrf.mxu0 }
  0xf9   : > { %v3026_v9 = vpack.c.bf16 %v1681_v5, %v1680_v61  ;;  %v1615_v10 = vsel %vm1359_vm7, %v898_v63, %v1487_v2  ;;  %v1492_v11 = vmul.f32 0.2, %v3290_v7  ;;  %v3354_v12 = vpop.f32.mrf.mxu1  ;;  %vm1364_vm9 = vcmp.gt.f32.partialorder %v3290_v7, 0.0 }
  0xfa   : > { %3146 = vst [vmem:[%s3648_s20 + $0x48] sm:$0xff] %v2866_v4   ;;  %v2861_v13 = vpack.c.bf16 %v1615_v10, %v1614_v0  ;;  %v1679_v14 = vsel %vm1423_vm8, %v1154_v3, %v1551_v6  ;;  %v1556_v15 = vmul.f32 0.2, %v3354_v12  ;;  %v911_v16 = vpop.f32.mrf.mxu0  ;;  %vm1428_vm10 = vcmp.gt.f32.partialorder %v3354_v12, 0.0 }
  0xfb   : > { %3178 = vst [vmem:[%s3648_s20 + $0x148] sm:$0xff] %v3026_v9   ;;  %v3021_v17 = vpack.c.bf16 %v1679_v14, %v1678_v8  ;;  %v1490_v18 = vmul.f32 0.2, %v911_v16  ;;  %v1167_v19 = vpop.f32.mrf.mxu1  ;;  %vm1362_vm11 = vcmp.gt.f32.partialorder %v911_v16, 0.0  ;;  %v1620_v21 = vsel %vm1364_vm9, %v3290_v7, %v1492_v11 }
  0xfc   : > { %3145 = vst [vmem:[%s3648_s20 + $0x40] sm:$0xff] %v2861_v13   ;;  %v3291_v20 = vpop.f32.mrf.mxu0  ;;  %v1554_v22 = vmul.f32 0.2, %v1167_v19  ;;  %v1684_v25 = vsel %vm1428_vm10, %v3354_v12, %v1556_v15  ;;  %vm1426_vm13 = vcmp.gt.f32.partialorder %v1167_v19, 0.0 }
  0xfd   : > { %3177 = vst [vmem:[%s3648_s20 + $0x140] sm:$0xff] %v3021_v17   ;;  %vm1365_vm12 = vcmp.gt.f32.partialorder %v3291_v20, 0.0  ;;  %v1493_v23 = vmul.f32 0.2, %v3291_v20  ;;  %v3355_v24 = vpop.f32.mrf.mxu1  ;;  %v1618_v28 = vsel %vm1362_vm11, %v911_v16, %v1490_v18 }
  0xfe   : > { %vm1429_vm14 = vcmp.gt.f32.partialorder %v3355_v24, 0.0  ;;  %v1557_v26 = vmul.f32 0.2, %v3355_v24  ;;  %v914_v27 = vpop.f32.mrf.mxu0  ;;  %v1682_v36 = vsel %vm1426_vm13, %v1167_v19, %v1554_v22 }
  0xff   : > { %v1621_v29 = vsel %vm1365_vm12, %v3291_v20, %v1493_v23  ;;  %vm1363_vm15 = vcmp.gt.f32.partialorder %v914_v27, 0.0  ;;  %v1491_v30 = vmul.f32 0.2, %v914_v27  ;;  %v1170_v31 = vpop.f32.mrf.mxu1 }
 0x100   : > { %v2876_v32 = vpack.c.bf16 %v1621_v29, %v1620_v21  ;;  %v1685_v33 = vsel %vm1429_vm14, %v3355_v24, %v1557_v26  ;;  %vm1427_vm0 = vcmp.gt.f32.partialorder %v1170_v31, 0.0  ;;  %v1555_v34 = vmul.f32 0.2, %v1170_v31  ;;  %v3294_v35 = vpop.f32.mrf.mxu0 }
 0x101   : > { %v3036_v37 = vpack.c.bf16 %v1685_v33, %v1684_v25  ;;  %v1619_v38 = vsel %vm1363_vm15, %v914_v27, %v1491_v30  ;;  %v1496_v39 = vmul.f32 0.2, %v3294_v35  ;;  %v3358_v40 = vpop.f32.mrf.mxu1  ;;  %vm1368_vm1 = vcmp.gt.f32.partialorder %v3294_v35, 0.0 }
 0x102   : > { %3148 = vst [vmem:[%s3648_s20 + $0x58] sm:$0xff] %v2876_v32   ;;  %v2871_v41 = vpack.c.bf16 %v1619_v38, %v1618_v28  ;;  %v1683_v42 = vsel %vm1427_vm0, %v1170_v31, %v1555_v34  ;;  %v1560_v43 = vmul.f32 0.2, %v3358_v40  ;;  %v927_v44 = vpop.f32.mrf.mxu0  ;;  %vm1432_vm2 = vcmp.gt.f32.partialorder %v3358_v40, 0.0 }
 0x103   : > { %3180 = vst [vmem:[%s3648_s20 + $0x158] sm:$0xff] %v3036_v37   ;;  %v3031_v45 = vpack.c.bf16 %v1683_v42, %v1682_v36  ;;  %v1494_v46 = vmul.f32 0.2, %v927_v44  ;;  %v1183_v47 = vpop.f32.mrf.mxu1  ;;  %vm1366_vm3 = vcmp.gt.f32.partialorder %v927_v44, 0.0  ;;  %v1624_v49 = vsel %vm1368_vm1, %v3294_v35, %v1496_v39 }
 0x104   : > { %3147 = vst [vmem:[%s3648_s20 + $0x50] sm:$0xff] %v2871_v41   ;;  %v3295_v48 = vpop.f32.mrf.mxu0  ;;  %v1558_v50 = vmul.f32 0.2, %v1183_v47  ;;  %v1688_v53 = vsel %vm1432_vm2, %v3358_v40, %v1560_v43  ;;  %vm1430_vm5 = vcmp.gt.f32.partialorder %v1183_v47, 0.0 }
 0x105   : > { %3179 = vst [vmem:[%s3648_s20 + $0x150] sm:$0xff] %v3031_v45   ;;  %vm1369_vm4 = vcmp.gt.f32.partialorder %v3295_v48, 0.0  ;;  %v1497_v51 = vmul.f32 0.2, %v3295_v48  ;;  %v3359_v52 = vpop.f32.mrf.mxu1  ;;  %v1622_v56 = vsel %vm1366_vm3, %v927_v44, %v1494_v46 }
 0x106   : > { %vm1433_vm6 = vcmp.gt.f32.partialorder %v3359_v52, 0.0  ;;  %v1561_v54 = vmul.f32 0.2, %v3359_v52  ;;  %v930_v55 = vpop.f32.mrf.mxu0  ;;  %v1686_v0 = vsel %vm1430_vm5, %v1183_v47, %v1558_v50 }
 0x107   : > { %v1625_v57 = vsel %vm1369_vm4, %v3295_v48, %v1497_v51  ;;  %vm1367_vm7 = vcmp.gt.f32.partialorder %v930_v55, 0.0  ;;  %v1495_v58 = vmul.f32 0.2, %v930_v55  ;;  %v1186_v59 = vpop.f32.mrf.mxu1 }
 0x108   : > { %v2886_v60 = vpack.c.bf16 %v1625_v57, %v1624_v49  ;;  %v1689_v61 = vsel %vm1433_vm6, %v3359_v52, %v1561_v54  ;;  %vm1431_vm8 = vcmp.gt.f32.partialorder %v1186_v59, 0.0  ;;  %v1559_v62 = vmul.f32 0.2, %v1186_v59  ;;  %v3298_v63 = vpop.f32.mrf.mxu0 }
 0x109   : > { %v3046_v1 = vpack.c.bf16 %v1689_v61, %v1688_v53  ;;  %v1623_v2 = vsel %vm1367_vm7, %v930_v55, %v1495_v58  ;;  %v1500_v3 = vmul.f32 0.2, %v3298_v63  ;;  %v3362_v4 = vpop.f32.mrf.mxu1  ;;  %vm1372_vm9 = vcmp.gt.f32.partialorder %v3298_v63, 0.0 }
 0x10a   : > { %3150 = vst [vmem:[%s3648_s20 + $0x68] sm:$0xff] %v2886_v60   ;;  %v2881_v5 = vpack.c.bf16 %v1623_v2, %v1622_v56  ;;  %v1687_v6 = vsel %vm1431_vm8, %v1186_v59, %v1559_v62  ;;  %v1564_v7 = vmul.f32 0.2, %v3362_v4  ;;  %v943_v8 = vpop.f32.mrf.mxu0  ;;  %vm1436_vm10 = vcmp.gt.f32.partialorder %v3362_v4, 0.0 }
 0x10b   : > { %3182 = vst [vmem:[%s3648_s20 + $0x168] sm:$0xff] %v3046_v1   ;;  %v3041_v9 = vpack.c.bf16 %v1687_v6, %v1686_v0  ;;  %v1498_v10 = vmul.f32 0.2, %v943_v8  ;;  %v1199_v11 = vpop.f32.mrf.mxu1  ;;  %vm1370_vm11 = vcmp.gt.f32.partialorder %v943_v8, 0.0  ;;  %v1628_v13 = vsel %vm1372_vm9, %v3298_v63, %v1500_v3 }
 0x10c   : > { %3149 = vst [vmem:[%s3648_s20 + $0x60] sm:$0xff] %v2881_v5   ;;  %v3299_v12 = vpop.f32.mrf.mxu0  ;;  %v1562_v14 = vmul.f32 0.2, %v1199_v11  ;;  %v1692_v17 = vsel %vm1436_vm10, %v3362_v4, %v1564_v7  ;;  %vm1434_vm13 = vcmp.gt.f32.partialorder %v1199_v11, 0.0 }
 0x10d   : > { %3181 = vst [vmem:[%s3648_s20 + $0x160] sm:$0xff] %v3041_v9   ;;  %vm1373_vm12 = vcmp.gt.f32.partialorder %v3299_v12, 0.0  ;;  %v1501_v15 = vmul.f32 0.2, %v3299_v12  ;;  %v3363_v16 = vpop.f32.mrf.mxu1  ;;  %v1626_v20 = vsel %vm1370_vm11, %v943_v8, %v1498_v10 }
 0x10e   : > { %vm1437_vm14 = vcmp.gt.f32.partialorder %v3363_v16, 0.0  ;;  %v1565_v18 = vmul.f32 0.2, %v3363_v16  ;;  %v946_v19 = vpop.f32.mrf.mxu0  ;;  %v1690_v28 = vsel %vm1434_vm13, %v1199_v11, %v1562_v14 }
 0x10f   : > { %v1629_v21 = vsel %vm1373_vm12, %v3299_v12, %v1501_v15  ;;  %vm1371_vm15 = vcmp.gt.f32.partialorder %v946_v19, 0.0  ;;  %v1499_v22 = vmul.f32 0.2, %v946_v19  ;;  %v1202_v23 = vpop.f32.mrf.mxu1 }
 0x110   : > { %v2896_v24 = vpack.c.bf16 %v1629_v21, %v1628_v13  ;;  %v1693_v25 = vsel %vm1437_vm14, %v3363_v16, %v1565_v18  ;;  %vm1435_vm0 = vcmp.gt.f32.partialorder %v1202_v23, 0.0  ;;  %v1563_v26 = vmul.f32 0.2, %v1202_v23  ;;  %v3302_v27 = vpop.f32.mrf.mxu0 }
 0x111   : > { %v3056_v29 = vpack.c.bf16 %v1693_v25, %v1692_v17  ;;  %v1627_v30 = vsel %vm1371_vm15, %v946_v19, %v1499_v22  ;;  %v1504_v31 = vmul.f32 0.2, %v3302_v27  ;;  %v3366_v32 = vpop.f32.mrf.mxu1  ;;  %vm1376_vm1 = vcmp.gt.f32.partialorder %v3302_v27, 0.0 }
 0x112   : > { %3152 = vst [vmem:[%s3648_s20 + $0x78] sm:$0xff] %v2896_v24   ;;  %v2891_v33 = vpack.c.bf16 %v1627_v30, %v1626_v20  ;;  %v1691_v34 = vsel %vm1435_vm0, %v1202_v23, %v1563_v26  ;;  %v1568_v35 = vmul.f32 0.2, %v3366_v32  ;;  %v959_v36 = vpop.f32.mrf.mxu0  ;;  %vm1440_vm2 = vcmp.gt.f32.partialorder %v3366_v32, 0.0 }
 0x113   : > { %3184 = vst [vmem:[%s3648_s20 + $0x178] sm:$0xff] %v3056_v29   ;;  %v3051_v37 = vpack.c.bf16 %v1691_v34, %v1690_v28  ;;  %v1502_v38 = vmul.f32 0.2, %v959_v36  ;;  %v1215_v39 = vpop.f32.mrf.mxu1  ;;  %vm1374_vm3 = vcmp.gt.f32.partialorder %v959_v36, 0.0  ;;  %v1632_v41 = vsel %vm1376_vm1, %v3302_v27, %v1504_v31 }
 0x114   : > { %3151 = vst [vmem:[%s3648_s20 + $0x70] sm:$0xff] %v2891_v33   ;;  %v3303_v40 = vpop.f32.mrf.mxu0  ;;  %v1566_v42 = vmul.f32 0.2, %v1215_v39  ;;  %v1696_v45 = vsel %vm1440_vm2, %v3366_v32, %v1568_v35  ;;  %vm1438_vm5 = vcmp.gt.f32.partialorder %v1215_v39, 0.0 }
 0x115   : > { %3183 = vst [vmem:[%s3648_s20 + $0x170] sm:$0xff] %v3051_v37   ;;  %vm1377_vm4 = vcmp.gt.f32.partialorder %v3303_v40, 0.0  ;;  %v1505_v43 = vmul.f32 0.2, %v3303_v40  ;;  %v3367_v44 = vpop.f32.mrf.mxu1  ;;  %v1630_v48 = vsel %vm1374_vm3, %v959_v36, %v1502_v38 }
 0x116   : > { %vm1441_vm6 = vcmp.gt.f32.partialorder %v3367_v44, 0.0  ;;  %v1569_v46 = vmul.f32 0.2, %v3367_v44  ;;  %v962_v47 = vpop.f32.mrf.mxu0  ;;  %v1694_v56 = vsel %vm1438_vm5, %v1215_v39, %v1566_v42 }
 0x117   : > { %v1633_v49 = vsel %vm1377_vm4, %v3303_v40, %v1505_v43  ;;  %vm1375_vm7 = vcmp.gt.f32.partialorder %v962_v47, 0.0  ;;  %v1503_v50 = vmul.f32 0.2, %v962_v47  ;;  %v1218_v51 = vpop.f32.mrf.mxu1 }
 0x118   : > { %v2906_v52 = vpack.c.bf16 %v1633_v49, %v1632_v41  ;;  %v1697_v53 = vsel %vm1441_vm6, %v3367_v44, %v1569_v46  ;;  %vm1439_vm8 = vcmp.gt.f32.partialorder %v1218_v51, 0.0  ;;  %v1567_v54 = vmul.f32 0.2, %v1218_v51  ;;  %v3306_v55 = vpop.f32.mrf.mxu0 }
 0x119   : > { %v3066_v57 = vpack.c.bf16 %v1697_v53, %v1696_v45  ;;  %v1631_v58 = vsel %vm1375_vm7, %v962_v47, %v1503_v50  ;;  %v1508_v59 = vmul.f32 0.2, %v3306_v55  ;;  %v3370_v60 = vpop.f32.mrf.mxu1  ;;  %vm1380_vm9 = vcmp.gt.f32.partialorder %v3306_v55, 0.0 }
 0x11a   : > { %3154 = vst [vmem:[%s3648_s20 + $0x88] sm:$0xff] %v2906_v52   ;;  %v2901_v61 = vpack.c.bf16 %v1631_v58, %v1630_v48  ;;  %v1695_v62 = vsel %vm1439_vm8, %v1218_v51, %v1567_v54  ;;  %v1572_v63 = vmul.f32 0.2, %v3370_v60  ;;  %v975_v0 = vpop.f32.mrf.mxu0  ;;  %vm1444_vm10 = vcmp.gt.f32.partialorder %v3370_v60, 0.0 }
 0x11b   : > { %3186 = vst [vmem:[%s3648_s20 + $0x188] sm:$0xff] %v3066_v57   ;;  %v3061_v1 = vpack.c.bf16 %v1695_v62, %v1694_v56  ;;  %v1506_v2 = vmul.f32 0.2, %v975_v0  ;;  %v1231_v3 = vpop.f32.mrf.mxu1  ;;  %vm1378_vm11 = vcmp.gt.f32.partialorder %v975_v0, 0.0  ;;  %v1636_v5 = vsel %vm1380_vm9, %v3306_v55, %v1508_v59 }
 0x11c   : > { %3153 = vst [vmem:[%s3648_s20 + $0x80] sm:$0xff] %v2901_v61   ;;  %v3307_v4 = vpop.f32.mrf.mxu0  ;;  %v1570_v6 = vmul.f32 0.2, %v1231_v3  ;;  %v1700_v9 = vsel %vm1444_vm10, %v3370_v60, %v1572_v63  ;;  %vm1442_vm13 = vcmp.gt.f32.partialorder %v1231_v3, 0.0 }
 0x11d   : > { %3185 = vst [vmem:[%s3648_s20 + $0x180] sm:$0xff] %v3061_v1   ;;  %vm1381_vm12 = vcmp.gt.f32.partialorder %v3307_v4, 0.0  ;;  %v1509_v7 = vmul.f32 0.2, %v3307_v4  ;;  %v3371_v8 = vpop.f32.mrf.mxu1  ;;  %v1634_v12 = vsel %vm1378_vm11, %v975_v0, %v1506_v2 }
 0x11e   : > { %vm1445_vm14 = vcmp.gt.f32.partialorder %v3371_v8, 0.0  ;;  %v1573_v10 = vmul.f32 0.2, %v3371_v8  ;;  %v978_v11 = vpop.f32.mrf.mxu0  ;;  %v1698_v20 = vsel %vm1442_vm13, %v1231_v3, %v1570_v6 }
 0x11f   : > { %v1637_v13 = vsel %vm1381_vm12, %v3307_v4, %v1509_v7  ;;  %vm1379_vm15 = vcmp.gt.f32.partialorder %v978_v11, 0.0  ;;  %v1507_v14 = vmul.f32 0.2, %v978_v11  ;;  %v1234_v15 = vpop.f32.mrf.mxu1 }
 0x120   : > { %v2916_v16 = vpack.c.bf16 %v1637_v13, %v1636_v5  ;;  %v1701_v17 = vsel %vm1445_vm14, %v3371_v8, %v1573_v10  ;;  %vm1443_vm0 = vcmp.gt.f32.partialorder %v1234_v15, 0.0  ;;  %v1571_v18 = vmul.f32 0.2, %v1234_v15  ;;  %v3310_v19 = vpop.f32.mrf.mxu0 }
 0x121   : > { %v3076_v21 = vpack.c.bf16 %v1701_v17, %v1700_v9  ;;  %v1635_v22 = vsel %vm1379_vm15, %v978_v11, %v1507_v14  ;;  %v1512_v23 = vmul.f32 0.2, %v3310_v19  ;;  %v3374_v24 = vpop.f32.mrf.mxu1  ;;  %vm1384_vm1 = vcmp.gt.f32.partialorder %v3310_v19, 0.0 }
 0x122   : > { %3156 = vst [vmem:[%s3648_s20 + $0x98] sm:$0xff] %v2916_v16   ;;  %v2911_v25 = vpack.c.bf16 %v1635_v22, %v1634_v12  ;;  %v1699_v26 = vsel %vm1443_vm0, %v1234_v15, %v1571_v18  ;;  %v1576_v27 = vmul.f32 0.2, %v3374_v24  ;;  %v991_v28 = vpop.f32.mrf.mxu0  ;;  %vm1448_vm2 = vcmp.gt.f32.partialorder %v3374_v24, 0.0 }
 0x123   : > { %3188 = vst [vmem:[%s3648_s20 + $0x198] sm:$0xff] %v3076_v21   ;;  %v3071_v29 = vpack.c.bf16 %v1699_v26, %v1698_v20  ;;  %v1510_v30 = vmul.f32 0.2, %v991_v28  ;;  %v1247_v31 = vpop.f32.mrf.mxu1  ;;  %vm1382_vm3 = vcmp.gt.f32.partialorder %v991_v28, 0.0  ;;  %v1640_v33 = vsel %vm1384_vm1, %v3310_v19, %v1512_v23 }
 0x124   : > { %3155 = vst [vmem:[%s3648_s20 + $0x90] sm:$0xff] %v2911_v25   ;;  %v3311_v32 = vpop.f32.mrf.mxu0  ;;  %v1574_v34 = vmul.f32 0.2, %v1247_v31  ;;  %v1704_v37 = vsel %vm1448_vm2, %v3374_v24, %v1576_v27  ;;  %vm1446_vm5 = vcmp.gt.f32.partialorder %v1247_v31, 0.0 }
 0x125   : > { %3187 = vst [vmem:[%s3648_s20 + $0x190] sm:$0xff] %v3071_v29   ;;  %vm1385_vm4 = vcmp.gt.f32.partialorder %v3311_v32, 0.0  ;;  %v1513_v35 = vmul.f32 0.2, %v3311_v32  ;;  %v3375_v36 = vpop.f32.mrf.mxu1  ;;  %v1638_v40 = vsel %vm1382_vm3, %v991_v28, %v1510_v30 }
 0x126   : > { %vm1449_vm6 = vcmp.gt.f32.partialorder %v3375_v36, 0.0  ;;  %v1577_v38 = vmul.f32 0.2, %v3375_v36  ;;  %v994_v39 = vpop.f32.mrf.mxu0  ;;  %v1702_v48 = vsel %vm1446_vm5, %v1247_v31, %v1574_v34 }
 0x127   : > { %v1641_v41 = vsel %vm1385_vm4, %v3311_v32, %v1513_v35  ;;  %vm1383_vm7 = vcmp.gt.f32.partialorder %v994_v39, 0.0  ;;  %v1511_v42 = vmul.f32 0.2, %v994_v39  ;;  %v1250_v43 = vpop.f32.mrf.mxu1 }
 0x128   : > { %v2926_v44 = vpack.c.bf16 %v1641_v41, %v1640_v33  ;;  %v1705_v45 = vsel %vm1449_vm6, %v3375_v36, %v1577_v38  ;;  %vm1447_vm8 = vcmp.gt.f32.partialorder %v1250_v43, 0.0  ;;  %v1575_v46 = vmul.f32 0.2, %v1250_v43  ;;  %v3314_v47 = vpop.f32.mrf.mxu0 }
 0x129   : > { %v3086_v49 = vpack.c.bf16 %v1705_v45, %v1704_v37  ;;  %v1639_v50 = vsel %vm1383_vm7, %v994_v39, %v1511_v42  ;;  %v1516_v51 = vmul.f32 0.2, %v3314_v47  ;;  %v3378_v52 = vpop.f32.mrf.mxu1  ;;  %vm1388_vm9 = vcmp.gt.f32.partialorder %v3314_v47, 0.0 }
 0x12a   : > { %3158 = vst [vmem:[%s3648_s20 + $0xa8] sm:$0xff] %v2926_v44   ;;  %v2921_v53 = vpack.c.bf16 %v1639_v50, %v1638_v40  ;;  %v1703_v54 = vsel %vm1447_vm8, %v1250_v43, %v1575_v46  ;;  %v1580_v55 = vmul.f32 0.2, %v3378_v52  ;;  %v1007_v56 = vpop.f32.mrf.mxu0  ;;  %vm1452_vm10 = vcmp.gt.f32.partialorder %v3378_v52, 0.0 }
 0x12b   : > { %3190 = vst [vmem:[%s3648_s20 + $0x1a8] sm:$0xff] %v3086_v49   ;;  %v3081_v57 = vpack.c.bf16 %v1703_v54, %v1702_v48  ;;  %v1514_v58 = vmul.f32 0.2, %v1007_v56  ;;  %v1263_v59 = vpop.f32.mrf.mxu1  ;;  %vm1386_vm11 = vcmp.gt.f32.partialorder %v1007_v56, 0.0  ;;  %v1644_v61 = vsel %vm1388_vm9, %v3314_v47, %v1516_v51 }
 0x12c   : > { %3157 = vst [vmem:[%s3648_s20 + $0xa0] sm:$0xff] %v2921_v53   ;;  %v3315_v60 = vpop.f32.mrf.mxu0  ;;  %v1578_v62 = vmul.f32 0.2, %v1263_v59  ;;  %v1708_v1 = vsel %vm1452_vm10, %v3378_v52, %v1580_v55  ;;  %vm1450_vm13 = vcmp.gt.f32.partialorder %v1263_v59, 0.0 }
 0x12d   : > { %3189 = vst [vmem:[%s3648_s20 + $0x1a0] sm:$0xff] %v3081_v57   ;;  %vm1389_vm12 = vcmp.gt.f32.partialorder %v3315_v60, 0.0  ;;  %v1517_v63 = vmul.f32 0.2, %v3315_v60  ;;  %v3379_v0 = vpop.f32.mrf.mxu1  ;;  %v1642_v4 = vsel %vm1386_vm11, %v1007_v56, %v1514_v58 }
 0x12e   : > { %vm1453_vm14 = vcmp.gt.f32.partialorder %v3379_v0, 0.0  ;;  %v1581_v2 = vmul.f32 0.2, %v3379_v0  ;;  %v1010_v3 = vpop.f32.mrf.mxu0  ;;  %v1706_v12 = vsel %vm1450_vm13, %v1263_v59, %v1578_v62 }
 0x12f   : > { %v1645_v5 = vsel %vm1389_vm12, %v3315_v60, %v1517_v63  ;;  %vm1387_vm15 = vcmp.gt.f32.partialorder %v1010_v3, 0.0  ;;  %v1515_v6 = vmul.f32 0.2, %v1010_v3  ;;  %v1266_v7 = vpop.f32.mrf.mxu1 }
 0x130   : > { %v2936_v8 = vpack.c.bf16 %v1645_v5, %v1644_v61  ;;  %v1709_v9 = vsel %vm1453_vm14, %v3379_v0, %v1581_v2  ;;  %vm1451_vm0 = vcmp.gt.f32.partialorder %v1266_v7, 0.0  ;;  %v1579_v10 = vmul.f32 0.2, %v1266_v7  ;;  %v3318_v11 = vpop.f32.mrf.mxu0 }
 0x131   : > { %v3096_v13 = vpack.c.bf16 %v1709_v9, %v1708_v1  ;;  %v1643_v14 = vsel %vm1387_vm15, %v1010_v3, %v1515_v6  ;;  %v1520_v15 = vmul.f32 0.2, %v3318_v11  ;;  %v3382_v16 = vpop.f32.mrf.mxu1  ;;  %vm1392_vm1 = vcmp.gt.f32.partialorder %v3318_v11, 0.0 }
 0x132   : > { %3160 = vst [vmem:[%s3648_s20 + $0xb8] sm:$0xff] %v2936_v8   ;;  %v2931_v17 = vpack.c.bf16 %v1643_v14, %v1642_v4  ;;  %v1707_v18 = vsel %vm1451_vm0, %v1266_v7, %v1579_v10  ;;  %v1584_v19 = vmul.f32 0.2, %v3382_v16  ;;  %v1023_v20 = vpop.f32.mrf.mxu0  ;;  %vm1456_vm2 = vcmp.gt.f32.partialorder %v3382_v16, 0.0 }
 0x133   : > { %3192 = vst [vmem:[%s3648_s20 + $0x1b8] sm:$0xff] %v3096_v13   ;;  %v3091_v21 = vpack.c.bf16 %v1707_v18, %v1706_v12  ;;  %v1518_v22 = vmul.f32 0.2, %v1023_v20  ;;  %v1279_v23 = vpop.f32.mrf.mxu1  ;;  %vm1390_vm3 = vcmp.gt.f32.partialorder %v1023_v20, 0.0  ;;  %v1648_v25 = vsel %vm1392_vm1, %v3318_v11, %v1520_v15 }
 0x134   : > { %3159 = vst [vmem:[%s3648_s20 + $0xb0] sm:$0xff] %v2931_v17   ;;  %v3319_v24 = vpop.f32.mrf.mxu0  ;;  %v1582_v26 = vmul.f32 0.2, %v1279_v23  ;;  %v1712_v29 = vsel %vm1456_vm2, %v3382_v16, %v1584_v19  ;;  %vm1454_vm5 = vcmp.gt.f32.partialorder %v1279_v23, 0.0 }
 0x135   : > { %3191 = vst [vmem:[%s3648_s20 + $0x1b0] sm:$0xff] %v3091_v21   ;;  %vm1393_vm4 = vcmp.gt.f32.partialorder %v3319_v24, 0.0  ;;  %v1521_v27 = vmul.f32 0.2, %v3319_v24  ;;  %v3383_v28 = vpop.f32.mrf.mxu1  ;;  %v1646_v32 = vsel %vm1390_vm3, %v1023_v20, %v1518_v22 }
 0x136   : > { %vm1457_vm6 = vcmp.gt.f32.partialorder %v3383_v28, 0.0  ;;  %v1585_v30 = vmul.f32 0.2, %v3383_v28  ;;  %v1026_v31 = vpop.f32.mrf.mxu0  ;;  %v1710_v40 = vsel %vm1454_vm5, %v1279_v23, %v1582_v26 }
 0x137   : > { %v1649_v33 = vsel %vm1393_vm4, %v3319_v24, %v1521_v27  ;;  %vm1391_vm7 = vcmp.gt.f32.partialorder %v1026_v31, 0.0  ;;  %v1519_v34 = vmul.f32 0.2, %v1026_v31  ;;  %v1282_v35 = vpop.f32.mrf.mxu1 }
 0x138   : > { %v2946_v36 = vpack.c.bf16 %v1649_v33, %v1648_v25  ;;  %v1713_v37 = vsel %vm1457_vm6, %v3383_v28, %v1585_v30  ;;  %vm1455_vm8 = vcmp.gt.f32.partialorder %v1282_v35, 0.0  ;;  %v1583_v38 = vmul.f32 0.2, %v1282_v35  ;;  %v3322_v39 = vpop.f32.mrf.mxu0 }
 0x139   : > { %v3106_v41 = vpack.c.bf16 %v1713_v37, %v1712_v29  ;;  %v1647_v42 = vsel %vm1391_vm7, %v1026_v31, %v1519_v34  ;;  %v1524_v43 = vmul.f32 0.2, %v3322_v39  ;;  %v3386_v44 = vpop.f32.mrf.mxu1  ;;  %vm1396_vm9 = vcmp.gt.f32.partialorder %v3322_v39, 0.0 }
 0x13a   : > { %3162 = vst [vmem:[%s3648_s20 + $0xc8] sm:$0xff] %v2946_v36   ;;  %v2941_v45 = vpack.c.bf16 %v1647_v42, %v1646_v32  ;;  %v1711_v46 = vsel %vm1455_vm8, %v1282_v35, %v1583_v38  ;;  %v1588_v47 = vmul.f32 0.2, %v3386_v44  ;;  %v1039_v48 = vpop.f32.mrf.mxu0  ;;  %vm1460_vm10 = vcmp.gt.f32.partialorder %v3386_v44, 0.0 }
 0x13b   : > { %3194 = vst [vmem:[%s3648_s20 + $0x1c8] sm:$0xff] %v3106_v41   ;;  %v3101_v49 = vpack.c.bf16 %v1711_v46, %v1710_v40  ;;  %vm1394_vm11 = vcmp.gt.f32.partialorder %v1039_v48, 0.0  ;;  %v1522_v50 = vmul.f32 0.2, %v1039_v48  ;;  %v1295_v51 = vpop.f32.mrf.mxu1  ;;  %v1652_v54 = vsel %vm1396_vm9, %v3322_v39, %v1524_v43 }
 0x13c   : > { %3161 = vst [vmem:[%s3648_s20 + $0xc0] sm:$0xff] %v2941_v45   ;;  %vm1458_vm12 = vcmp.gt.f32.partialorder %v1295_v51, 0.0  ;;  %v1586_v52 = vmul.f32 0.2, %v1295_v51  ;;  %v3323_v53 = vpop.f32.mrf.mxu0  ;;  %v1716_v57 = vsel %vm1460_vm10, %v3386_v44, %v1588_v47 }
 0x13d   : > { %3193 = vst [vmem:[%s3648_s20 + $0x1c0] sm:$0xff] %v3101_v49   ;;  %vm1397_vm13 = vcmp.gt.f32.partialorder %v3323_v53, 0.0  ;;  %v1525_v55 = vmul.f32 0.2, %v3323_v53  ;;  %v3387_v56 = vpop.f32.mrf.mxu1  ;;  %v1650_v58 = vsel %vm1394_vm11, %v1039_v48, %v1522_v50 }
 0x13e   : > { %vm1461_vm14 = vcmp.gt.f32.partialorder %v3387_v56, 0.0  ;;  %v1589_v59 = vmul.f32 0.2, %v3387_v56  ;;  %v1042_v60 = vpop.f32.mrf.mxu0  ;;  %v1714_v61 = vsel %vm1458_vm12, %v1295_v51, %v1586_v52 }
 0x13f   : > { %v1653_v62 = vsel %vm1397_vm13, %v3323_v53, %v1525_v55  ;;  %vm1395_vm15 = vcmp.gt.f32.partialorder %v1042_v60, 0.0  ;;  %v1523_v63 = vmul.f32 0.2, %v1042_v60  ;;  %v1298_v0 = vpop.f32.mrf.mxu1 }
 0x140   : > { %v2956_v1 = vpack.c.bf16 %v1653_v62, %v1652_v54  ;;  %v1717_v2 = vsel %vm1461_vm14, %v3387_v56, %v1589_v59  ;;  %vm1459_vm0 = vcmp.gt.f32.partialorder %v1298_v0, 0.0  ;;  %v1587_v3 = vmul.f32 0.2, %v1298_v0  ;;  %v3326_v4 = vpop.f32.mrf.mxu0 }
 0x141   : > { %v3116_v5 = vpack.c.bf16 %v1717_v2, %v1716_v57  ;;  %v1651_v6 = vsel %vm1395_vm15, %v1042_v60, %v1523_v63  ;;  %vm1400_vm1 = vcmp.gt.f32.partialorder %v3326_v4, 0.0  ;;  %v1528_v7 = vmul.f32 0.2, %v3326_v4  ;;  %v3390_v8 = vpop.f32.mrf.mxu1 }
 0x142   : > { %3164 = vst [vmem:[%s3648_s20 + $0xd8] sm:$0xff] %v2956_v1   ;;  %v2951_v9 = vpack.c.bf16 %v1651_v6, %v1650_v58  ;;  %v1715_v10 = vsel %vm1459_vm0, %v1298_v0, %v1587_v3  ;;  %vm1464_vm2 = vcmp.gt.f32.partialorder %v3390_v8, 0.0  ;;  %v1592_v11 = vmul.f32 0.2, %v3390_v8  ;;  %v1055_v12 = vpop.f32.mrf.mxu0 }
 0x143   : > { %3196 = vst [vmem:[%s3648_s20 + $0x1d8] sm:$0xff] %v3116_v5   ;;  %v3111_v13 = vpack.c.bf16 %v1715_v10, %v1714_v61  ;;  %v1526_v14 = vmul.f32 0.2, %v1055_v12  ;;  %v1311_v15 = vpop.f32.mrf.mxu1  ;;  %vm1398_vm3 = vcmp.gt.f32.partialorder %v1055_v12, 0.0  ;;  %v1656_v17 = vsel %vm1400_vm1, %v3326_v4, %v1528_v7 }
 0x144   : > { %3163 = vst [vmem:[%s3648_s20 + $0xd0] sm:$0xff] %v2951_v9   ;;  %v3327_v16 = vpop.f32.mrf.mxu0  ;;  %v1720_v18 = vsel %vm1464_vm2, %v3390_v8, %v1592_v11  ;;  %vm1462_vm5 = vcmp.gt.f32.partialorder %v1311_v15, 0.0  ;;  %v1590_v21 = vmul.f32 0.2, %v1311_v15 }
 0x145   : > { %3195 = vst [vmem:[%s3648_s20 + $0x1d0] sm:$0xff] %v3111_v13   ;;  %vm1401_vm4 = vcmp.gt.f32.partialorder %v3327_v16, 0.0  ;;  %v1529_v19 = vmul.f32 0.2, %v3327_v16  ;;  %v3391_v20 = vpop.f32.mrf.mxu1  ;;  %v1654_v24 = vsel %vm1398_vm3, %v1055_v12, %v1526_v14 }
 0x146   : > { %vm1465_vm6 = vcmp.gt.f32.partialorder %v3391_v20, 0.0  ;;  %v1593_v22 = vmul.f32 0.2, %v3391_v20  ;;  %v1058_v23 = vpop.f32.mrf.mxu0  ;;  %v1718_v36 = vsel %vm1462_vm5, %v1311_v15, %v1590_v21 }
 0x147   : > { %v1657_v25 = vsel %vm1401_vm4, %v3327_v16, %v1529_v19  ;;  %vm1399_vm7 = vcmp.gt.f32.partialorder %v1058_v23, 0.0  ;;  %v1527_v26 = vmul.f32 0.2, %v1058_v23  ;;  %v1314_v27 = vpop.f32.mrf.mxu1 }
 0x148   : > { %v2966_v28 = vpack.c.bf16 %v1657_v25, %v1656_v17  ;;  %v1721_v29 = vsel %vm1465_vm6, %v3391_v20, %v1593_v22  ;;  %vm1463_vm8 = vcmp.gt.f32.partialorder %v1314_v27, 0.0  ;;  %v1591_v30 = vmul.f32 0.2, %v1314_v27  ;;  %v3330_v31 = vpop.f32.mrf.mxu0 }
 0x149   : > { %v3126_v32 = vpack.c.bf16 %v1721_v29, %v1720_v18  ;;  %v1655_v33 = vsel %vm1399_vm7, %v1058_v23, %v1527_v26  ;;  %vm1404_vm9 = vcmp.gt.f32.partialorder %v3330_v31, 0.0  ;;  %v1532_v34 = vmul.f32 0.2, %v3330_v31  ;;  %v3394_v35 = vpop.f32.mrf.mxu1 }
 0x14a   : > { %3166 = vst [vmem:[%s3648_s20 + $0xe8] sm:$0xff] %v2966_v28   ;;  %v2961_v37 = vpack.c.bf16 %v1655_v33, %v1654_v24  ;;  %v1719_v38 = vsel %vm1463_vm8, %v1314_v27, %v1591_v30  ;;  %v1596_v39 = vmul.f32 0.2, %v3394_v35  ;;  %v1071_v40 = vpop.f32.mrf.mxu0  ;;  %vm1468_vm10 = vcmp.gt.f32.partialorder %v3394_v35, 0.0 }
 0x14b   : > { %3198 = vst [vmem:[%s3648_s20 + $0x1e8] sm:$0xff] %v3126_v32   ;;  %v3121_v41 = vpack.c.bf16 %v1719_v38, %v1718_v36  ;;  %v1327_v42 = vpop.f32.mrf.mxu1  ;;  %v1660_v43 = vsel %vm1404_vm9, %v3330_v31, %v1532_v34  ;;  %vm1402_vm11 = vcmp.gt.f32.partialorder %v1071_v40, 0.0  ;;  %v1530_v45 = vmul.f32 0.2, %v1071_v40 }
 0x14c   : > { %3165 = vst [vmem:[%s3648_s20 + $0xe0] sm:$0xff] %v2961_v37   ;;  %v3331_v44 = vpop.f32.mrf.mxu0  ;;  %v1724_v48 = vsel %vm1468_vm10, %v3394_v35, %v1596_v39  ;;  %v1594_v49 = vmul.f32 0.2, %v1327_v42  ;;  %vm1466_vm14 = vcmp.gt.f32.partialorder %v1327_v42, 0.0 }
 0x14d   : > { %3197 = vst [vmem:[%s3648_s20 + $0x1e0] sm:$0xff] %v3121_v41   ;;  %vm1405_vm12 = vcmp.gt.f32.partialorder %v3331_v44, 0.0  ;;  %v1533_v46 = vmul.f32 0.2, %v3331_v44  ;;  %v3395_v47 = vpop.f32.mrf.mxu1  ;;  %v1658_v58 = vsel %vm1402_vm11, %v1071_v40, %v1530_v45 }
 0x14e   : > { %vm1469_vm13 = vcmp.gt.f32.partialorder %v3395_v47, 0.0  ;;  %v1597_v50 = vmul.f32 0.2, %v3395_v47  ;;  %v1074_v51 = vpop.f32.mrf.mxu0  ;;  %v1722_v61 = vsel %vm1466_vm14, %v1327_v42, %v1594_v49 }
 0x14f   : > { %v1661_v52 = vsel %vm1405_vm12, %v3331_v44, %v1533_v46  ;;  %vm1403_vm15 = vcmp.gt.f32.partialorder %v1074_v51, 0.0  ;;  %v1531_v53 = vmul.f32 0.2, %v1074_v51  ;;  %v1330_v54 = vpop.f32.mrf.mxu1 }
 0x150   : > { %v2976_v55 = vpack.c.bf16 %v1661_v52, %v1660_v43  ;;  %v1725_v56 = vsel %vm1469_vm13, %v3395_v47, %v1597_v50  ;;  %vm1467_vm0 = vcmp.gt.f32.partialorder %v1330_v54, 0.0  ;;  %v1595_v57 = vmul.f32 0.2, %v1330_v54 }
 0x151   : > { %v3136_v59 = vpack.c.bf16 %v1725_v56, %v1724_v48  ;;  %v1659_v60 = vsel %vm1403_vm15, %v1074_v51, %v1531_v53 }
 0x152   : > { %3168 = vst [vmem:[%s3648_s20 + $0xf8] sm:$0xff] %v2976_v55   ;;  %v2971_v62 = vpack.c.bf16 %v1659_v60, %v1658_v58  ;;  %v1723_v63 = vsel %vm1467_vm0, %v1330_v54, %v1595_v57 }
 0x153   : > { %3200 = vst [vmem:[%s3648_s20 + $0x1f8] sm:$0xff] %v3136_v59   ;;  %v3131_v0 = vpack.c.bf16 %v1723_v63, %v1722_v61 }
 0x154   : > { %3167 = vst [vmem:[%s3648_s20 + $0xf0] sm:$0xff] %v2971_v62  }
 0x155   : > { %3199 = vst [vmem:[%s3648_s20 + $0x1f0] sm:$0xff] %v3131_v0  }
 0x156 PF: > { %s12_s9 = sadd.s32 1, %s3477_s9  }
 0x157   : > { %p9_p4 = scmp.ge.s32.totalorder %s12_s9, 6  }
 0x159   :  { %11 = sbr.rel (!%p9_p4) target bundleno = 1 (0x1), region = 58 }

// kernel: discriminator_forward.9
= control target key start
LH: loop header
LB: loop body
LE: loop exit
PB: predicated region body
PF: predicated region fallthrough
CT: control target
= control target key end

     0   :  { %s1990_s12 = smov 0   ;;  %s2306_s0 = inlined_call_operand.vmem [shape: bf16[1024,128], index: 0, kind: input, shape index: {}]   ;;  %s2307_s1 = inlined_call_operand.vmem [shape: bf16[128,128], index: 1, kind: input, shape index: {}]   ;;  %s2308_s2 = inlined_call_operand.vmem [shape: bf16[1024,128], index: 2, kind: output, shape index: {0}]   ;;  %s2309_s3 = inlined_call_operand.vmem [shape: f32[2,2,128], index: 3, kind: output, shape index: {1}]  }
   0x1 LB: > { %s1996_s13 = sadd.s32 4294967295, %s1968_s12   ;;  %p1411_p0 = scmp.ge.s32.totalorder %s1968_s12, 1  ;;  %s1968_s12 = sphi %s1990_s12, %s14_s12  }
   0x2   : > { %p141_p1 = scmp.lt.s32.totalorder %s1968_s12, 3 }
   0x4   : > { %p142_p2 = pnand %p1411_p0, %p141_p1 }
   0x5   : > { %s1412_s16 = sshll.u32 (!%p142_p2), %s1996_s13, 6  ;;  %p181_p4 = scmp.lt.s32.totalorder (!%p142_p2), %s1996_s13, 1 }
   0x6   : > { %145 = sbr.rel (%p142_p2) target bundleno = 385 (0x181), region = 28  ;;  %p170_p3 = scmp.lt.s32.totalorder (!%p142_p2), %s1412_s16, 127 }
   0xb   : > { %v1922_v0 = vld [vmem:[%s2307_s1 + $0x38] sm:$0xff]   ;;  %v1923_v1 = vld [vmem:[%s2307_s1 + $0x30] sm:$0xff]   ;;  %s2311_s16 = smov (!%p170_p3, %s1412_s16), 127  ;;  %v1924_v2 = vld [vmem:[%s2307_s1 + $0x28] sm:$0xff]   ;;  %s2313_s13 = smov (!%p181_p4, %s1996_s13), 1  ;;  %vm1317_vm0 = vcmask 1040384  }
   0xc   : > { %1818 = vmatprep.subr.bf16.mxu0 %v1922_v0  ;;  %1898 = vmatprep.subr.bf16.mxu1 %v1922_v0  ;;  %s1413_s21 = sshll.u32 %s2311_s16, 2  ;;  %v1925_v3 = vld [vmem:[%s2307_s1 + $0x20] sm:$0xff]   ;;  %v1926_v5 = vld [vmem:[%s2307_s1 + $0x18] sm:$0xff]   ;;  %v1927_v6 = vld [vmem:[%s2307_s1 + $0x10] sm:$0xff]   ;;  %s1416_s11 = sshll.u32 %s2313_s13, 1 }
   0xd   : > { %1819 = vmatpush3.bf16.msra.mxu0 %v1922_v0  ;;  %1906 = vmatpush3.bf16.msra.mxu1 %v1922_v0  ;;  %s2018_s24 = scalar_lea.vmem %s2306_s0, %s1413_s21  ;;  %v1928_v7 = vld [vmem:[%s2307_s1 + $0x8] sm:$0xff]   ;;  %v1929_v8 = vld [vmem:[%s2307_s1] sm:$0xff]   ;;  %s2076_s10 = scalar_lea.vmem %s2308_s2, %s1413_s21 }
   0xe   : > { %1820 = vmatprep.subr.bf16.mxu0 %v1923_v1  ;;  %1899 = vmatprep.subr.bf16.mxu1 %v1923_v1  ;;  %v1930_v4 = vld [vmem:[%s2018_s24] sm:$0xff]   ;;  %v1931_v10 = vld [vmem:[%s2018_s24 + $0x8] sm:$0xff]   ;;  %v1932_v11 = vld [vmem:[%s2018_s24 + $0x10] sm:$0xff]   ;;  %s184_s16 = scalar_lea.vmem %s2309_s3, %s1416_s11 }
   0xf   : > { %1834 = vmatprep.mubr.bf16.mxu0 %v1930_v4  ;;  %v1946_v9 = vld [vmem:[%s2018_s24 + $0x80] sm:$0xff]   ;;  %v1947_v12 = vld [vmem:[%s2018_s24 + $0x88] sm:$0xff]   ;;  %v1948_v13 = vld [vmem:[%s2018_s24 + $0x90] sm:$0xff]  }
  0x10   : > { %1866 = vmatprep.mubr.bf16.mxu1 %v1946_v9  ;;  %v1933_v14 = vld [vmem:[%s2018_s24 + $0x18] sm:$0xff]   ;;  %v1934_v15 = vld [vmem:[%s2018_s24 + $0x20] sm:$0xff]   ;;  %v1935_v18 = vld [vmem:[%s2018_s24 + $0x28] sm:$0xff]  }
  0x11   : > { %1821 = vmatpush3.bf16.msra.mxu0 %v1923_v1  ;;  %1907 = vmatpush3.bf16.msra.mxu1 %v1923_v1  ;;  %v1949_v16 = vld [vmem:[%s2018_s24 + $0x98] sm:$0xff]   ;;  %v1950_v17 = vld [vmem:[%s2018_s24 + $0xa0] sm:$0xff]   ;;  %v1951_v19 = vld [vmem:[%s2018_s24 + $0xa8] sm:$0xff]  }
  0x12   : > { %1822 = vmatprep.subr.bf16.mxu0 %v1924_v2  ;;  %1900 = vmatprep.subr.bf16.mxu1 %v1924_v2  ;;  %v1936_v20 = vld [vmem:[%s2018_s24 + $0x30] sm:$0xff]   ;;  %v1937_v22 = vld [vmem:[%s2018_s24 + $0x38] sm:$0xff]   ;;  %v1938_v24 = vld [vmem:[%s2018_s24 + $0x40] sm:$0xff]  }
  0x13   : > { %v1952_v21 = vld [vmem:[%s2018_s24 + $0xb0] sm:$0xff]   ;;  %v1953_v23 = vld [vmem:[%s2018_s24 + $0xb8] sm:$0xff]   ;;  %v1954_v25 = vld [vmem:[%s2018_s24 + $0xc0] sm:$0xff]  }
  0x14   : > { %v1939_v26 = vld [vmem:[%s2018_s24 + $0x48] sm:$0xff]   ;;  %v1940_v28 = vld [vmem:[%s2018_s24 + $0x50] sm:$0xff]   ;;  %v1941_v30 = vld [vmem:[%s2018_s24 + $0x58] sm:$0xff]  }
  0x15   : > { %1823 = vmatpush3.bf16.msra.mxu0 %v1924_v2  ;;  %1908 = vmatpush3.bf16.msra.mxu1 %v1924_v2  ;;  %v1955_v27 = vld [vmem:[%s2018_s24 + $0xc8] sm:$0xff]   ;;  %v1956_v29 = vld [vmem:[%s2018_s24 + $0xd0] sm:$0xff]   ;;  %v1957_v31 = vld [vmem:[%s2018_s24 + $0xd8] sm:$0xff]  }
  0x16   : > { %1824 = vmatprep.subr.bf16.mxu0 %v1925_v3  ;;  %1901 = vmatprep.subr.bf16.mxu1 %v1925_v3  ;;  %v1942_v32 = vld [vmem:[%s2018_s24 + $0x60] sm:$0xff]   ;;  %v1943_v34 = vld [vmem:[%s2018_s24 + $0x68] sm:$0xff]   ;;  %v1944_v36 = vld [vmem:[%s2018_s24 + $0x70] sm:$0xff]  }
  0x17   : > { %v1958_v33 = vld [vmem:[%s2018_s24 + $0xe0] sm:$0xff]   ;;  %v1959_v35 = vld [vmem:[%s2018_s24 + $0xe8] sm:$0xff]   ;;  %v1960_v37 = vld [vmem:[%s2018_s24 + $0xf0] sm:$0xff]  }
  0x18   : > { %v1945_v38 = vld [vmem:[%s2018_s24 + $0x78] sm:$0xff]  }
  0x19   : > { %1825 = vmatpush3.bf16.msra.mxu0 %v1925_v3  ;;  %1909 = vmatpush3.bf16.msra.mxu1 %v1925_v3  ;;  %v1961_v39 = vld [vmem:[%s2018_s24 + $0xf8] sm:$0xff]  }
  0x1a   : > { %1826 = vmatprep.subr.bf16.mxu0 %v1926_v5  ;;  %1902 = vmatprep.subr.bf16.mxu1 %v1926_v5 }
  0x1d   : > { %1827 = vmatpush3.bf16.msra.mxu0 %v1926_v5  ;;  %1910 = vmatpush3.bf16.msra.mxu1 %v1926_v5 }
  0x1e   : > { %1828 = vmatprep.subr.bf16.mxu0 %v1927_v6  ;;  %1903 = vmatprep.subr.bf16.mxu1 %v1927_v6 }
  0x21   : > { %1829 = vmatpush3.bf16.msra.mxu0 %v1927_v6  ;;  %1911 = vmatpush3.bf16.msra.mxu1 %v1927_v6 }
  0x22   : > { %1830 = vmatprep.subr.bf16.mxu0 %v1928_v7  ;;  %1904 = vmatprep.subr.bf16.mxu1 %v1928_v7 }
  0x25   : > { %1831 = vmatpush3.bf16.msra.mxu0 %v1928_v7  ;;  %1912 = vmatpush3.bf16.msra.mxu1 %v1928_v7 }
  0x26   : > { %1832 = vmatprep.subr.bf16.mxu0 %v1929_v8  ;;  %1905 = vmatprep.subr.bf16.mxu1 %v1929_v8 }
  0x29   : > { %1833 = vmatpush3.bf16.msra.mxu0 %v1929_v8  ;;  %1913 = vmatpush3.bf16.msra.mxu1 %v1929_v8 }
  0x2c   : > { %1835 = vmatmul.mubr.bf16.vlgmr.msra.gmra.mxu0 %v1931_v10  ;;  %1867 = vmatmul.mubr.bf16.vlgmr.msra.gmra.mxu1 %v1947_v12 }
  0x2d   : > { %1838 = vmatprep.mubr.bf16.mxu0 %v1932_v11  ;;  %1870 = vmatprep.mubr.bf16.mxu1 %v1948_v13 }
  0x34   : > { %1839 = vmatmul.mubr.bf16.gmra.mxu0 %v1933_v14  ;;  %1871 = vmatmul.mubr.bf16.gmra.mxu1 %v1949_v16 }
  0x35   : > { %1842 = vmatprep.mubr.bf16.mxu0 %v1934_v15  ;;  %1874 = vmatprep.mubr.bf16.mxu1 %v1950_v17 }
  0x3c   : > { %1843 = vmatmul.mubr.bf16.gmra.mxu0 %v1935_v18  ;;  %1875 = vmatmul.mubr.bf16.gmra.mxu1 %v1951_v19 }
  0x3d   : > { %1846 = vmatprep.mubr.bf16.mxu0 %v1936_v20  ;;  %1878 = vmatprep.mubr.bf16.mxu1 %v1952_v21 }
  0x44   : > { %1847 = vmatmul.mubr.bf16.gmra.mxu0 %v1937_v22  ;;  %1879 = vmatmul.mubr.bf16.gmra.mxu1 %v1953_v23 }
  0x45   : > { %1850 = vmatprep.mubr.bf16.mxu0 %v1938_v24  ;;  %1882 = vmatprep.mubr.bf16.mxu1 %v1954_v25 }
  0x4c   : > { %1851 = vmatmul.mubr.bf16.gmra.mxu0 %v1939_v26  ;;  %1883 = vmatmul.mubr.bf16.gmra.mxu1 %v1955_v27 }
  0x4d   : > { %1854 = vmatprep.mubr.bf16.mxu0 %v1940_v28  ;;  %1886 = vmatprep.mubr.bf16.mxu1 %v1956_v29 }
  0x54   : > { %1855 = vmatmul.mubr.bf16.gmra.mxu0 %v1941_v30  ;;  %1887 = vmatmul.mubr.bf16.gmra.mxu1 %v1957_v31 }
  0x55   : > { %1858 = vmatprep.mubr.bf16.mxu0 %v1942_v32  ;;  %1890 = vmatprep.mubr.bf16.mxu1 %v1958_v33 }
  0x5c   : > { %1859 = vmatmul.mubr.bf16.gmra.mxu0 %v1943_v34  ;;  %1891 = vmatmul.mubr.bf16.gmra.mxu1 %v1959_v35 }
  0x5d   : > { %1862 = vmatprep.mubr.bf16.mxu0 %v1944_v36  ;;  %1894 = vmatprep.mubr.bf16.mxu1 %v1960_v37 }
  0x64   : > { %1863 = vmatmul.mubr.bf16.gmra.mxu0 %v1945_v38  ;;  %1895 = vmatmul.mubr.bf16.gmra.mxu1 %v1961_v39 }
  0xec   : > { %v1836_v40 = vpop.f32.mrf.mxu0  ;;  %v2067_v41 = vpop.f32.mrf.mxu1 }
  0xed   : > { %v1186_v57 = vmul.f32 %v1836_v40, %v1836_v40 }
  0xee   : > { %v540_v42 = vpop.f32.mrf.mxu0  ;;  %v2069_v43 = vpop.f32.mrf.mxu1 }
  0xef   : > { %v1184_v48 = vmul.f32 %v540_v42, %v540_v42 }
  0xf0   : > { %v1837_v44 = vpop.f32.mrf.mxu0  ;;  %v2078_v45 = vpop.f32.mrf.mxu1 }
  0xf1   : > { %v1595_v46 = vpack.c.bf16 %v1837_v44, %v1836_v40  ;;  %v1675_v47 = vpack.c.bf16 %v2078_v45, %v2067_v41  ;;  %v1187_v62 = vmul.f32 %v1837_v44, %v1837_v44 }
  0xf2   : > { %v543_v49 = vpop.f32.mrf.mxu0  ;;  %v2082_v50 = vpop.f32.mrf.mxu1 }
  0xf3   : > { %1747 = vst [vmem:[%s2076_s10 + $0x8] sm:$0xff] %v1595_v46   ;;  %v1590_v51 = vpack.c.bf16 %v543_v49, %v540_v42  ;;  %v1115_v52 = vadd.f32 %v543_v49, %v540_v42  ;;  %v1185_v53 = vmul.f32 %v543_v49, %v543_v49  ;;  %1763 = vst [vmem:[%s2076_s10 + $0x88] sm:$0xff] %v1675_v47  }
  0xf4   : > { %v1670_v54 = vpack.c.bf16 %v2082_v50, %v2069_v43  ;;  %v1840_v55 = vpop.f32.mrf.mxu0  ;;  %v2088_v56 = vpop.f32.mrf.mxu1 }
  0xf5   : > { %1591 = vst [vmem:[%s2076_s10] sm:$0xff] %v1590_v51   ;;  %v1116_v58 = vadd.f32 %v1836_v40, %v1115_v52  ;;  %v1248_v59 = vadd.f32 %v1185_v53, %v1184_v48  ;;  %v1190_v17 = vmul.f32 %v1840_v55, %v1840_v55 }
  0xf6   : > { %1762 = vst [vmem:[%s2076_s10 + $0x80] sm:$0xff] %v1670_v54   ;;  %v556_v60 = vpop.f32.mrf.mxu0  ;;  %v2092_v61 = vpop.f32.mrf.mxu1 }
  0xf7   : > { %v1249_v63 = vadd.f32 %v1248_v59, %v1186_v57  ;;  %v1117_v0 = vadd.f32 %v1837_v44, %v1116_v58  ;;  %v1188_v4 = vmul.f32 %v556_v60, %v556_v60 }
  0xf8   : > { %v1841_v1 = vpop.f32.mrf.mxu0  ;;  %v2094_v2 = vpop.f32.mrf.mxu1 }
  0xf9   : > { %v1118_v3 = vadd.f32 %v1117_v0, %v556_v60  ;;  %v1250_v5 = vadd.f32 %v1249_v63, %v1187_v62  ;;  %v1605_v6 = vpack.c.bf16 %v1841_v1, %v1840_v55  ;;  %v1685_v8 = vpack.c.bf16 %v2094_v2, %v2088_v56 }
  0xfa   : > { %v559_v7 = vpop.f32.mrf.mxu0  ;;  %v2098_v9 = vpop.f32.mrf.mxu1  ;;  %v1191_v22 = vmul.f32 %v1841_v1, %v1841_v1 }
  0xfb   : > { %v1251_v10 = vadd.f32 %v1250_v5, %v1188_v4  ;;  %1749 = vst [vmem:[%s2076_s10 + $0x18] sm:$0xff] %v1605_v6   ;;  %v1600_v11 = vpack.c.bf16 %v559_v7, %v556_v60  ;;  %v1119_v12 = vadd.f32 %v1118_v3, %v559_v7  ;;  %v1189_v13 = vmul.f32 %v559_v7, %v559_v7 }
  0xfc   : > { %v1844_v14 = vpop.f32.mrf.mxu0  ;;  %1765 = vst [vmem:[%s2076_s10 + $0x98] sm:$0xff] %v1685_v8   ;;  %v1680_v15 = vpack.c.bf16 %v2098_v9, %v2092_v61  ;;  %v2104_v16 = vpop.f32.mrf.mxu1 }
  0xfd   : > { %1748 = vst [vmem:[%s2076_s10 + $0x10] sm:$0xff] %v1600_v11   ;;  %v1120_v18 = vadd.f32 %v1840_v55, %v1119_v12  ;;  %v1252_v19 = vadd.f32 %v1251_v10, %v1189_v13  ;;  %v1194_v42 = vmul.f32 %v1844_v14, %v1844_v14 }
  0xfe   : > { %v572_v20 = vpop.f32.mrf.mxu0  ;;  %1764 = vst [vmem:[%s2076_s10 + $0x90] sm:$0xff] %v1680_v15   ;;  %v2108_v21 = vpop.f32.mrf.mxu1 }
  0xff   : > { %v1253_v23 = vadd.f32 %v1252_v19, %v1190_v17  ;;  %v1121_v24 = vadd.f32 %v1841_v1, %v1120_v18  ;;  %v1192_v28 = vmul.f32 %v572_v20, %v572_v20 }
 0x100   : > { %v1845_v25 = vpop.f32.mrf.mxu0  ;;  %v2110_v26 = vpop.f32.mrf.mxu1 }
 0x101   : > { %v1122_v27 = vadd.f32 %v1121_v24, %v572_v20  ;;  %v1254_v29 = vadd.f32 %v1253_v23, %v1191_v22  ;;  %v1615_v30 = vpack.c.bf16 %v1845_v25, %v1844_v14  ;;  %v1695_v32 = vpack.c.bf16 %v2110_v26, %v2104_v16 }
 0x102   : > { %v575_v31 = vpop.f32.mrf.mxu0  ;;  %v2114_v33 = vpop.f32.mrf.mxu1  ;;  %v1195_v49 = vmul.f32 %v1845_v25, %v1845_v25 }
 0x103   : > { %v1255_v34 = vadd.f32 %v1254_v29, %v1192_v28  ;;  %1751 = vst [vmem:[%s2076_s10 + $0x28] sm:$0xff] %v1615_v30   ;;  %v1610_v35 = vpack.c.bf16 %v575_v31, %v572_v20  ;;  %v1123_v36 = vadd.f32 %v1122_v27, %v575_v31  ;;  %v1193_v37 = vmul.f32 %v575_v31, %v575_v31 }
 0x104   : > { %v1848_v38 = vpop.f32.mrf.mxu0  ;;  %1767 = vst [vmem:[%s2076_s10 + $0xa8] sm:$0xff] %v1695_v32   ;;  %v1690_v39 = vpack.c.bf16 %v2114_v33, %v2108_v21  ;;  %v2120_v40 = vpop.f32.mrf.mxu1 }
 0x105   : > { %1750 = vst [vmem:[%s2076_s10 + $0x20] sm:$0xff] %v1610_v35   ;;  %v1124_v44 = vadd.f32 %v1844_v14, %v1123_v36  ;;  %v1256_v46 = vadd.f32 %v1255_v34, %v1193_v37  ;;  %v1198_v8 = vmul.f32 %v1848_v38, %v1848_v38 }
 0x106   : > { %v588_v47 = vpop.f32.mrf.mxu0  ;;  %1766 = vst [vmem:[%s2076_s10 + $0xa0] sm:$0xff] %v1690_v39   ;;  %v2124_v48 = vpop.f32.mrf.mxu1 }
 0x107   : > { %v1257_v51 = vadd.f32 %v1256_v46, %v1194_v42  ;;  %v1125_v52 = vadd.f32 %v1845_v25, %v1124_v44  ;;  %v1196_v57 = vmul.f32 %v588_v47, %v588_v47 }
 0x108   : > { %v1849_v53 = vpop.f32.mrf.mxu0  ;;  %v2126_v54 = vpop.f32.mrf.mxu1 }
 0x109   : > { %v1126_v55 = vadd.f32 %v1125_v52, %v588_v47  ;;  %v1258_v58 = vadd.f32 %v1257_v51, %v1195_v49  ;;  %v1625_v59 = vpack.c.bf16 %v1849_v53, %v1848_v38  ;;  %v1705_v62 = vpack.c.bf16 %v2126_v54, %v2120_v40 }
 0x10a   : > { %v591_v60 = vpop.f32.mrf.mxu0  ;;  %v2130_v63 = vpop.f32.mrf.mxu1  ;;  %v1199_v14 = vmul.f32 %v1849_v53, %v1849_v53 }
 0x10b   : > { %v1259_v0 = vadd.f32 %v1258_v58, %v1196_v57  ;;  %1753 = vst [vmem:[%s2076_s10 + $0x38] sm:$0xff] %v1625_v59   ;;  %v1620_v1 = vpack.c.bf16 %v591_v60, %v588_v47  ;;  %v1127_v3 = vadd.f32 %v1126_v55, %v591_v60  ;;  %v1197_v4 = vmul.f32 %v591_v60, %v591_v60 }
 0x10c   : > { %v1852_v5 = vpop.f32.mrf.mxu0  ;;  %1769 = vst [vmem:[%s2076_s10 + $0xb8] sm:$0xff] %v1705_v62   ;;  %v1700_v6 = vpack.c.bf16 %v2130_v63, %v2124_v48  ;;  %v2136_v7 = vpop.f32.mrf.mxu1 }
 0x10d   : > { %1752 = vst [vmem:[%s2076_s10 + $0x30] sm:$0xff] %v1620_v1   ;;  %v1128_v10 = vadd.f32 %v1848_v38, %v1127_v3  ;;  %v1260_v11 = vadd.f32 %v1259_v0, %v1197_v4  ;;  %v1202_v37 = vmul.f32 %v1852_v5, %v1852_v5 }
 0x10e   : > { %v604_v12 = vpop.f32.mrf.mxu0  ;;  %1768 = vst [vmem:[%s2076_s10 + $0xb0] sm:$0xff] %v1700_v6   ;;  %v2140_v13 = vpop.f32.mrf.mxu1 }
 0x10f   : > { %v1261_v15 = vadd.f32 %v1260_v11, %v1198_v8  ;;  %v1129_v17 = vadd.f32 %v1849_v53, %v1128_v10  ;;  %v1200_v22 = vmul.f32 %v604_v12, %v604_v12 }
 0x110   : > { %v1853_v18 = vpop.f32.mrf.mxu0  ;;  %v2142_v19 = vpop.f32.mrf.mxu1 }
 0x111   : > { %v1130_v20 = vadd.f32 %v1129_v17, %v604_v12  ;;  %v1262_v23 = vadd.f32 %v1261_v15, %v1199_v14  ;;  %v1635_v24 = vpack.c.bf16 %v1853_v18, %v1852_v5  ;;  %v1715_v27 = vpack.c.bf16 %v2142_v19, %v2136_v7 }
 0x112   : > { %v607_v25 = vpop.f32.mrf.mxu0  ;;  %v2146_v28 = vpop.f32.mrf.mxu1  ;;  %v1203_v46 = vmul.f32 %v1853_v18, %v1853_v18 }
 0x113   : > { %v1263_v29 = vadd.f32 %v1262_v23, %v1200_v22  ;;  %1755 = vst [vmem:[%s2076_s10 + $0x48] sm:$0xff] %v1635_v24   ;;  %v1630_v30 = vpack.c.bf16 %v607_v25, %v604_v12  ;;  %v1131_v31 = vadd.f32 %v1130_v20, %v607_v25  ;;  %v1201_v32 = vmul.f32 %v607_v25, %v607_v25 }
 0x114   : > { %v1856_v34 = vpop.f32.mrf.mxu0  ;;  %1771 = vst [vmem:[%s2076_s10 + $0xc8] sm:$0xff] %v1715_v27   ;;  %v1710_v35 = vpack.c.bf16 %v2146_v28, %v2140_v13  ;;  %v2152_v36 = vpop.f32.mrf.mxu1 }
 0x115   : > { %1754 = vst [vmem:[%s2076_s10 + $0x40] sm:$0xff] %v1630_v30   ;;  %v1132_v38 = vadd.f32 %v1852_v5, %v1131_v31  ;;  %v1264_v39 = vadd.f32 %v1263_v29, %v1201_v32  ;;  %v1206_v10 = vmul.f32 %v1856_v34, %v1856_v34 }
 0x116   : > { %v620_v42 = vpop.f32.mrf.mxu0  ;;  %1770 = vst [vmem:[%s2076_s10 + $0xc0] sm:$0xff] %v1710_v35   ;;  %v2156_v44 = vpop.f32.mrf.mxu1 }
 0x117   : > { %v1265_v47 = vadd.f32 %v1264_v39, %v1202_v37  ;;  %v1133_v49 = vadd.f32 %v1853_v18, %v1132_v38  ;;  %v1204_v55 = vmul.f32 %v620_v42, %v620_v42 }
 0x118   : > { %v1857_v51 = vpop.f32.mrf.mxu0  ;;  %v2158_v52 = vpop.f32.mrf.mxu1 }
 0x119   : > { %v1134_v53 = vadd.f32 %v1133_v49, %v620_v42  ;;  %v1266_v57 = vadd.f32 %v1265_v47, %v1203_v46  ;;  %v1645_v58 = vpack.c.bf16 %v1857_v51, %v1856_v34  ;;  %v1725_v60 = vpack.c.bf16 %v2158_v52, %v2152_v36 }
 0x11a   : > { %v623_v59 = vpop.f32.mrf.mxu0  ;;  %v2162_v62 = vpop.f32.mrf.mxu1  ;;  %v1207_v17 = vmul.f32 %v1857_v51, %v1857_v51 }
 0x11b   : > { %v1267_v0 = vadd.f32 %v1266_v57, %v1204_v55  ;;  %1757 = vst [vmem:[%s2076_s10 + $0x58] sm:$0xff] %v1645_v58   ;;  %v1640_v1 = vpack.c.bf16 %v623_v59, %v620_v42  ;;  %v1135_v3 = vadd.f32 %v1134_v53, %v623_v59  ;;  %v1205_v4 = vmul.f32 %v623_v59, %v623_v59 }
 0x11c   : > { %v1860_v5 = vpop.f32.mrf.mxu0  ;;  %1773 = vst [vmem:[%s2076_s10 + $0xd8] sm:$0xff] %v1725_v60   ;;  %v1720_v6 = vpack.c.bf16 %v2162_v62, %v2156_v44  ;;  %v2168_v8 = vpop.f32.mrf.mxu1 }
 0x11d   : > { %1756 = vst [vmem:[%s2076_s10 + $0x50] sm:$0xff] %v1640_v1   ;;  %v1136_v11 = vadd.f32 %v1856_v34, %v1135_v3  ;;  %v1268_v12 = vadd.f32 %v1267_v0, %v1205_v4  ;;  %v1210_v47 = vmul.f32 %v1860_v5, %v1860_v5 }
 0x11e   : > { %v636_v14 = vpop.f32.mrf.mxu0  ;;  %1772 = vst [vmem:[%s2076_s10 + $0xd0] sm:$0xff] %v1720_v6   ;;  %v2172_v15 = vpop.f32.mrf.mxu1 }
 0x11f   : > { %v1269_v18 = vadd.f32 %v1268_v12, %v1206_v10  ;;  %v1137_v20 = vadd.f32 %v1857_v51, %v1136_v11  ;;  %v1208_v25 = vmul.f32 %v636_v14, %v636_v14 }
 0x120   : > { %v1861_v22 = vpop.f32.mrf.mxu0  ;;  %v2174_v23 = vpop.f32.mrf.mxu1 }
 0x121   : > { %v1138_v24 = vadd.f32 %v1137_v20, %v636_v14  ;;  %v1270_v27 = vadd.f32 %v1269_v18, %v1207_v17  ;;  %v1655_v29 = vpack.c.bf16 %v1861_v22, %v1860_v5  ;;  %v1735_v31 = vpack.c.bf16 %v2174_v23, %v2168_v8 }
 0x122   : > { %v639_v30 = vpop.f32.mrf.mxu0  ;;  %v2178_v32 = vpop.f32.mrf.mxu1  ;;  %v1211_v57 = vmul.f32 %v1861_v22, %v1861_v22 }
 0x123   : > { %v1271_v34 = vadd.f32 %v1270_v27, %v1208_v25  ;;  %1759 = vst [vmem:[%s2076_s10 + $0x68] sm:$0xff] %v1655_v29   ;;  %v1650_v35 = vpack.c.bf16 %v639_v30, %v636_v14  ;;  %v1139_v37 = vadd.f32 %v1138_v24, %v639_v30  ;;  %v1209_v38 = vmul.f32 %v639_v30, %v639_v30 }
 0x124   : > { %v1864_v39 = vpop.f32.mrf.mxu0  ;;  %1775 = vst [vmem:[%s2076_s10 + $0xe8] sm:$0xff] %v1735_v31   ;;  %v1730_v42 = vpack.c.bf16 %v2178_v32, %v2172_v15  ;;  %v2184_v46 = vpop.f32.mrf.mxu1  ;;  %v1216_v31 = vmul.f32 %v2069_v43, %v2069_v43 }
 0x125   : > { %1758 = vst [vmem:[%s2076_s10 + $0x60] sm:$0xff] %v1650_v35   ;;  %v1140_v49 = vadd.f32 %v1860_v5, %v1139_v37  ;;  %v1272_v51 = vadd.f32 %v1271_v34, %v1209_v38  ;;  %v1217_v38 = vmul.f32 %v2082_v50, %v2082_v50 }
 0x126   : > { %v652_v53 = vpop.f32.mrf.mxu0  ;;  %1774 = vst [vmem:[%s2076_s10 + $0xe0] sm:$0xff] %v1730_v42   ;;  %v2188_v55 = vpop.f32.mrf.mxu1 }
 0x127   : > { %v1273_v58 = vadd.f32 %v1272_v51, %v1210_v47  ;;  %v1141_v59 = vadd.f32 %v1861_v22, %v1140_v49  ;;  %v1212_v3 = vmul.f32 %v652_v53, %v652_v53  ;;  %v1214_v22 = vmul.f32 %v1864_v39, %v1864_v39 }
 0x128   : > { %v1865_v60 = vpop.f32.mrf.mxu0  ;;  %v2190_v0 = vpop.f32.mrf.mxu1  ;;  %v1219_v51 = vmul.f32 %v2078_v45, %v2078_v45 }
 0x129   : > { %v1142_v1 = vadd.f32 %v1141_v59, %v652_v53  ;;  %v1274_v4 = vadd.f32 %v1273_v58, %v1211_v57  ;;  %v1665_v6 = vpack.c.bf16 %v1865_v60, %v1864_v39  ;;  %v1745_v10 = vpack.c.bf16 %v2190_v0, %v2184_v46 }
 0x12a   : > { %v655_v5 = vpop.f32.mrf.mxu0  ;;  %v2194_v11 = vpop.f32.mrf.mxu1  ;;  %v1215_v27 = vmul.f32 %v1865_v60, %v1865_v60  ;;  %v1220_v58 = vmul.f32 %v2092_v61, %v2092_v61 }
 0x12b   : > { %v1275_v12 = vadd.f32 %v1274_v4, %v1212_v3  ;;  %1761 = vst [vmem:[%s2076_s10 + $0x78] sm:$0xff] %v1665_v6   ;;  %v1660_v14 = vpack.c.bf16 %v655_v5, %v652_v53  ;;  %v1143_v17 = vadd.f32 %v1142_v1, %v655_v5  ;;  %v1213_v18 = vmul.f32 %v655_v5, %v655_v5 }
 0x12c   : > { %1777 = vst [vmem:[%s2076_s10 + $0xf8] sm:$0xff] %v1745_v10   ;;  %v1740_v20 = vpack.c.bf16 %v2194_v11, %v2188_v55  ;;  %v1221_v1 = vmul.f32 %v2098_v9, %v2098_v9  ;;  %v1224_v10 = vmul.f32 %v2108_v21, %v2108_v21 }
 0x12d   : > { %1760 = vst [vmem:[%s2076_s10 + $0x70] sm:$0xff] %v1660_v14   ;;  %v1144_v24 = vadd.f32 %v1864_v39, %v1143_v17  ;;  %v1276_v25 = vadd.f32 %v1275_v12, %v1213_v18  ;;  %v1218_v39 = vmul.f32 %v2067_v41, %v2067_v41  ;;  %v1225_v17 = vmul.f32 %v2114_v33, %v2114_v33 }
 0x12e   : > { %1776 = vst [vmem:[%s2076_s10 + $0xf0] sm:$0xff] %v1740_v20  }
 0x12f   : > { %v1145_v29 = vadd.f32 %v1865_v60, %v1144_v24  ;;  %v1277_v30 = vadd.f32 %v1276_v25, %v1214_v22  ;;  %v1228_v25 = vmul.f32 %v2124_v48, %v2124_v48 }
 0x131   : > { %v1278_v34 = vadd.f32 %v1277_v30, %v1215_v27  ;;  %v1146_v35 = vadd.f32 %v1145_v29, %v2069_v43  ;;  %v1229_v30 = vmul.f32 %v2130_v63, %v2130_v63 }
 0x133   : > { %v1147_v37 = vadd.f32 %v1146_v35, %v2082_v50  ;;  %v1279_v42 = vadd.f32 %v1278_v34, %v1216_v31 }
 0x135   : > { %v1148_v47 = vadd.f32 %v2067_v41, %v1147_v37  ;;  %v1280_v49 = vadd.f32 %v1279_v42, %v1217_v38  ;;  %v1222_v41 = vmul.f32 %v2088_v56, %v2088_v56  ;;  %v1232_v38 = vmul.f32 %v2140_v13, %v2140_v13 }
 0x137   : > { %v1281_v53 = vadd.f32 %v1280_v49, %v1218_v39  ;;  %v1149_v57 = vadd.f32 %v2078_v45, %v1148_v47  ;;  %v1223_v45 = vmul.f32 %v2094_v2, %v2094_v2  ;;  %v1233_v47 = vmul.f32 %v2146_v28, %v2146_v28 }
 0x139   : > { %v1150_v43 = vadd.f32 %v1149_v57, %v2092_v61  ;;  %v1282_v59 = vadd.f32 %v1281_v53, %v1219_v51 }
 0x13b   : > { %v1283_v50 = vadd.f32 %v1282_v59, %v1220_v58  ;;  %v1151_v60 = vadd.f32 %v1150_v43, %v2098_v9  ;;  %v1236_v43 = vmul.f32 %v2156_v44, %v2156_v44 }
 0x13d   : > { %v1152_v3 = vadd.f32 %v2088_v56, %v1151_v60  ;;  %v1284_v4 = vadd.f32 %v1283_v50, %v1221_v1  ;;  %v1226_v56 = vmul.f32 %v2104_v16, %v2104_v16  ;;  %v1237_v50 = vmul.f32 %v2162_v62, %v2162_v62 }
 0x13f   : > { %v1285_v6 = vadd.f32 %v1284_v4, %v1222_v41  ;;  %v1153_v5 = vadd.f32 %v2094_v2, %v1152_v3  ;;  %v1227_v2 = vmul.f32 %v2110_v26, %v2110_v26  ;;  %v1240_v4 = vmul.f32 %v2172_v15, %v2172_v15 }
 0x141   : > { %v1154_v61 = vadd.f32 %v1153_v5, %v2108_v21  ;;  %v1286_v12 = vadd.f32 %v1285_v6, %v1223_v45  ;;  %v1241_v5 = vmul.f32 %v2178_v32, %v2178_v32 }
 0x143   : > { %v1287_v14 = vadd.f32 %v1286_v12, %v1224_v10  ;;  %v1155_v9 = vadd.f32 %v1154_v61, %v2114_v33 }
 0x145   : > { %v1156_v18 = vadd.f32 %v2104_v16, %v1155_v9  ;;  %v1288_v20 = vadd.f32 %v1287_v14, %v1225_v17  ;;  %v1230_v16 = vmul.f32 %v2120_v40, %v2120_v40  ;;  %v1244_v9 = vmul.f32 %v2188_v55, %v2188_v55 }
 0x147   : > { %v1289_v22 = vadd.f32 %v1288_v20, %v1226_v56  ;;  %v1157_v24 = vadd.f32 %v2110_v26, %v1156_v18  ;;  %v1231_v26 = vmul.f32 %v2126_v54, %v2126_v54  ;;  %v1246_v18 = vmul.f32 %v2184_v46, %v2184_v46 }
 0x149   : > { %v1158_v21 = vadd.f32 %v1157_v24, %v2124_v48  ;;  %v1290_v27 = vadd.f32 %v1289_v22, %v1227_v2 }
 0x14b   : > { %v1291_v29 = vadd.f32 %v1290_v27, %v1228_v25  ;;  %v1159_v33 = vadd.f32 %v1158_v21, %v2130_v63 }
 0x14d   : > { %v1160_v31 = vadd.f32 %v2120_v40, %v1159_v33  ;;  %v1292_v34 = vadd.f32 %v1291_v29, %v1229_v30  ;;  %v1234_v40 = vmul.f32 %v2136_v7, %v2136_v7 }
 0x14f   : > { %v1293_v35 = vadd.f32 %v1292_v34, %v1230_v16  ;;  %v1161_v37 = vadd.f32 %v2126_v54, %v1160_v31  ;;  %v1235_v54 = vmul.f32 %v2142_v19, %v2142_v19 }
 0x151   : > { %v1162_v48 = vadd.f32 %v1161_v37, %v2140_v13  ;;  %v1294_v42 = vadd.f32 %v1293_v35, %v1231_v26 }
 0x153   : > { %v1295_v39 = vadd.f32 %v1294_v42, %v1232_v38  ;;  %v1163_v63 = vadd.f32 %v1162_v48, %v2146_v28 }
 0x155   : > { %v1164_v49 = vadd.f32 %v2136_v7, %v1163_v63  ;;  %v1296_v51 = vadd.f32 %v1295_v39, %v1233_v47  ;;  %v1238_v7 = vmul.f32 %v2152_v36, %v2152_v36 }
 0x157   : > { %v1297_v53 = vadd.f32 %v1296_v51, %v1234_v40  ;;  %v1165_v57 = vadd.f32 %v2142_v19, %v1164_v49  ;;  %v1239_v19 = vmul.f32 %v2158_v52, %v2158_v52 }
 0x159   : > { %v1166_v13 = vadd.f32 %v1165_v57, %v2156_v44  ;;  %v1298_v58 = vadd.f32 %v1297_v53, %v1235_v54 }
 0x15b   : > { %v1299_v59 = vadd.f32 %v1298_v58, %v1236_v43  ;;  %v1167_v28 = vadd.f32 %v1166_v13, %v2162_v62 }
 0x15d   : > { %v1168_v60 = vadd.f32 %v2152_v36, %v1167_v28  ;;  %v1300_v1 = vadd.f32 %v1299_v59, %v1237_v50  ;;  %v1242_v36 = vmul.f32 %v2168_v8, %v2168_v8 }
 0x15f   : > { %v1301_v41 = vadd.f32 %v1300_v1, %v1238_v7  ;;  %v1169_v3 = vadd.f32 %v2158_v52, %v1168_v60  ;;  %v1243_v52 = vmul.f32 %v2174_v23, %v2174_v23 }
 0x161   : > { %v1170_v44 = vadd.f32 %v1169_v3, %v2172_v15  ;;  %v1302_v45 = vadd.f32 %v1301_v41, %v1239_v19 }
 0x163   : > { %v1303_v6 = vadd.f32 %v1302_v45, %v1240_v4  ;;  %v1171_v62 = vadd.f32 %v1170_v44, %v2178_v32 }
 0x165   : > { %v1172_v61 = vadd.f32 %v2168_v8, %v1171_v62  ;;  %v1304_v10 = vadd.f32 %v1303_v6, %v1241_v5  ;;  %v1245_v8 = vmul.f32 %v2194_v11, %v2194_v11 }
 0x167   : > { %v1305_v12 = vadd.f32 %v1304_v10, %v1242_v36  ;;  %v1173_v15 = vadd.f32 %v2174_v23, %v1172_v61  ;;  %v1247_v23 = vmul.f32 %v2190_v0, %v2190_v0 }
 0x169   : > { %v1174_v14 = vadd.f32 %v1173_v15, %v2188_v55  ;;  %v1306_v17 = vadd.f32 %v1305_v12, %v1243_v52 }
 0x16b   : > { %v1307_v32 = vadd.f32 %v1306_v17, %v1244_v9  ;;  %v1175_v56 = vadd.f32 %v1174_v14, %v2194_v11 }
 0x16d   : > { %v1176_v20 = vadd.f32 %v2184_v46, %v1175_v56  ;;  %v1308_v2 = vadd.f32 %v1307_v32, %v1245_v8 }
 0x16f   : > { %v1177_v22 = vadd.f32 %v2190_v0, %v1176_v20  ;;  %v1309_v55 = vadd.f32 %v1308_v2, %v1246_v18 }
 0x171   : > { %v1178_v24 = vrot.slane %v1177_v22, 4  ;;  %v1310_v21 = vadd.f32 %v1309_v55, %v1247_v23 }
 0x173   : > { %v1179_v25 = vadd.f32 %v1178_v24, %v1177_v22  ;;  %v1311_v27 = vrot.slane %v1310_v21, 4 }
 0x175   : > { %v1180_v29 = vrot.slane %v1179_v25, 2  ;;  %v1312_v33 = vadd.f32 %v1311_v27, %v1310_v21 }
 0x177   : > { %v1181_v11 = vadd.f32 %v1180_v29, %v1179_v25  ;;  %v1313_v30 = vrot.slane %v1312_v33, 2 }
 0x179   : > { %v1182_v16 = vrot.slane %v1181_v11, 1  ;;  %v1314_v31 = vadd.f32 %v1313_v30, %v1312_v33 }
 0x17b   : > { %v1315_v46 = vrot.slane %v1314_v31, 1  ;;  %v1183_v0 = vadd.f32 %v1182_v16, %v1181_v11 }
 0x17d   : > { %v1316_v34 = vadd.f32 %v1315_v46, %v1314_v31 }
 0x17f   : > { %v1318_v26 = vsel %vm1317_vm0, %v1183_v0, %v1316_v34 }
 0x180   : > { %1319 = vst [vmem:[%s184_s16] sm:$0x3] %v1318_v26 }
 0x181 PF: > { %s14_s12 = sadd.s32 1, %s1968_s12  }
 0x182   : > { %p11_p5 = scmp.ge.s32.totalorder %s14_s12, 4  }
 0x184   :  { %13 = sbr.rel (!%p11_p5) target bundleno = 1 (0x1), region = 70 }

// kernel: discriminator_forward.10
= control target key start
LH: loop header
LB: loop body
LE: loop exit
PB: predicated region body
PF: predicated region fallthrough
CT: control target
= control target key end

     0   :  { %s1539_s12 = smov 0   ;;  %s1770_s0 = inlined_call_operand.vmem [shape: bf16[1024,128], index: 0, kind: input, shape index: {}]   ;;  %s1771_s1 = inlined_call_operand.vmem [shape: f32[1,128], index: 1, kind: input, shape index: {}]   ;;  %s1772_s2 = inlined_call_operand.vmem [shape: f32[1,128], index: 2, kind: input, shape index: {}]   ;;  %s1773_s3 = inlined_call_operand.vmem [shape: bf16[1024,128], index: 3, kind: output, shape index: {}]  }
   0x1 LB: > { %s1012_s13 = sadd.s32 4294967295, %s1517_s12   ;;  %p1016_p0 = scmp.ge.s32.totalorder %s1517_s12, 1  ;;  %s1517_s12 = sphi %s1539_s12, %s13_s12  }
   0x2   : > { %p138_p1 = scmp.lt.s32.totalorder %s1517_s12, 3 }
   0x4   : > { %p139_p2 = pnand %p1016_p0, %p138_p1 }
   0x5   : > { %s1017_s14 = sshll.u32 (!%p139_p2), %s1012_s13, 6 }
   0x6   : > { %142 = sbr.rel (%p139_p2) target bundleno = 127 (0x7f), region = 32  ;;  %p163_p3 = scmp.lt.s32.totalorder (!%p139_p2), %s1017_s14, 127 }
   0xb   : > { %s1775_s14 = smov (!%p163_p3, %s1017_s14), 127  ;;  %v1560_v0 = vld [vmem:[%s1771_s1] ss:$0 sm:$0xff] }
   0xc   : > { %s1018_s15 = sshll.u32 %s1775_s14, 2  ;;  %v1569_v9 = vld [vmem:[%s1772_s2] ss:$0 sm:$0xff] }
   0xd   : > { %s1555_s18 = scalar_lea.vmem %s1770_s0, %s1018_s15  ;;  %s1592_s25 = scalar_lea.vmem %s1773_s3, %s1018_s15 }
   0xe   : > { %v1154_v1 = vld [vmem:[%s1555_s18] sm:$0xff]   ;;  %v1441_v2 = vld [vmem:[%s1555_s18 + $0x8] sm:$0xff]   ;;  %v1442_v3 = vld [vmem:[%s1555_s18 + $0x10] sm:$0xff]  }
   0xf   : > { %v1155_v4 = vunpack.c.l.bf16 %v1154_v1  ;;  %v1156_v5 = vunpack.c.h.bf16 %v1154_v1  ;;  %v1159_v6 = vunpack.c.l.bf16 %v1441_v2  ;;  %v1160_v7 = vunpack.c.h.bf16 %v1441_v2  ;;  %v1443_v8 = vld [vmem:[%s1555_s18 + $0x18] sm:$0xff]   ;;  %v1444_v36 = vld [vmem:[%s1555_s18 + $0x20] sm:$0xff]   ;;  %v1445_v41 = vld [vmem:[%s1555_s18 + $0x28] sm:$0xff]  }
  0x10   : > { %v1163_v10 = vunpack.c.l.bf16 %v1442_v3  ;;  %v1164_v11 = vunpack.c.h.bf16 %v1442_v3  ;;  %v1167_v12 = vunpack.c.l.bf16 %v1443_v8  ;;  %v1168_v13 = vunpack.c.h.bf16 %v1443_v8  ;;  %v1446_v52 = vld [vmem:[%s1555_s18 + $0x30] sm:$0xff]   ;;  %v1447_v53 = vld [vmem:[%s1555_s18 + $0x38] sm:$0xff]  }
  0x11   : > { %v309_v14 = vmul.f32 %v1155_v4, %v1560_v0  ;;  %v310_v15 = vmul.f32 %v1156_v5, %v1560_v0  ;;  %v311_v16 = vmul.f32 %v1159_v6, %v1560_v0  ;;  %v312_v17 = vmul.f32 %v1160_v7, %v1560_v0 }
  0x12   : > { %v313_v18 = vmul.f32 %v1163_v10, %v1560_v0  ;;  %v314_v19 = vmul.f32 %v1164_v11, %v1560_v0  ;;  %v315_v20 = vmul.f32 %v1167_v12, %v1560_v0  ;;  %v316_v21 = vmul.f32 %v1168_v13, %v1560_v0 }
  0x13   : > { %v380_v22 = vadd.f32 %v1569_v9, %v309_v14  ;;  %v381_v23 = vadd.f32 %v1569_v9, %v310_v15  ;;  %v382_v24 = vadd.f32 %v1569_v9, %v311_v16  ;;  %v383_v25 = vadd.f32 %v1569_v9, %v312_v17 }
  0x14   : > { %v384_v26 = vadd.f32 %v1569_v9, %v313_v18  ;;  %v385_v27 = vadd.f32 %v1569_v9, %v314_v19  ;;  %v386_v28 = vadd.f32 %v1569_v9, %v315_v20  ;;  %v387_v29 = vadd.f32 %v1569_v9, %v316_v21  ;;  %v1448_v20 = vld [vmem:[%s1555_s18 + $0x40] sm:$0xff]  }
  0x15   : > { %vm444_vm0 = vcmp.gt.f32.partialorder %v380_v22, 0.0  ;;  %vm445_vm1 = vcmp.gt.f32.partialorder %v381_v23, 0.0  ;;  %v508_v30 = vmul.f32 0.2, %v380_v22  ;;  %v509_v31 = vmul.f32 0.2, %v381_v23 }
  0x16   : > { %vm446_vm2 = vcmp.gt.f32.partialorder %v382_v24, 0.0  ;;  %vm447_vm3 = vcmp.gt.f32.partialorder %v383_v25, 0.0  ;;  %v510_v32 = vmul.f32 0.2, %v382_v24  ;;  %v511_v33 = vmul.f32 0.2, %v383_v25 }
  0x17   : > { %v572_v34 = vsel %vm444_vm0, %v380_v22, %v508_v30  ;;  %v573_v35 = vsel %vm445_vm1, %v381_v23, %v509_v31  ;;  %vm448_vm4 = vcmp.gt.f32.partialorder %v384_v26, 0.0  ;;  %vm449_vm5 = vcmp.gt.f32.partialorder %v385_v27, 0.0 }
  0x18   : > { %v1284_v37 = vpack.c.bf16 %v573_v35, %v572_v34  ;;  %v574_v38 = vsel %vm446_vm2, %v382_v24, %v510_v32  ;;  %v575_v39 = vsel %vm447_vm3, %v383_v25, %v511_v33  ;;  %v512_v40 = vmul.f32 0.2, %v384_v26  ;;  %v1449_v24 = vld [vmem:[%s1555_s18 + $0x48] sm:$0xff]  }
  0x19   : > { %v1289_v42 = vpack.c.bf16 %v575_v39, %v574_v38  ;;  %v513_v43 = vmul.f32 0.2, %v385_v27  ;;  %vm450_vm6 = vcmp.gt.f32.partialorder %v386_v28, 0.0  ;;  %vm451_vm7 = vcmp.gt.f32.partialorder %v387_v29, 0.0 }
  0x1a   : > { %1285 = vst [vmem:[%s1592_s25] sm:$0xff] %v1284_v37   ;;  %v576_v44 = vsel %vm448_vm4, %v384_v26, %v512_v40  ;;  %v514_v45 = vmul.f32 0.2, %v386_v28  ;;  %v515_v46 = vmul.f32 0.2, %v387_v29  ;;  %v1171_v47 = vunpack.c.l.bf16 %v1444_v36 }
  0x1b   : > { %1472 = vst [vmem:[%s1592_s25 + $0x8] sm:$0xff] %v1289_v42   ;;  %v577_v48 = vsel %vm449_vm5, %v385_v27, %v513_v43  ;;  %v1172_v49 = vunpack.c.h.bf16 %v1444_v36  ;;  %v1175_v50 = vunpack.c.l.bf16 %v1445_v41  ;;  %v1176_v51 = vunpack.c.h.bf16 %v1445_v41  ;;  %v1450_v36 = vld [vmem:[%s1555_s18 + $0x50] sm:$0xff]  }
  0x1c   : > { %v1294_v54 = vpack.c.bf16 %v577_v48, %v576_v44  ;;  %v578_v55 = vsel %vm450_vm6, %v386_v28, %v514_v45  ;;  %v579_v56 = vsel %vm451_vm7, %v387_v29, %v515_v46  ;;  %v317_v57 = vmul.f32 %v1171_v47, %v1560_v0 }
  0x1d   : > { %v1299_v58 = vpack.c.bf16 %v579_v56, %v578_v55  ;;  %v318_v59 = vmul.f32 %v1172_v49, %v1560_v0  ;;  %v319_v60 = vmul.f32 %v1175_v50, %v1560_v0  ;;  %v320_v61 = vmul.f32 %v1176_v51, %v1560_v0  ;;  %v1451_v55 = vld [vmem:[%s1555_s18 + $0x58] sm:$0xff]  }
  0x1e   : > { %1473 = vst [vmem:[%s1592_s25 + $0x10] sm:$0xff] %v1294_v54   ;;  %v388_v62 = vadd.f32 %v1569_v9, %v317_v57  ;;  %v1179_v63 = vunpack.c.l.bf16 %v1446_v52  ;;  %v1180_v1 = vunpack.c.h.bf16 %v1446_v52  ;;  %v1183_v2 = vunpack.c.l.bf16 %v1447_v53 }
  0x1f   : > { %1474 = vst [vmem:[%s1592_s25 + $0x18] sm:$0xff] %v1299_v58   ;;  %v389_v3 = vadd.f32 %v1569_v9, %v318_v59  ;;  %v390_v4 = vadd.f32 %v1569_v9, %v319_v60  ;;  %v391_v5 = vadd.f32 %v1569_v9, %v320_v61  ;;  %v1184_v6 = vunpack.c.h.bf16 %v1447_v53 }
  0x20   : > { %vm452_vm8 = vcmp.gt.f32.partialorder %v388_v62, 0.0  ;;  %v516_v7 = vmul.f32 0.2, %v388_v62  ;;  %v321_v8 = vmul.f32 %v1179_v63, %v1560_v0  ;;  %v322_v10 = vmul.f32 %v1180_v1, %v1560_v0  ;;  %v1452_v1 = vld [vmem:[%s1555_s18 + $0x60] sm:$0xff]  }
  0x21   : > { %vm453_vm9 = vcmp.gt.f32.partialorder %v389_v3, 0.0  ;;  %v517_v11 = vmul.f32 0.2, %v389_v3  ;;  %vm454_vm10 = vcmp.gt.f32.partialorder %v390_v4, 0.0  ;;  %vm455_vm11 = vcmp.gt.f32.partialorder %v391_v5, 0.0 }
  0x22   : > { %v580_v12 = vsel %vm452_vm8, %v388_v62, %v516_v7  ;;  %v518_v13 = vmul.f32 0.2, %v390_v4  ;;  %v519_v14 = vmul.f32 0.2, %v391_v5  ;;  %v392_v15 = vadd.f32 %v1569_v9, %v321_v8 }
  0x23   : > { %v581_v16 = vsel %vm453_vm9, %v389_v3, %v517_v11  ;;  %v393_v17 = vadd.f32 %v1569_v9, %v322_v10  ;;  %v323_v18 = vmul.f32 %v1183_v2, %v1560_v0  ;;  %v324_v19 = vmul.f32 %v1184_v6, %v1560_v0  ;;  %v1453_v6 = vld [vmem:[%s1555_s18 + $0x68] sm:$0xff]  }
  0x24   : > { %v1304_v21 = vpack.c.bf16 %v581_v16, %v580_v12  ;;  %v582_v22 = vsel %vm454_vm10, %v390_v4, %v518_v13  ;;  %v583_v23 = vsel %vm455_vm11, %v391_v5, %v519_v14  ;;  %vm456_vm12 = vcmp.gt.f32.partialorder %v392_v15, 0.0 }
  0x25   : > { %v1309_v25 = vpack.c.bf16 %v583_v23, %v582_v22  ;;  %vm457_vm13 = vcmp.gt.f32.partialorder %v393_v17, 0.0  ;;  %v520_v26 = vmul.f32 0.2, %v392_v15  ;;  %v521_v27 = vmul.f32 0.2, %v393_v17  ;;  %v1454_v22 = vld [vmem:[%s1555_s18 + $0x70] sm:$0xff]  }
  0x26   : > { %1475 = vst [vmem:[%s1592_s25 + $0x20] sm:$0xff] %v1304_v21   ;;  %v394_v28 = vadd.f32 %v1569_v9, %v323_v18  ;;  %v395_v29 = vadd.f32 %v1569_v9, %v324_v19  ;;  %v1187_v30 = vunpack.c.l.bf16 %v1448_v20  ;;  %v1188_v31 = vunpack.c.h.bf16 %v1448_v20 }
  0x27   : > { %1476 = vst [vmem:[%s1592_s25 + $0x28] sm:$0xff] %v1309_v25   ;;  %v584_v32 = vsel %vm456_vm12, %v392_v15, %v520_v26  ;;  %v585_v33 = vsel %vm457_vm13, %v393_v17, %v521_v27  ;;  %v1191_v34 = vunpack.c.l.bf16 %v1449_v24  ;;  %v1192_v35 = vunpack.c.h.bf16 %v1449_v24 }
  0x28   : > { %v1314_v37 = vpack.c.bf16 %v585_v33, %v584_v32  ;;  %vm458_vm14 = vcmp.gt.f32.partialorder %v394_v28, 0.0  ;;  %vm459_vm15 = vcmp.gt.f32.partialorder %v395_v29, 0.0  ;;  %v522_v38 = vmul.f32 0.2, %v394_v28 }
  0x29   : > { %v523_v39 = vmul.f32 0.2, %v395_v29  ;;  %v325_v40 = vmul.f32 %v1187_v30, %v1560_v0  ;;  %v326_v41 = vmul.f32 %v1188_v31, %v1560_v0  ;;  %v327_v42 = vmul.f32 %v1191_v34, %v1560_v0 }
  0x2a   : > { %1477 = vst [vmem:[%s1592_s25 + $0x30] sm:$0xff] %v1314_v37   ;;  %v586_v43 = vsel %vm458_vm14, %v394_v28, %v522_v38  ;;  %v328_v44 = vmul.f32 %v1192_v35, %v1560_v0  ;;  %v1195_v45 = vunpack.c.l.bf16 %v1450_v36  ;;  %v1196_v46 = vunpack.c.h.bf16 %v1450_v36 }
  0x2b   : > { %v587_v47 = vsel %vm459_vm15, %v395_v29, %v523_v39  ;;  %v396_v48 = vadd.f32 %v1569_v9, %v325_v40  ;;  %v397_v49 = vadd.f32 %v1569_v9, %v326_v41  ;;  %v398_v50 = vadd.f32 %v1569_v9, %v327_v42  ;;  %v1455_v41 = vld [vmem:[%s1555_s18 + $0x78] sm:$0xff]  }
  0x2c   : > { %v1319_v51 = vpack.c.bf16 %v587_v47, %v586_v43  ;;  %v399_v52 = vadd.f32 %v1569_v9, %v328_v44  ;;  %v329_v53 = vmul.f32 %v1195_v45, %v1560_v0  ;;  %v330_v54 = vmul.f32 %v1196_v46, %v1560_v0  ;;  %v1456_v46 = vld [vmem:[%s1555_s18 + $0x80] sm:$0xff]   ;;  %v1457_v47 = vld [vmem:[%s1555_s18 + $0x88] sm:$0xff]  }
  0x2d   : > { %vm460_vm0 = vcmp.gt.f32.partialorder %v396_v48, 0.0  ;;  %vm461_vm1 = vcmp.gt.f32.partialorder %v397_v49, 0.0  ;;  %v524_v56 = vmul.f32 0.2, %v396_v48  ;;  %v525_v57 = vmul.f32 0.2, %v397_v49 }
  0x2e   : > { %1478 = vst [vmem:[%s1592_s25 + $0x38] sm:$0xff] %v1319_v51   ;;  %vm462_vm2 = vcmp.gt.f32.partialorder %v398_v50, 0.0  ;;  %vm463_vm3 = vcmp.gt.f32.partialorder %v399_v52, 0.0  ;;  %v526_v58 = vmul.f32 0.2, %v398_v50  ;;  %v400_v62 = vadd.f32 %v1569_v9, %v329_v53 }
  0x2f   : > { %v527_v59 = vmul.f32 0.2, %v399_v52  ;;  %v588_v60 = vsel %vm460_vm0, %v396_v48, %v524_v56  ;;  %v589_v61 = vsel %vm461_vm1, %v397_v49, %v525_v57  ;;  %v401_v63 = vadd.f32 %v1569_v9, %v330_v54 }
  0x30   : > { %v1324_v2 = vpack.c.bf16 %v589_v61, %v588_v60  ;;  %v590_v3 = vsel %vm462_vm2, %v398_v50, %v526_v58  ;;  %v1199_v5 = vunpack.c.l.bf16 %v1451_v55  ;;  %vm464_vm4 = vcmp.gt.f32.partialorder %v400_v62, 0.0 }
  0x31   : > { %v591_v4 = vsel %vm463_vm3, %v399_v52, %v527_v59  ;;  %vm465_vm5 = vcmp.gt.f32.partialorder %v401_v63, 0.0  ;;  %v528_v8 = vmul.f32 0.2, %v400_v62  ;;  %v529_v10 = vmul.f32 0.2, %v401_v63 }
  0x32   : > { %v1329_v7 = vpack.c.bf16 %v591_v4, %v590_v3  ;;  %1479 = vst [vmem:[%s1592_s25 + $0x40] sm:$0xff] %v1324_v2   ;;  %v1200_v11 = vunpack.c.h.bf16 %v1451_v55  ;;  %v331_v12 = vmul.f32 %v1199_v5, %v1560_v0  ;;  %v1203_v13 = vunpack.c.l.bf16 %v1452_v1 }
  0x33   : > { %v592_v14 = vsel %vm464_vm4, %v400_v62, %v528_v8  ;;  %v1204_v15 = vunpack.c.h.bf16 %v1452_v1  ;;  %v1207_v16 = vunpack.c.l.bf16 %v1453_v6  ;;  %v1208_v17 = vunpack.c.h.bf16 %v1453_v6 }
  0x34   : > { %1480 = vst [vmem:[%s1592_s25 + $0x48] sm:$0xff] %v1329_v7   ;;  %v593_v18 = vsel %vm465_vm5, %v401_v63, %v529_v10  ;;  %v332_v19 = vmul.f32 %v1200_v11, %v1560_v0  ;;  %v402_v20 = vadd.f32 %v1569_v9, %v331_v12  ;;  %v333_v21 = vmul.f32 %v1203_v13, %v1560_v0 }
  0x35   : > { %v1334_v23 = vpack.c.bf16 %v593_v18, %v592_v14  ;;  %v334_v24 = vmul.f32 %v1204_v15, %v1560_v0  ;;  %v335_v25 = vmul.f32 %v1207_v16, %v1560_v0  ;;  %v336_v26 = vmul.f32 %v1208_v17, %v1560_v0  ;;  %v1458_v14 = vld [vmem:[%s1555_s18 + $0x90] sm:$0xff]  }
  0x36   : > { %v403_v27 = vadd.f32 %v1569_v9, %v332_v19  ;;  %vm466_vm6 = vcmp.gt.f32.partialorder %v402_v20, 0.0  ;;  %v530_v28 = vmul.f32 0.2, %v402_v20  ;;  %v404_v29 = vadd.f32 %v1569_v9, %v333_v21 }
  0x37   : > { %1481 = vst [vmem:[%s1592_s25 + $0x50] sm:$0xff] %v1334_v23   ;;  %v405_v30 = vadd.f32 %v1569_v9, %v334_v24  ;;  %v406_v31 = vadd.f32 %v1569_v9, %v335_v25  ;;  %v407_v32 = vadd.f32 %v1569_v9, %v336_v26  ;;  %v1211_v33 = vunpack.c.l.bf16 %v1454_v22  ;;  %v1459_v25 = vld [vmem:[%s1555_s18 + $0x98] sm:$0xff]  }
  0x38   : > { %vm467_vm7 = vcmp.gt.f32.partialorder %v403_v27, 0.0  ;;  %v531_v34 = vmul.f32 0.2, %v403_v27  ;;  %v594_v35 = vsel %vm466_vm6, %v402_v20, %v530_v28  ;;  %vm468_vm8 = vcmp.gt.f32.partialorder %v404_v29, 0.0 }
  0x39   : > { %vm469_vm9 = vcmp.gt.f32.partialorder %v405_v30, 0.0  ;;  %v532_v36 = vmul.f32 0.2, %v404_v29  ;;  %v533_v37 = vmul.f32 0.2, %v405_v30  ;;  %vm470_vm10 = vcmp.gt.f32.partialorder %v406_v31, 0.0 }
  0x3a   : > { %v595_v38 = vsel %vm467_vm7, %v403_v27, %v531_v34  ;;  %vm471_vm11 = vcmp.gt.f32.partialorder %v407_v32, 0.0  ;;  %v534_v39 = vmul.f32 0.2, %v406_v31  ;;  %v535_v40 = vmul.f32 0.2, %v407_v32 }
  0x3b   : > { %v1339_v42 = vpack.c.bf16 %v595_v38, %v594_v35  ;;  %v596_v43 = vsel %vm468_vm8, %v404_v29, %v532_v36  ;;  %v597_v44 = vsel %vm469_vm9, %v405_v30, %v533_v37  ;;  %v1212_v45 = vunpack.c.h.bf16 %v1454_v22  ;;  %v1460_v30 = vld [vmem:[%s1555_s18 + $0xa0] sm:$0xff]  }
  0x3c   : > { %v1344_v48 = vpack.c.bf16 %v597_v44, %v596_v43  ;;  %v598_v49 = vsel %vm470_vm10, %v406_v31, %v534_v39  ;;  %v599_v50 = vsel %vm471_vm11, %v407_v32, %v535_v40  ;;  %v337_v51 = vmul.f32 %v1211_v33, %v1560_v0 }
  0x3d   : > { %1482 = vst [vmem:[%s1592_s25 + $0x58] sm:$0xff] %v1339_v42   ;;  %v1349_v52 = vpack.c.bf16 %v599_v50, %v598_v49  ;;  %v338_v53 = vmul.f32 %v1212_v45, %v1560_v0  ;;  %v1215_v54 = vunpack.c.l.bf16 %v1455_v41  ;;  %v1216_v55 = vunpack.c.h.bf16 %v1455_v41  ;;  %v1461_v45 = vld [vmem:[%s1555_s18 + $0xa8] sm:$0xff]  }
  0x3e   : > { %1483 = vst [vmem:[%s1592_s25 + $0x60] sm:$0xff] %v1344_v48   ;;  %v408_v56 = vadd.f32 %v1569_v9, %v337_v51  ;;  %v1219_v57 = vunpack.c.l.bf16 %v1456_v46  ;;  %v1220_v58 = vunpack.c.h.bf16 %v1456_v46  ;;  %v1223_v59 = vunpack.c.l.bf16 %v1457_v47 }
  0x3f   : > { %1484 = vst [vmem:[%s1592_s25 + $0x68] sm:$0xff] %v1349_v52   ;;  %v409_v60 = vadd.f32 %v1569_v9, %v338_v53  ;;  %v339_v61 = vmul.f32 %v1215_v54, %v1560_v0  ;;  %v340_v62 = vmul.f32 %v1216_v55, %v1560_v0  ;;  %v1224_v63 = vunpack.c.h.bf16 %v1457_v47 }
  0x40   : > { %vm472_vm12 = vcmp.gt.f32.partialorder %v408_v56, 0.0  ;;  %v536_v1 = vmul.f32 0.2, %v408_v56  ;;  %v341_v2 = vmul.f32 %v1219_v57, %v1560_v0  ;;  %v342_v3 = vmul.f32 %v1220_v58, %v1560_v0 }
  0x41   : > { %vm473_vm13 = vcmp.gt.f32.partialorder %v409_v60, 0.0  ;;  %v537_v4 = vmul.f32 0.2, %v409_v60  ;;  %v410_v5 = vadd.f32 %v1569_v9, %v339_v61  ;;  %v411_v6 = vadd.f32 %v1569_v9, %v340_v62  ;;  %v1462_v62 = vld [vmem:[%s1555_s18 + $0xb0] sm:$0xff]  }
  0x42   : > { %v600_v7 = vsel %vm472_vm12, %v408_v56, %v536_v1  ;;  %v412_v8 = vadd.f32 %v1569_v9, %v341_v2  ;;  %v413_v10 = vadd.f32 %v1569_v9, %v342_v3  ;;  %v343_v11 = vmul.f32 %v1223_v59, %v1560_v0  ;;  %v1463_v3 = vld [vmem:[%s1555_s18 + $0xb8] sm:$0xff]  }
  0x43   : > { %v601_v12 = vsel %vm473_vm13, %v409_v60, %v537_v4  ;;  %vm474_vm14 = vcmp.gt.f32.partialorder %v410_v5, 0.0  ;;  %vm475_vm15 = vcmp.gt.f32.partialorder %v411_v6, 0.0  ;;  %v538_v13 = vmul.f32 0.2, %v410_v5 }
  0x44   : > { %v1354_v15 = vpack.c.bf16 %v601_v12, %v600_v7  ;;  %v539_v16 = vmul.f32 0.2, %v411_v6  ;;  %vm476_vm0 = vcmp.gt.f32.partialorder %v412_v8, 0.0  ;;  %vm477_vm1 = vcmp.gt.f32.partialorder %v413_v10, 0.0 }
  0x45   : > { %v602_v17 = vsel %vm474_vm14, %v410_v5, %v538_v13  ;;  %v540_v18 = vmul.f32 0.2, %v412_v8  ;;  %v541_v19 = vmul.f32 0.2, %v413_v10  ;;  %v344_v20 = vmul.f32 %v1224_v63, %v1560_v0 }
  0x46   : > { %1485 = vst [vmem:[%s1592_s25 + $0x70] sm:$0xff] %v1354_v15   ;;  %v603_v21 = vsel %vm475_vm15, %v411_v6, %v539_v16  ;;  %v414_v22 = vadd.f32 %v1569_v9, %v343_v11  ;;  %v1227_v23 = vunpack.c.l.bf16 %v1458_v14  ;;  %v1228_v24 = vunpack.c.h.bf16 %v1458_v14 }
  0x47   : > { %v1359_v26 = vpack.c.bf16 %v603_v21, %v602_v17  ;;  %v604_v27 = vsel %vm476_vm0, %v412_v8, %v540_v18  ;;  %v605_v28 = vsel %vm477_vm1, %v413_v10, %v541_v19  ;;  %v415_v29 = vadd.f32 %v1569_v9, %v344_v20  ;;  %v1464_v20 = vld [vmem:[%s1555_s18 + $0xc0] sm:$0xff]  }
  0x48   : > { %v1364_v31 = vpack.c.bf16 %v605_v28, %v604_v27  ;;  %vm478_vm2 = vcmp.gt.f32.partialorder %v414_v22, 0.0  ;;  %v542_v32 = vmul.f32 0.2, %v414_v22  ;;  %v345_v33 = vmul.f32 %v1227_v23, %v1560_v0 }
  0x49   : > { %1486 = vst [vmem:[%s1592_s25 + $0x78] sm:$0xff] %v1359_v26   ;;  %vm479_vm3 = vcmp.gt.f32.partialorder %v415_v29, 0.0  ;;  %v543_v34 = vmul.f32 0.2, %v415_v29  ;;  %v346_v35 = vmul.f32 %v1228_v24, %v1560_v0  ;;  %v1231_v36 = vunpack.c.l.bf16 %v1459_v25 }
  0x4a   : > { %1487 = vst [vmem:[%s1592_s25 + $0x80] sm:$0xff] %v1364_v31   ;;  %v606_v37 = vsel %vm478_vm2, %v414_v22, %v542_v32  ;;  %v416_v38 = vadd.f32 %v1569_v9, %v345_v33  ;;  %v1232_v39 = vunpack.c.h.bf16 %v1459_v25  ;;  %v1235_v40 = vunpack.c.l.bf16 %v1460_v30 }
  0x4b   : > { %v607_v41 = vsel %vm479_vm3, %v415_v29, %v543_v34  ;;  %v417_v42 = vadd.f32 %v1569_v9, %v346_v35  ;;  %v347_v43 = vmul.f32 %v1231_v36, %v1560_v0  ;;  %v1236_v44 = vunpack.c.h.bf16 %v1460_v30  ;;  %v1465_v34 = vld [vmem:[%s1555_s18 + $0xc8] sm:$0xff]  }
  0x4c   : > { %v1369_v46 = vpack.c.bf16 %v607_v41, %v606_v37  ;;  %vm480_vm4 = vcmp.gt.f32.partialorder %v416_v38, 0.0  ;;  %v544_v47 = vmul.f32 0.2, %v416_v38  ;;  %v348_v48 = vmul.f32 %v1232_v39, %v1560_v0 }
  0x4d   : > { %vm481_vm5 = vcmp.gt.f32.partialorder %v417_v42, 0.0  ;;  %v545_v49 = vmul.f32 0.2, %v417_v42  ;;  %v418_v50 = vadd.f32 %v1569_v9, %v347_v43  ;;  %v349_v51 = vmul.f32 %v1235_v40, %v1560_v0 }
  0x4e   : > { %1488 = vst [vmem:[%s1592_s25 + $0x88] sm:$0xff] %v1369_v46   ;;  %v608_v52 = vsel %vm480_vm4, %v416_v38, %v544_v47  ;;  %v419_v53 = vadd.f32 %v1569_v9, %v348_v48  ;;  %v350_v54 = vmul.f32 %v1236_v44, %v1560_v0  ;;  %v1239_v55 = vunpack.c.l.bf16 %v1461_v45  ;;  %v1466_v44 = vld [vmem:[%s1555_s18 + $0xd0] sm:$0xff]  }
  0x4f   : > { %v609_v56 = vsel %vm481_vm5, %v417_v42, %v545_v49  ;;  %vm482_vm6 = vcmp.gt.f32.partialorder %v418_v50, 0.0  ;;  %v546_v57 = vmul.f32 0.2, %v418_v50  ;;  %v420_v58 = vadd.f32 %v1569_v9, %v349_v51 }
  0x50   : > { %v1374_v59 = vpack.c.bf16 %v609_v56, %v608_v52  ;;  %vm483_vm7 = vcmp.gt.f32.partialorder %v419_v53, 0.0  ;;  %v547_v60 = vmul.f32 0.2, %v419_v53  ;;  %v421_v61 = vadd.f32 %v1569_v9, %v350_v54 }
  0x51   : > { %v610_v63 = vsel %vm482_vm6, %v418_v50, %v546_v57  ;;  %vm484_vm8 = vcmp.gt.f32.partialorder %v420_v58, 0.0  ;;  %v548_v1 = vmul.f32 0.2, %v420_v58  ;;  %v1240_v2 = vunpack.c.h.bf16 %v1461_v45  ;;  %v1467_v45 = vld [vmem:[%s1555_s18 + $0xd8] sm:$0xff]  }
  0x52   : > { %1489 = vst [vmem:[%s1592_s25 + $0x90] sm:$0xff] %v1374_v59   ;;  %v611_v4 = vsel %vm483_vm7, %v419_v53, %v547_v60  ;;  %vm485_vm9 = vcmp.gt.f32.partialorder %v421_v61, 0.0  ;;  %v549_v5 = vmul.f32 0.2, %v421_v61  ;;  %v351_v6 = vmul.f32 %v1239_v55, %v1560_v0 }
  0x53   : > { %v1379_v7 = vpack.c.bf16 %v611_v4, %v610_v63  ;;  %v612_v8 = vsel %vm484_vm8, %v420_v58, %v548_v1  ;;  %v352_v10 = vmul.f32 %v1240_v2, %v1560_v0  ;;  %v1243_v11 = vunpack.c.l.bf16 %v1462_v62 }
  0x54   : > { %v613_v12 = vsel %vm485_vm9, %v421_v61, %v549_v5  ;;  %v422_v13 = vadd.f32 %v1569_v9, %v351_v6  ;;  %v1244_v14 = vunpack.c.h.bf16 %v1462_v62  ;;  %v1247_v15 = vunpack.c.l.bf16 %v1463_v3 }
  0x55   : > { %1490 = vst [vmem:[%s1592_s25 + $0x98] sm:$0xff] %v1379_v7   ;;  %v1384_v16 = vpack.c.bf16 %v613_v12, %v612_v8  ;;  %v423_v17 = vadd.f32 %v1569_v9, %v352_v10  ;;  %v353_v18 = vmul.f32 %v1243_v11, %v1560_v0  ;;  %v1248_v19 = vunpack.c.h.bf16 %v1463_v3  ;;  %v1468_v12 = vld [vmem:[%s1555_s18 + $0xe0] sm:$0xff]  }
  0x56   : > { %vm486_vm10 = vcmp.gt.f32.partialorder %v422_v13, 0.0  ;;  %v550_v21 = vmul.f32 0.2, %v422_v13  ;;  %v354_v22 = vmul.f32 %v1244_v14, %v1560_v0  ;;  %v355_v23 = vmul.f32 %v1247_v15, %v1560_v0 }
  0x57   : > { %1491 = vst [vmem:[%s1592_s25 + $0xa0] sm:$0xff] %v1384_v16   ;;  %vm487_vm11 = vcmp.gt.f32.partialorder %v423_v17, 0.0  ;;  %v551_v24 = vmul.f32 0.2, %v423_v17  ;;  %v424_v25 = vadd.f32 %v1569_v9, %v353_v18  ;;  %v356_v26 = vmul.f32 %v1248_v19, %v1560_v0  ;;  %v1469_v16 = vld [vmem:[%s1555_s18 + $0xe8] sm:$0xff]  }
  0x58   : > { %v614_v27 = vsel %vm486_vm10, %v422_v13, %v550_v21  ;;  %v425_v28 = vadd.f32 %v1569_v9, %v354_v22  ;;  %v426_v29 = vadd.f32 %v1569_v9, %v355_v23  ;;  %v1251_v30 = vunpack.c.l.bf16 %v1464_v20 }
  0x59   : > { %v615_v31 = vsel %vm487_vm11, %v423_v17, %v551_v24  ;;  %vm488_vm12 = vcmp.gt.f32.partialorder %v424_v25, 0.0  ;;  %v552_v32 = vmul.f32 0.2, %v424_v25  ;;  %v427_v33 = vadd.f32 %v1569_v9, %v356_v26 }
  0x5a   : > { %v1389_v35 = vpack.c.bf16 %v615_v31, %v614_v27  ;;  %vm489_vm13 = vcmp.gt.f32.partialorder %v425_v28, 0.0  ;;  %v553_v36 = vmul.f32 0.2, %v425_v28  ;;  %vm490_vm14 = vcmp.gt.f32.partialorder %v426_v29, 0.0 }
  0x5b   : > { %v616_v37 = vsel %vm488_vm12, %v424_v25, %v552_v32  ;;  %vm491_vm15 = vcmp.gt.f32.partialorder %v427_v33, 0.0  ;;  %v554_v38 = vmul.f32 0.2, %v426_v29  ;;  %v555_v39 = vmul.f32 0.2, %v427_v33 }
  0x5c   : > { %1492 = vst [vmem:[%s1592_s25 + $0xa8] sm:$0xff] %v1389_v35   ;;  %v617_v40 = vsel %vm489_vm13, %v425_v28, %v553_v36  ;;  %v1252_v41 = vunpack.c.h.bf16 %v1464_v20  ;;  %v357_v42 = vmul.f32 %v1251_v30, %v1560_v0  ;;  %v1255_v43 = vunpack.c.l.bf16 %v1465_v34  ;;  %v1470_v28 = vld [vmem:[%s1555_s18 + $0xf0] sm:$0xff]  }
  0x5d   : > { %v1394_v46 = vpack.c.bf16 %v617_v40, %v616_v37  ;;  %v618_v47 = vsel %vm490_vm14, %v426_v29, %v554_v38  ;;  %v619_v48 = vsel %vm491_vm15, %v427_v33, %v555_v39  ;;  %v1256_v49 = vunpack.c.h.bf16 %v1465_v34 }
  0x5e   : > { %v1399_v50 = vpack.c.bf16 %v619_v48, %v618_v47  ;;  %v358_v51 = vmul.f32 %v1252_v41, %v1560_v0  ;;  %v428_v52 = vadd.f32 %v1569_v9, %v357_v42  ;;  %v359_v53 = vmul.f32 %v1255_v43, %v1560_v0  ;;  %v1471_v47 = vld [vmem:[%s1555_s18 + $0xf8] sm:$0xff]  }
  0x5f   : > { %1493 = vst [vmem:[%s1592_s25 + $0xb0] sm:$0xff] %v1394_v46   ;;  %v360_v54 = vmul.f32 %v1256_v49, %v1560_v0  ;;  %v1259_v55 = vunpack.c.l.bf16 %v1466_v44  ;;  %v1260_v56 = vunpack.c.h.bf16 %v1466_v44  ;;  %v1263_v57 = vunpack.c.l.bf16 %v1467_v45 }
  0x60   : > { %1494 = vst [vmem:[%s1592_s25 + $0xb8] sm:$0xff] %v1399_v50   ;;  %v429_v58 = vadd.f32 %v1569_v9, %v358_v51  ;;  %vm492_vm0 = vcmp.gt.f32.partialorder %v428_v52, 0.0  ;;  %v556_v59 = vmul.f32 0.2, %v428_v52  ;;  %v430_v60 = vadd.f32 %v1569_v9, %v359_v53 }
  0x61   : > { %v431_v61 = vadd.f32 %v1569_v9, %v360_v54  ;;  %v361_v62 = vmul.f32 %v1259_v55, %v1560_v0  ;;  %v362_v63 = vmul.f32 %v1260_v56, %v1560_v0  ;;  %v1264_v1 = vunpack.c.h.bf16 %v1467_v45 }
  0x62   : > { %vm493_vm1 = vcmp.gt.f32.partialorder %v429_v58, 0.0  ;;  %v557_v2 = vmul.f32 0.2, %v429_v58  ;;  %v620_v3 = vsel %vm492_vm0, %v428_v52, %v556_v59  ;;  %vm494_vm2 = vcmp.gt.f32.partialorder %v430_v60, 0.0 }
  0x63   : > { %vm495_vm3 = vcmp.gt.f32.partialorder %v431_v61, 0.0  ;;  %v558_v4 = vmul.f32 0.2, %v430_v60  ;;  %v559_v5 = vmul.f32 0.2, %v431_v61  ;;  %v432_v6 = vadd.f32 %v1569_v9, %v361_v62 }
  0x64   : > { %v621_v7 = vsel %vm493_vm1, %v429_v58, %v557_v2  ;;  %v433_v8 = vadd.f32 %v1569_v9, %v362_v63  ;;  %v363_v10 = vmul.f32 %v1263_v57, %v1560_v0  ;;  %v364_v11 = vmul.f32 %v1264_v1, %v1560_v0 }
  0x65   : > { %v1404_v13 = vpack.c.bf16 %v621_v7, %v620_v3  ;;  %v622_v14 = vsel %vm494_vm2, %v430_v60, %v558_v4  ;;  %v623_v15 = vsel %vm495_vm3, %v431_v61, %v559_v5  ;;  %vm496_vm4 = vcmp.gt.f32.partialorder %v432_v6, 0.0 }
  0x66   : > { %v1409_v17 = vpack.c.bf16 %v623_v15, %v622_v14  ;;  %vm497_vm5 = vcmp.gt.f32.partialorder %v433_v8, 0.0  ;;  %v560_v18 = vmul.f32 0.2, %v432_v6  ;;  %v561_v19 = vmul.f32 0.2, %v433_v8 }
  0x67   : > { %1495 = vst [vmem:[%s1592_s25 + $0xc0] sm:$0xff] %v1404_v13   ;;  %v434_v20 = vadd.f32 %v1569_v9, %v363_v10  ;;  %v435_v21 = vadd.f32 %v1569_v9, %v364_v11  ;;  %v1267_v22 = vunpack.c.l.bf16 %v1468_v12  ;;  %v1268_v23 = vunpack.c.h.bf16 %v1468_v12 }
  0x68   : > { %1496 = vst [vmem:[%s1592_s25 + $0xc8] sm:$0xff] %v1409_v17   ;;  %v624_v24 = vsel %vm496_vm4, %v432_v6, %v560_v18  ;;  %v625_v25 = vsel %vm497_vm5, %v433_v8, %v561_v19  ;;  %v1271_v26 = vunpack.c.l.bf16 %v1469_v16  ;;  %v1272_v27 = vunpack.c.h.bf16 %v1469_v16 }
  0x69   : > { %v1414_v29 = vpack.c.bf16 %v625_v25, %v624_v24  ;;  %vm498_vm6 = vcmp.gt.f32.partialorder %v434_v20, 0.0  ;;  %vm499_vm7 = vcmp.gt.f32.partialorder %v435_v21, 0.0  ;;  %v562_v30 = vmul.f32 0.2, %v434_v20 }
  0x6a   : > { %v563_v31 = vmul.f32 0.2, %v435_v21  ;;  %v365_v32 = vmul.f32 %v1267_v22, %v1560_v0  ;;  %v366_v33 = vmul.f32 %v1268_v23, %v1560_v0  ;;  %v367_v34 = vmul.f32 %v1271_v26, %v1560_v0 }
  0x6b   : > { %1497 = vst [vmem:[%s1592_s25 + $0xd0] sm:$0xff] %v1414_v29   ;;  %v626_v35 = vsel %vm498_vm6, %v434_v20, %v562_v30  ;;  %v368_v36 = vmul.f32 %v1272_v27, %v1560_v0  ;;  %v1275_v37 = vunpack.c.l.bf16 %v1470_v28  ;;  %v1276_v38 = vunpack.c.h.bf16 %v1470_v28 }
  0x6c   : > { %v627_v39 = vsel %vm499_vm7, %v435_v21, %v563_v31  ;;  %v436_v40 = vadd.f32 %v1569_v9, %v365_v32  ;;  %v437_v41 = vadd.f32 %v1569_v9, %v366_v33  ;;  %v438_v42 = vadd.f32 %v1569_v9, %v367_v34 }
  0x6d   : > { %v1419_v43 = vpack.c.bf16 %v627_v39, %v626_v35  ;;  %v439_v44 = vadd.f32 %v1569_v9, %v368_v36  ;;  %v369_v45 = vmul.f32 %v1275_v37, %v1560_v0  ;;  %v370_v46 = vmul.f32 %v1276_v38, %v1560_v0 }
  0x6e   : > { %vm500_vm8 = vcmp.gt.f32.partialorder %v436_v40, 0.0  ;;  %vm501_vm9 = vcmp.gt.f32.partialorder %v437_v41, 0.0  ;;  %v564_v48 = vmul.f32 0.2, %v436_v40  ;;  %v565_v49 = vmul.f32 0.2, %v437_v41 }
  0x6f   : > { %1498 = vst [vmem:[%s1592_s25 + $0xd8] sm:$0xff] %v1419_v43   ;;  %vm502_vm10 = vcmp.gt.f32.partialorder %v438_v42, 0.0  ;;  %vm503_vm11 = vcmp.gt.f32.partialorder %v439_v44, 0.0  ;;  %v566_v50 = vmul.f32 0.2, %v438_v42  ;;  %v440_v54 = vadd.f32 %v1569_v9, %v369_v45 }
  0x70   : > { %v567_v51 = vmul.f32 0.2, %v439_v44  ;;  %v628_v52 = vsel %vm500_vm8, %v436_v40, %v564_v48  ;;  %v629_v53 = vsel %vm501_vm9, %v437_v41, %v565_v49  ;;  %v441_v55 = vadd.f32 %v1569_v9, %v370_v46 }
  0x71   : > { %v1424_v56 = vpack.c.bf16 %v629_v53, %v628_v52  ;;  %v630_v57 = vsel %vm502_vm10, %v438_v42, %v566_v50  ;;  %v1279_v59 = vunpack.c.l.bf16 %v1471_v47  ;;  %vm504_vm12 = vcmp.gt.f32.partialorder %v440_v54, 0.0 }
  0x72   : > { %v631_v58 = vsel %vm503_vm11, %v439_v44, %v567_v51  ;;  %vm505_vm13 = vcmp.gt.f32.partialorder %v441_v55, 0.0  ;;  %v568_v61 = vmul.f32 0.2, %v440_v54  ;;  %v569_v62 = vmul.f32 0.2, %v441_v55 }
  0x73   : > { %v1429_v60 = vpack.c.bf16 %v631_v58, %v630_v57  ;;  %1499 = vst [vmem:[%s1592_s25 + $0xe0] sm:$0xff] %v1424_v56   ;;  %v1280_v63 = vunpack.c.h.bf16 %v1471_v47  ;;  %v371_v1 = vmul.f32 %v1279_v59, %v1560_v0 }
  0x74   : > { %v632_v2 = vsel %vm504_vm12, %v440_v54, %v568_v61  ;;  %v633_v3 = vsel %vm505_vm13, %v441_v55, %v569_v62 }
  0x75   : > { %1500 = vst [vmem:[%s1592_s25 + $0xe8] sm:$0xff] %v1429_v60   ;;  %v372_v4 = vmul.f32 %v1280_v63, %v1560_v0  ;;  %v442_v5 = vadd.f32 %v1569_v9, %v371_v1  ;;  %v1434_v6 = vpack.c.bf16 %v633_v3, %v632_v2 }
  0x77   : > { %v443_v7 = vadd.f32 %v1569_v9, %v372_v4  ;;  %vm506_vm14 = vcmp.gt.f32.partialorder %v442_v5, 0.0  ;;  %v570_v8 = vmul.f32 0.2, %v442_v5  ;;  %1501 = vst [vmem:[%s1592_s25 + $0xf0] sm:$0xff] %v1434_v6  }
  0x79   : > { %vm507_vm15 = vcmp.gt.f32.partialorder %v443_v7, 0.0  ;;  %v571_v10 = vmul.f32 0.2, %v443_v7  ;;  %v634_v11 = vsel %vm506_vm14, %v442_v5, %v570_v8 }
  0x7b   : > { %v635_v12 = vsel %vm507_vm15, %v443_v7, %v571_v10 }
  0x7c   : > { %v1439_v13 = vpack.c.bf16 %v635_v12, %v634_v11 }
  0x7e   : > { %1502 = vst [vmem:[%s1592_s25 + $0xf8] sm:$0xff] %v1439_v13  }
  0x7f PF: > { %s13_s12 = sadd.s32 1, %s1517_s12  }
  0x80   : > { %p10_p4 = scmp.ge.s32.totalorder %s13_s12, 4  }
  0x82   :  { %12 = sbr.rel (!%p10_p4) target bundleno = 1 (0x1), region = 62 }

// kernel: discriminator_forward.12
= control target key start
LH: loop header
LB: loop body
LE: loop exit
PB: predicated region body
PF: predicated region fallthrough
CT: control target
= control target key end

     0   :  { %s603_s12 = smov 0   ;;  %s690_s0 = inlined_call_operand.vmem [shape: bf16[256,128], index: 0, kind: input, shape index: {}]   ;;  %s691_s1 = inlined_call_operand.vmem [shape: f32[1,128], index: 1, kind: input, shape index: {}]   ;;  %s692_s2 = inlined_call_operand.vmem [shape: f32[1,128], index: 2, kind: input, shape index: {}]   ;;  %s693_s3 = inlined_call_operand.vmem [shape: bf16[256,128], index: 3, kind: output, shape index: {}]  }
   0x1 LB: > { %s436_s13 = sadd.s32 4294967295, %s581_s12   ;;  %p440_p0 = scmp.ge.s32.totalorder %s581_s12, 1  ;;  %s581_s12 = sphi %s603_s12, %s13_s12  }
   0x2   : > { %p138_p1 = scmp.lt.s32.totalorder %s581_s12, 3 }
   0x4   : > { %p139_p2 = pnand %p440_p0, %p138_p1 }
   0x5   : > { %s441_s14 = sshll.u32 (!%p139_p2), %s436_s13, 4 }
   0x6   : > { %142 = sbr.rel (%p139_p2) target bundleno = 47 (0x2f), region = 32  ;;  %p163_p3 = scmp.lt.s32.totalorder (!%p139_p2), %s441_s14, 31 }
   0xb   : > { %s695_s14 = smov (!%p163_p3, %s441_s14), 31  ;;  %v624_v0 = vld [vmem:[%s691_s1] ss:$0 sm:$0xff] }
   0xc   : > { %s442_s15 = sshll.u32 %s695_s14, 2  ;;  %v633_v9 = vld [vmem:[%s692_s2] ss:$0 sm:$0xff] }
   0xd   : > { %s619_s18 = scalar_lea.vmem %s690_s0, %s442_s15  ;;  %s656_s25 = scalar_lea.vmem %s693_s3, %s442_s15 }
   0xe   : > { %v482_v1 = vld [vmem:[%s619_s18] sm:$0xff]   ;;  %v553_v2 = vld [vmem:[%s619_s18 + $0x8] sm:$0xff]   ;;  %v554_v3 = vld [vmem:[%s619_s18 + $0x10] sm:$0xff]  }
   0xf   : > { %v483_v4 = vunpack.c.l.bf16 %v482_v1  ;;  %v484_v5 = vunpack.c.h.bf16 %v482_v1  ;;  %v487_v6 = vunpack.c.l.bf16 %v553_v2  ;;  %v488_v7 = vunpack.c.h.bf16 %v553_v2  ;;  %v555_v8 = vld [vmem:[%s619_s18 + $0x18] sm:$0xff]   ;;  %v556_v36 = vld [vmem:[%s619_s18 + $0x20] sm:$0xff]   ;;  %v557_v41 = vld [vmem:[%s619_s18 + $0x28] sm:$0xff]  }
  0x10   : > { %v491_v10 = vunpack.c.l.bf16 %v554_v3  ;;  %v492_v11 = vunpack.c.h.bf16 %v554_v3  ;;  %v495_v12 = vunpack.c.l.bf16 %v555_v8  ;;  %v496_v13 = vunpack.c.h.bf16 %v555_v8  ;;  %v558_v52 = vld [vmem:[%s619_s18 + $0x30] sm:$0xff]   ;;  %v559_v53 = vld [vmem:[%s619_s18 + $0x38] sm:$0xff]  }
  0x11   : > { %v213_v14 = vmul.f32 %v483_v4, %v624_v0  ;;  %v214_v15 = vmul.f32 %v484_v5, %v624_v0  ;;  %v215_v16 = vmul.f32 %v487_v6, %v624_v0  ;;  %v216_v17 = vmul.f32 %v488_v7, %v624_v0 }
  0x12   : > { %v217_v18 = vmul.f32 %v491_v10, %v624_v0  ;;  %v218_v19 = vmul.f32 %v492_v11, %v624_v0  ;;  %v219_v20 = vmul.f32 %v495_v12, %v624_v0  ;;  %v220_v21 = vmul.f32 %v496_v13, %v624_v0 }
  0x13   : > { %v236_v22 = vadd.f32 %v633_v9, %v213_v14  ;;  %v237_v23 = vadd.f32 %v633_v9, %v214_v15  ;;  %v238_v24 = vadd.f32 %v633_v9, %v215_v16  ;;  %v239_v25 = vadd.f32 %v633_v9, %v216_v17 }
  0x14   : > { %v240_v26 = vadd.f32 %v633_v9, %v217_v18  ;;  %v241_v27 = vadd.f32 %v633_v9, %v218_v19  ;;  %v242_v28 = vadd.f32 %v633_v9, %v219_v20  ;;  %v243_v29 = vadd.f32 %v633_v9, %v220_v21 }
  0x15   : > { %vm252_vm0 = vcmp.gt.f32.partialorder %v236_v22, 0.0  ;;  %vm253_vm1 = vcmp.gt.f32.partialorder %v237_v23, 0.0  ;;  %v268_v30 = vmul.f32 0.2, %v236_v22  ;;  %v269_v31 = vmul.f32 0.2, %v237_v23 }
  0x16   : > { %vm254_vm2 = vcmp.gt.f32.partialorder %v238_v24, 0.0  ;;  %vm255_vm3 = vcmp.gt.f32.partialorder %v239_v25, 0.0  ;;  %v270_v32 = vmul.f32 0.2, %v238_v24  ;;  %v271_v33 = vmul.f32 0.2, %v239_v25 }
  0x17   : > { %v284_v34 = vsel %vm252_vm0, %v236_v22, %v268_v30  ;;  %v285_v35 = vsel %vm253_vm1, %v237_v23, %v269_v31  ;;  %vm256_vm4 = vcmp.gt.f32.partialorder %v240_v26, 0.0  ;;  %vm257_vm5 = vcmp.gt.f32.partialorder %v241_v27, 0.0 }
  0x18   : > { %v516_v37 = vpack.c.bf16 %v285_v35, %v284_v34  ;;  %v286_v38 = vsel %vm254_vm2, %v238_v24, %v270_v32  ;;  %v287_v39 = vsel %vm255_vm3, %v239_v25, %v271_v33  ;;  %v272_v40 = vmul.f32 0.2, %v240_v26 }
  0x19   : > { %v521_v42 = vpack.c.bf16 %v287_v39, %v286_v38  ;;  %v273_v43 = vmul.f32 0.2, %v241_v27  ;;  %vm258_vm6 = vcmp.gt.f32.partialorder %v242_v28, 0.0  ;;  %vm259_vm7 = vcmp.gt.f32.partialorder %v243_v29, 0.0 }
  0x1a   : > { %517 = vst [vmem:[%s656_s25] sm:$0xff] %v516_v37   ;;  %v288_v44 = vsel %vm256_vm4, %v240_v26, %v272_v40  ;;  %v274_v45 = vmul.f32 0.2, %v242_v28  ;;  %v275_v46 = vmul.f32 0.2, %v243_v29  ;;  %v499_v47 = vunpack.c.l.bf16 %v556_v36 }
  0x1b   : > { %560 = vst [vmem:[%s656_s25 + $0x8] sm:$0xff] %v521_v42   ;;  %v289_v48 = vsel %vm257_vm5, %v241_v27, %v273_v43  ;;  %v500_v49 = vunpack.c.h.bf16 %v556_v36  ;;  %v503_v50 = vunpack.c.l.bf16 %v557_v41  ;;  %v504_v51 = vunpack.c.h.bf16 %v557_v41 }
  0x1c   : > { %v526_v54 = vpack.c.bf16 %v289_v48, %v288_v44  ;;  %v290_v55 = vsel %vm258_vm6, %v242_v28, %v274_v45  ;;  %v291_v56 = vsel %vm259_vm7, %v243_v29, %v275_v46  ;;  %v221_v57 = vmul.f32 %v499_v47, %v624_v0 }
  0x1d   : > { %v531_v58 = vpack.c.bf16 %v291_v56, %v290_v55  ;;  %v222_v59 = vmul.f32 %v500_v49, %v624_v0  ;;  %v223_v60 = vmul.f32 %v503_v50, %v624_v0  ;;  %v224_v61 = vmul.f32 %v504_v51, %v624_v0 }
  0x1e   : > { %561 = vst [vmem:[%s656_s25 + $0x10] sm:$0xff] %v526_v54   ;;  %v244_v62 = vadd.f32 %v633_v9, %v221_v57  ;;  %v507_v63 = vunpack.c.l.bf16 %v558_v52  ;;  %v508_v1 = vunpack.c.h.bf16 %v558_v52  ;;  %v511_v2 = vunpack.c.l.bf16 %v559_v53 }
  0x1f   : > { %562 = vst [vmem:[%s656_s25 + $0x18] sm:$0xff] %v531_v58   ;;  %v245_v3 = vadd.f32 %v633_v9, %v222_v59  ;;  %v246_v4 = vadd.f32 %v633_v9, %v223_v60  ;;  %v247_v5 = vadd.f32 %v633_v9, %v224_v61  ;;  %v512_v6 = vunpack.c.h.bf16 %v559_v53 }
  0x20   : > { %vm260_vm8 = vcmp.gt.f32.partialorder %v244_v62, 0.0  ;;  %v276_v7 = vmul.f32 0.2, %v244_v62  ;;  %v225_v8 = vmul.f32 %v507_v63, %v624_v0  ;;  %v226_v10 = vmul.f32 %v508_v1, %v624_v0 }
  0x21   : > { %vm261_vm9 = vcmp.gt.f32.partialorder %v245_v3, 0.0  ;;  %v277_v11 = vmul.f32 0.2, %v245_v3  ;;  %vm262_vm10 = vcmp.gt.f32.partialorder %v246_v4, 0.0  ;;  %vm263_vm11 = vcmp.gt.f32.partialorder %v247_v5, 0.0 }
  0x22   : > { %v292_v12 = vsel %vm260_vm8, %v244_v62, %v276_v7  ;;  %v278_v13 = vmul.f32 0.2, %v246_v4  ;;  %v279_v14 = vmul.f32 0.2, %v247_v5  ;;  %v248_v15 = vadd.f32 %v633_v9, %v225_v8 }
  0x23   : > { %v293_v16 = vsel %vm261_vm9, %v245_v3, %v277_v11  ;;  %v249_v17 = vadd.f32 %v633_v9, %v226_v10  ;;  %v227_v18 = vmul.f32 %v511_v2, %v624_v0  ;;  %v228_v19 = vmul.f32 %v512_v6, %v624_v0 }
  0x24   : > { %v536_v20 = vpack.c.bf16 %v293_v16, %v292_v12  ;;  %v294_v21 = vsel %vm262_vm10, %v246_v4, %v278_v13  ;;  %v295_v22 = vsel %vm263_vm11, %v247_v5, %v279_v14  ;;  %vm264_vm12 = vcmp.gt.f32.partialorder %v248_v15, 0.0 }
  0x25   : > { %v541_v23 = vpack.c.bf16 %v295_v22, %v294_v21  ;;  %vm265_vm13 = vcmp.gt.f32.partialorder %v249_v17, 0.0  ;;  %v280_v24 = vmul.f32 0.2, %v248_v15  ;;  %v281_v25 = vmul.f32 0.2, %v249_v17 }
  0x26   : > { %563 = vst [vmem:[%s656_s25 + $0x20] sm:$0xff] %v536_v20   ;;  %v250_v26 = vadd.f32 %v633_v9, %v227_v18  ;;  %v251_v27 = vadd.f32 %v633_v9, %v228_v19 }
  0x27   : > { %564 = vst [vmem:[%s656_s25 + $0x28] sm:$0xff] %v541_v23   ;;  %v296_v28 = vsel %vm264_vm12, %v248_v15, %v280_v24  ;;  %v297_v29 = vsel %vm265_vm13, %v249_v17, %v281_v25 }
  0x28   : > { %v546_v30 = vpack.c.bf16 %v297_v29, %v296_v28  ;;  %vm266_vm14 = vcmp.gt.f32.partialorder %v250_v26, 0.0  ;;  %vm267_vm15 = vcmp.gt.f32.partialorder %v251_v27, 0.0  ;;  %v282_v0 = vmul.f32 0.2, %v250_v26 }
  0x29   : > { %v283_v31 = vmul.f32 0.2, %v251_v27 }
  0x2a   : > { %565 = vst [vmem:[%s656_s25 + $0x30] sm:$0xff] %v546_v30   ;;  %v298_v32 = vsel %vm266_vm14, %v250_v26, %v282_v0 }
  0x2b   : > { %v299_v33 = vsel %vm267_vm15, %v251_v27, %v283_v31 }
  0x2c   : > { %v551_v34 = vpack.c.bf16 %v299_v33, %v298_v32 }
  0x2e   : > { %566 = vst [vmem:[%s656_s25 + $0x38] sm:$0xff] %v551_v34  }
  0x2f PF: > { %s13_s12 = sadd.s32 1, %s581_s12  }
  0x30   : > { %p10_p4 = scmp.ge.s32.totalorder %s13_s12, 4  }
  0x32   :  { %12 = sbr.rel (!%p10_p4) target bundleno = 1 (0x1), region = 62 }

// kernel: discriminator_forward.11
= control target key start
LH: loop header
LB: loop body
LE: loop exit
PB: predicated region body
PF: predicated region fallthrough
CT: control target
= control target key end

     0   :  { %s1019_s12 = smov 0   ;;  %s1148_s0 = inlined_call_operand.vmem [shape: bf16[256,256], index: 0, kind: input, shape index: {}]   ;;  %s1149_s1 = inlined_call_operand.vmem [shape: bf16[256,128], index: 1, kind: input, shape index: {}]   ;;  %s1150_s2 = inlined_call_operand.vmem [shape: bf16[256,128], index: 2, kind: output, shape index: {0}]   ;;  %s1151_s3 = inlined_call_operand.vmem [shape: f32[2,2,128], index: 3, kind: output, shape index: {1}]  }
   0x1 LB: > { %s1025_s13 = sadd.s32 4294967295, %s997_s12   ;;  %p742_p0 = scmp.ge.s32.totalorder %s997_s12, 1  ;;  %s997_s12 = sphi %s1019_s12, %s14_s12  }
   0x2   : > { %p142_p1 = scmp.lt.s32.totalorder %s997_s12, 3 }
   0x4   : > { %p143_p2 = pnand %p742_p0, %p142_p1 }
   0x5   : > { %s743_s16 = sshll.u32 (!%p143_p2), %s1025_s13, 4  ;;  %p184_p4 = scmp.lt.s32.totalorder (!%p143_p2), %s1025_s13, 1 }
   0x6   : > { %146 = sbr.rel (%p143_p2) target bundleno = 303 (0x12f), region = 28  ;;  %p172_p3 = scmp.lt.s32.totalorder (!%p143_p2), %s743_s16, 31 }
   0xb   : > { %v951_v0 = vld [vmem:[%s1149_s1 + $0x78] sm:$0xff]   ;;  %v953_v2 = vld [vmem:[%s1149_s1 + $0x70] sm:$0xff]   ;;  %v955_v4 = vld [vmem:[%s1149_s1 + $0x68] sm:$0xff]   ;;  %s1153_s16 = smov (!%p172_p3, %s743_s16), 31  ;;  %s1155_s13 = smov (!%p184_p4, %s1025_s13), 1  ;;  %vm648_vm0 = vcmask 1040384  }
   0xc   : > { %v952_v1 = vld [vmem:[%s1149_s1 + $0x38] sm:$0xff]   ;;  %863 = vmatprep.subr.bf16.mxu0 %v951_v0  ;;  %927 = vmatprep.subr.bf16.mxu1 %v951_v0  ;;  %v954_v3 = vld [vmem:[%s1149_s1 + $0x30] sm:$0xff]   ;;  %v956_v5 = vld [vmem:[%s1149_s1 + $0x28] sm:$0xff]   ;;  %s799_s4 = sshll.u32 %s1153_s16, 3  ;;  %s747_s27 = sshll.u32 %s1153_s16, 2 }
   0xd   : > { %864 = vmatpush3.bf16.msra.mxu0 %v952_v1  ;;  %935 = vmatpush3.bf16.msra.mxu1 %v952_v1  ;;  %v957_v6 = vld [vmem:[%s1149_s1 + $0x60] sm:$0xff]   ;;  %v959_v8 = vld [vmem:[%s1149_s1 + $0x58] sm:$0xff]   ;;  %s1063_s9 = scalar_lea.vmem %s1148_s0, %s799_s4  ;;  %v961_v10 = vld [vmem:[%s1149_s1 + $0x50] sm:$0xff]   ;;  %s1110_s30 = scalar_lea.vmem %s1150_s2, %s747_s27 }
   0xe   : > { %865 = vmatprep.subr.bf16.mxu0 %v953_v2  ;;  %928 = vmatprep.subr.bf16.mxu1 %v953_v2  ;;  %v958_v7 = vld [vmem:[%s1149_s1 + $0x20] sm:$0xff]   ;;  %v960_v9 = vld [vmem:[%s1149_s1 + $0x18] sm:$0xff]   ;;  %v962_v12 = vld [vmem:[%s1149_s1 + $0x10] sm:$0xff]   ;;  %s748_s16 = sshll.u32 %s1155_s13, 1 }
   0xf   : > { %v969_v11 = vld [vmem:[%s1063_s9 + $0x4] ss:$8 sps:$4 sm:$0xff]   ;;  %v967_v18 = vld [vmem:[%s1063_s9] ss:$8 sps:$4 sm:$0xff]   ;;  %v970_v20 = vld [vmem:[%s1063_s9 + $0x14] ss:$8 sps:$4 sm:$0xff]   ;;  %s187_s6 = scalar_lea.vmem %s1151_s3, %s748_s16 }
  0x10   : > { %v975_v13 = vld [vmem:[%s1063_s9 + $0x44] ss:$8 sps:$4 sm:$0xff]   ;;  %445 = vmatprep.mubr.bf16.mxu0 %v969_v11  ;;  %v973_v19 = vld [vmem:[%s1063_s9 + $0x40] ss:$8 sps:$4 sm:$0xff]   ;;  %v979_v21 = vld [vmem:[%s1063_s9 + $0x54] ss:$8 sps:$4 sm:$0xff]  }
  0x11   : > { %866 = vmatpush3.bf16.msra.mxu0 %v954_v3  ;;  %936 = vmatpush3.bf16.msra.mxu1 %v954_v3  ;;  %v963_v14 = vld [vmem:[%s1149_s1 + $0x48] sm:$0xff]   ;;  %v965_v16 = vld [vmem:[%s1149_s1 + $0x40] sm:$0xff]   ;;  %v972_v22 = vld [vmem:[%s1063_s9 + $0x10] ss:$8 sps:$4 sm:$0xff]  }
  0x12   : > { %867 = vmatprep.subr.bf16.mxu0 %v955_v4  ;;  %929 = vmatprep.subr.bf16.mxu1 %v955_v4  ;;  %v964_v15 = vld [vmem:[%s1149_s1 + $0x8] sm:$0xff]   ;;  %v966_v17 = vld [vmem:[%s1149_s1] sm:$0xff]   ;;  %v981_v23 = vld [vmem:[%s1063_s9 + $0x50] ss:$8 sps:$4 sm:$0xff]  }
  0x13   : > { %477 = vmatprep.mubr.bf16.mxu1 %v975_v13  ;;  %v976_v24 = vld [vmem:[%s1063_s9 + $0x24] ss:$8 sps:$4 sm:$0xff]   ;;  %v978_v26 = vld [vmem:[%s1063_s9 + $0x20] ss:$8 sps:$4 sm:$0xff]   ;;  %v982_v28 = vld [vmem:[%s1063_s9 + $0x34] ss:$8 sps:$4 sm:$0xff]  }
  0x14   : > { %v985_v25 = vld [vmem:[%s1063_s9 + $0x64] ss:$8 sps:$4 sm:$0xff]   ;;  %v987_v27 = vld [vmem:[%s1063_s9 + $0x60] ss:$8 sps:$4 sm:$0xff]   ;;  %v988_v29 = vld [vmem:[%s1063_s9 + $0x74] ss:$8 sps:$4 sm:$0xff]  }
  0x15   : > { %868 = vmatpush3.bf16.msra.mxu0 %v956_v5  ;;  %937 = vmatpush3.bf16.msra.mxu1 %v956_v5  ;;  %v984_v30 = vld [vmem:[%s1063_s9 + $0x30] ss:$8 sps:$4 sm:$0xff]  }
  0x16   : > { %869 = vmatprep.subr.bf16.mxu0 %v957_v6  ;;  %930 = vmatprep.subr.bf16.mxu1 %v957_v6  ;;  %v990_v31 = vld [vmem:[%s1063_s9 + $0x70] ss:$8 sps:$4 sm:$0xff]  }
  0x19   : > { %870 = vmatpush3.bf16.msra.mxu0 %v958_v7  ;;  %938 = vmatpush3.bf16.msra.mxu1 %v958_v7 }
  0x1a   : > { %871 = vmatprep.subr.bf16.mxu0 %v959_v8  ;;  %931 = vmatprep.subr.bf16.mxu1 %v959_v8 }
  0x1d   : > { %872 = vmatpush3.bf16.msra.mxu0 %v960_v9  ;;  %939 = vmatpush3.bf16.msra.mxu1 %v960_v9 }
  0x1e   : > { %873 = vmatprep.subr.bf16.mxu0 %v961_v10  ;;  %932 = vmatprep.subr.bf16.mxu1 %v961_v10 }
  0x21   : > { %874 = vmatpush3.bf16.msra.mxu0 %v962_v12  ;;  %940 = vmatpush3.bf16.msra.mxu1 %v962_v12 }
  0x22   : > { %875 = vmatprep.subr.bf16.mxu0 %v963_v14  ;;  %933 = vmatprep.subr.bf16.mxu1 %v963_v14 }
  0x25   : > { %876 = vmatpush3.bf16.msra.mxu0 %v964_v15  ;;  %941 = vmatpush3.bf16.msra.mxu1 %v964_v15 }
  0x26   : > { %877 = vmatprep.subr.bf16.mxu0 %v965_v16  ;;  %934 = vmatprep.subr.bf16.mxu1 %v965_v16 }
  0x29   : > { %878 = vmatpush3.bf16.msra.mxu0 %v966_v17  ;;  %942 = vmatpush3.bf16.msra.mxu1 %v966_v17 }
  0x2c   : > { %446 = vmatmul.mubr.bf16.vlgmr.msra.gmra.mxu0 %v967_v18  ;;  %478 = vmatmul.mubr.bf16.vlgmr.msra.gmra.mxu1 %v973_v19 }
  0x2d   : > { %453 = vmatprep.mubr.bf16.mxu0 %v970_v20  ;;  %485 = vmatprep.mubr.bf16.mxu1 %v979_v21 }
  0x34   : > { %454 = vmatmul.mubr.bf16.gmra.mxu0 %v972_v22  ;;  %486 = vmatmul.mubr.bf16.gmra.mxu1 %v981_v23 }
  0x35   : > { %461 = vmatprep.mubr.bf16.mxu0 %v976_v24  ;;  %493 = vmatprep.mubr.bf16.mxu1 %v985_v25 }
  0x3c   : > { %462 = vmatmul.mubr.bf16.gmra.mxu0 %v978_v26  ;;  %494 = vmatmul.mubr.bf16.gmra.mxu1 %v987_v27 }
  0x3d   : > { %469 = vmatprep.mubr.bf16.mxu0 %v982_v28  ;;  %501 = vmatprep.mubr.bf16.mxu1 %v988_v29 }
  0x44   : > { %470 = vmatmul.mubr.bf16.gmra.mxu0 %v984_v30  ;;  %502 = vmatmul.mubr.bf16.gmra.mxu1 %v990_v31 }
  0xec   : > { %v879_v32 = vpop.f32.mrf.mxu0  ;;  %v903_v33 = vpop.f32.mrf.mxu1 }
  0xee   : > { %v880_v34 = vpop.f32.mrf.mxu0  ;;  %v904_v35 = vpop.f32.mrf.mxu1 }
  0xef   : > { %v1103_v38 = vadd.f32 %v904_v35, %v903_v33  ;;  %v881_v41 = vadd.f32 %v880_v34, %v879_v32 }
  0xf0   : > { %v882_v36 = vpop.f32.mrf.mxu0  ;;  %v906_v37 = vpop.f32.mrf.mxu1 }
  0xf1   : > { %v611_v1 = vmul.f32 %v881_v41, %v881_v41 }
  0xf2   : > { %v883_v39 = vpop.f32.mrf.mxu0  ;;  %v907_v40 = vpop.f32.mrf.mxu1 }
  0xf3   : > { %v884_v42 = vadd.f32 %v883_v39, %v882_v36  ;;  %v1105_v43 = vadd.f32 %v907_v40, %v906_v37 }
  0xf4   : > { %v885_v44 = vpop.f32.mrf.mxu0  ;;  %v909_v45 = vpop.f32.mrf.mxu1 }
  0xf5   : > { %v819_v46 = vpack.c.bf16 %v884_v42, %v881_v41  ;;  %v839_v47 = vpack.c.bf16 %v1105_v43, %v1103_v38  ;;  %v612_v62 = vmul.f32 %v884_v42, %v884_v42  ;;  %v590_v6 = vadd.f32 %v884_v42, %v881_v41 }
  0xf6   : > { %v886_v48 = vpop.f32.mrf.mxu0  ;;  %v910_v49 = vpop.f32.mrf.mxu1 }
  0xf7   : > { %820 = vst [vmem:[%s1110_s30] sm:$0xff] %v819_v46   ;;  %859 = vst [vmem:[%s1110_s30 + $0x20] sm:$0xff] %v839_v47   ;;  %v1116_v52 = vadd.f32 %v910_v49, %v909_v45  ;;  %v887_v55 = vadd.f32 %v886_v48, %v885_v44  ;;  %v627_v8 = vadd.f32 %v612_v62, %v611_v1 }
  0xf8   : > { %v888_v50 = vpop.f32.mrf.mxu0  ;;  %v912_v51 = vpop.f32.mrf.mxu1  ;;  %v619_v47 = vmul.f32 %v1103_v38, %v1103_v38 }
  0xf9   : > { %v613_v2 = vmul.f32 %v887_v55, %v887_v55  ;;  %v591_v12 = vadd.f32 %v887_v55, %v590_v6 }
  0xfa   : > { %v889_v53 = vpop.f32.mrf.mxu0  ;;  %v913_v54 = vpop.f32.mrf.mxu1 }
  0xfb   : > { %v890_v56 = vadd.f32 %v889_v53, %v888_v50  ;;  %v1118_v57 = vadd.f32 %v913_v54, %v912_v51  ;;  %v628_v15 = vadd.f32 %v627_v8, %v613_v2  ;;  %v620_v50 = vmul.f32 %v1105_v43, %v1105_v43 }
  0xfc   : > { %v891_v58 = vpop.f32.mrf.mxu0  ;;  %v915_v59 = vpop.f32.mrf.mxu1  ;;  %v621_v54 = vmul.f32 %v1116_v52, %v1116_v52 }
  0xfd   : > { %v824_v60 = vpack.c.bf16 %v890_v56, %v887_v55  ;;  %v844_v61 = vpack.c.bf16 %v1118_v57, %v1116_v52  ;;  %v614_v9 = vmul.f32 %v890_v56, %v890_v56  ;;  %v592_v19 = vadd.f32 %v890_v56, %v591_v12 }
  0xfe   : > { %v892_v63 = vpop.f32.mrf.mxu0  ;;  %v916_v0 = vpop.f32.mrf.mxu1 }
  0xff   : > { %856 = vst [vmem:[%s1110_s30 + $0x8] sm:$0xff] %v824_v60   ;;  %860 = vst [vmem:[%s1110_s30 + $0x28] sm:$0xff] %v844_v61   ;;  %v893_v3 = vadd.f32 %v892_v63, %v891_v58  ;;  %v917_v7 = vadd.f32 %v916_v0, %v915_v59  ;;  %v629_v22 = vadd.f32 %v628_v15, %v614_v9 }
 0x100   : > { %v894_v4 = vpop.f32.mrf.mxu0  ;;  %v918_v5 = vpop.f32.mrf.mxu1  ;;  %v622_v58 = vmul.f32 %v1118_v57, %v1118_v57 }
 0x101   : > { %v615_v16 = vmul.f32 %v893_v3, %v893_v3  ;;  %v593_v26 = vadd.f32 %v893_v3, %v592_v19  ;;  %v623_v60 = vmul.f32 %v917_v7, %v917_v7 }
 0x102   : > { %v895_v10 = vpop.f32.mrf.mxu0  ;;  %v919_v11 = vpop.f32.mrf.mxu1 }
 0x103   : > { %v896_v13 = vadd.f32 %v895_v10, %v894_v4  ;;  %v920_v14 = vadd.f32 %v919_v11, %v918_v5  ;;  %v630_v28 = vadd.f32 %v629_v22, %v615_v16 }
 0x104   : > { %v897_v17 = vpop.f32.mrf.mxu0  ;;  %v921_v18 = vpop.f32.mrf.mxu1 }
 0x105   : > { %v829_v20 = vpack.c.bf16 %v896_v13, %v893_v3  ;;  %v849_v21 = vpack.c.bf16 %v920_v14, %v917_v7  ;;  %v616_v23 = vmul.f32 %v896_v13, %v896_v13  ;;  %v594_v31 = vadd.f32 %v896_v13, %v593_v26 }
 0x106   : > { %v898_v24 = vpop.f32.mrf.mxu0  ;;  %v922_v25 = vpop.f32.mrf.mxu1 }
 0x107   : > { %857 = vst [vmem:[%s1110_s30 + $0x10] sm:$0xff] %v829_v20   ;;  %v899_v27 = vadd.f32 %v898_v24, %v897_v17  ;;  %861 = vst [vmem:[%s1110_s30 + $0x30] sm:$0xff] %v849_v21   ;;  %v923_v33 = vadd.f32 %v922_v25, %v921_v18  ;;  %v631_v34 = vadd.f32 %v630_v28, %v616_v23 }
 0x108   : > { %v900_v29 = vpop.f32.mrf.mxu0  ;;  %v924_v30 = vpop.f32.mrf.mxu1 }
 0x109   : > { %v617_v32 = vmul.f32 %v899_v27, %v899_v27  ;;  %v595_v37 = vadd.f32 %v899_v27, %v594_v31  ;;  %v625_v3 = vmul.f32 %v923_v33, %v923_v33 }
 0x10a   : > { %v901_v35 = vpop.f32.mrf.mxu0  ;;  %v925_v36 = vpop.f32.mrf.mxu1 }
 0x10b   : > { %v902_v39 = vadd.f32 %v901_v35, %v900_v29  ;;  %v926_v40 = vadd.f32 %v925_v36, %v924_v30  ;;  %v632_v41 = vadd.f32 %v631_v34, %v617_v32 }
 0x10d   : > { %v834_v42 = vpack.c.bf16 %v902_v39, %v899_v27  ;;  %v596_v44 = vadd.f32 %v902_v39, %v595_v37  ;;  %v618_v45 = vmul.f32 %v902_v39, %v902_v39  ;;  %v854_v46 = vpack.c.bf16 %v926_v40, %v923_v33 }
 0x10f   : > { %858 = vst [vmem:[%s1110_s30 + $0x18] sm:$0xff] %v834_v42   ;;  %v597_v48 = vadd.f32 %v1103_v38, %v596_v44  ;;  %v633_v49 = vadd.f32 %v632_v41, %v618_v45  ;;  %862 = vst [vmem:[%s1110_s30 + $0x38] sm:$0xff] %v854_v46  }
 0x111   : > { %v598_v51 = vadd.f32 %v1105_v43, %v597_v48  ;;  %v634_v53 = vadd.f32 %v633_v49, %v619_v47  ;;  %v624_v43 = vmul.f32 %v920_v14, %v920_v14 }
 0x113   : > { %v635_v55 = vadd.f32 %v634_v53, %v620_v50  ;;  %v599_v56 = vadd.f32 %v1116_v52, %v598_v51  ;;  %v626_v52 = vmul.f32 %v926_v40, %v926_v40 }
 0x115   : > { %v600_v59 = vadd.f32 %v1118_v57, %v599_v56  ;;  %v636_v38 = vadd.f32 %v635_v55, %v621_v54 }
 0x117   : > { %v601_v61 = vadd.f32 %v917_v7, %v600_v59  ;;  %v637_v62 = vadd.f32 %v636_v38, %v622_v58 }
 0x119   : > { %v602_v63 = vadd.f32 %v920_v14, %v601_v61  ;;  %v638_v0 = vadd.f32 %v637_v62, %v623_v60 }
 0x11b   : > { %v639_v1 = vadd.f32 %v638_v0, %v624_v43  ;;  %v603_v2 = vadd.f32 %v923_v33, %v602_v63 }
 0x11d   : > { %v640_v4 = vadd.f32 %v639_v1, %v625_v3  ;;  %v604_v5 = vadd.f32 %v926_v40, %v603_v2 }
 0x11f   : > { %v605_v6 = vrot.slane %v604_v5, 4  ;;  %v641_v8 = vadd.f32 %v640_v4, %v626_v52 }
 0x121   : > { %v606_v9 = vadd.f32 %v605_v6, %v604_v5  ;;  %v642_v57 = vrot.slane %v641_v8, 4 }
 0x123   : > { %v607_v10 = vrot.slane %v606_v9, 2  ;;  %v643_v11 = vadd.f32 %v642_v57, %v641_v8 }
 0x125   : > { %v608_v7 = vadd.f32 %v607_v10, %v606_v9  ;;  %v644_v12 = vrot.slane %v643_v11, 2 }
 0x127   : > { %v609_v13 = vrot.slane %v608_v7, 1  ;;  %v645_v15 = vadd.f32 %v644_v12, %v643_v11 }
 0x129   : > { %v646_v14 = vrot.slane %v645_v15, 1  ;;  %v610_v16 = vadd.f32 %v609_v13, %v608_v7 }
 0x12b   : > { %v647_v17 = vadd.f32 %v646_v14, %v645_v15 }
 0x12d   : > { %v649_v18 = vsel %vm648_vm0, %v610_v16, %v647_v17 }
 0x12e   : > { %650 = vst [vmem:[%s187_s6] sm:$0x3] %v649_v18 }
 0x12f PF: > { %s14_s12 = sadd.s32 1, %s997_s12  }
 0x130   : > { %p11_p5 = scmp.ge.s32.totalorder %s14_s12, 4  }
 0x132   :  { %13 = sbr.rel (!%p11_p5) target bundleno = 1 (0x1), region = 70 }

// kernel: discriminator_forward.14
= control target key start
LH: loop header
LB: loop body
LE: loop exit
PB: predicated region body
PF: predicated region fallthrough
CT: control target
= control target key end

     0   :  { %s369_s12 = smov 0   ;;  %s392_s0 = inlined_call_operand.vmem [shape: bf16[64,128], index: 0, kind: input, shape index: {}]   ;;  %s393_s1 = inlined_call_operand.vmem [shape: f32[1,128], index: 1, kind: input, shape index: {}]   ;;  %s394_s2 = inlined_call_operand.vmem [shape: f32[1,128], index: 2, kind: input, shape index: {}]   ;;  %s395_s3 = inlined_call_operand.vmem [shape: bf16[64,128], index: 3, kind: output, shape index: {}]  }
   0x1 LB: > { %s292_s13 = sadd.s32 4294967295, %s347_s12   ;;  %p296_p0 = scmp.ge.s32.totalorder %s347_s12, 1  ;;  %s347_s12 = sphi %s369_s12, %s13_s12  }
   0x2   : > { %p138_p1 = scmp.lt.s32.totalorder %s347_s12, 3 }
   0x4   : > { %p139_p2 = pnand %p296_p0, %p138_p1 }
   0x5   : > { %s297_s14 = sshll.u32 (!%p139_p2), %s292_s13, 2 }
   0x6   : > { %142 = sbr.rel (%p139_p2) target bundleno = 28 (0x1c), region = 32  ;;  %p163_p3 = scmp.lt.s32.totalorder (!%p139_p2), %s297_s14, 7 }
   0xb   : > { %s397_s14 = smov (!%p163_p3, %s297_s14), 7  ;;  %v301_v2 = vld [vmem:[%s393_s1] ss:$0 sm:$0xff] }
   0xc   : > { %s298_s15 = sshll.u32 %s397_s14, 2  ;;  %v302_v7 = vld [vmem:[%s394_s2] ss:$0 sm:$0xff] }
   0xd   : > { %s166_s18 = scalar_lea.vmem %s392_s0, %s298_s15  ;;  %s172_s25 = scalar_lea.vmem %s395_s3, %s298_s15 }
   0xe   : > { %v314_v0 = vld [vmem:[%s166_s18] sm:$0xff]   ;;  %v331_v1 = vld [vmem:[%s166_s18 + $0x8] sm:$0xff]  }
   0xf   : > { %v315_v3 = vunpack.c.l.bf16 %v314_v0  ;;  %v316_v4 = vunpack.c.h.bf16 %v314_v0  ;;  %v319_v5 = vunpack.c.l.bf16 %v331_v1  ;;  %v320_v6 = vunpack.c.h.bf16 %v331_v1 }
  0x11   : > { %v189_v8 = vmul.f32 %v315_v3, %v301_v2  ;;  %v190_v9 = vmul.f32 %v316_v4, %v301_v2  ;;  %v191_v10 = vmul.f32 %v319_v5, %v301_v2  ;;  %v192_v11 = vmul.f32 %v320_v6, %v301_v2 }
  0x13   : > { %v200_v12 = vadd.f32 %v302_v7, %v189_v8  ;;  %v201_v13 = vadd.f32 %v302_v7, %v190_v9  ;;  %v202_v14 = vadd.f32 %v302_v7, %v191_v10  ;;  %v203_v15 = vadd.f32 %v302_v7, %v192_v11 }
  0x15   : > { %vm204_vm0 = vcmp.gt.f32.partialorder %v200_v12, 0.0  ;;  %vm205_vm1 = vcmp.gt.f32.partialorder %v201_v13, 0.0  ;;  %v208_v16 = vmul.f32 0.2, %v200_v12  ;;  %v209_v17 = vmul.f32 0.2, %v201_v13 }
  0x16   : > { %vm206_vm2 = vcmp.gt.f32.partialorder %v202_v14, 0.0  ;;  %vm207_vm3 = vcmp.gt.f32.partialorder %v203_v15, 0.0  ;;  %v210_v18 = vmul.f32 0.2, %v202_v14  ;;  %v211_v19 = vmul.f32 0.2, %v203_v15 }
  0x17   : > { %v212_v20 = vsel %vm204_vm0, %v200_v12, %v208_v16  ;;  %v213_v21 = vsel %vm205_vm1, %v201_v13, %v209_v17 }
  0x18   : > { %v324_v22 = vpack.c.bf16 %v213_v21, %v212_v20  ;;  %v214_v23 = vsel %vm206_vm2, %v202_v14, %v210_v18  ;;  %v215_v24 = vsel %vm207_vm3, %v203_v15, %v211_v19 }
  0x19   : > { %v329_v25 = vpack.c.bf16 %v215_v24, %v214_v23 }
  0x1a   : > { %325 = vst [vmem:[%s172_s25] sm:$0xff] %v324_v22  }
  0x1b   : > { %332 = vst [vmem:[%s172_s25 + $0x8] sm:$0xff] %v329_v25  }
  0x1c PF: > { %s13_s12 = sadd.s32 1, %s347_s12  }
  0x1d   : > { %p10_p4 = scmp.ge.s32.totalorder %s13_s12, 4  }
  0x1f   :  { %12 = sbr.rel (!%p10_p4) target bundleno = 1 (0x1), region = 62 }

// kernel: discriminator_forward.13
= control target key start
LH: loop header
LB: loop body
LE: loop exit
PB: predicated region body
PF: predicated region fallthrough
CT: control target
= control target key end

     0   :  { %s932_s12 = smov 0   ;;  %s1057_s0 = inlined_call_operand.vmem [shape: bf16[64,512], index: 0, kind: input, shape index: {}]   ;;  %s1058_s1 = inlined_call_operand.vmem [shape: bf16[512,128], index: 1, kind: input, shape index: {}]   ;;  %s1059_s2 = inlined_call_operand.vmem [shape: bf16[64,128], index: 2, kind: output, shape index: {0}]   ;;  %s1060_s3 = inlined_call_operand.vmem [shape: f32[2,2,128], index: 3, kind: output, shape index: {1}]  }
   0x1 LB: > { %s938_s13 = sadd.s32 4294967295, %s910_s12   ;;  %p727_p0 = scmp.ge.s32.totalorder %s910_s12, 1  ;;  %s910_s12 = sphi %s932_s12, %s14_s12  }
   0x2   : > { %p142_p1 = scmp.lt.s32.totalorder %s910_s12, 3 }
   0x4   : > { %p143_p2 = pnand %p727_p0, %p142_p1 }
   0x5   : > { %s728_s21 = sshll.u32 (!%p143_p2), %s938_s13, 2  ;;  %p184_p4 = scmp.lt.s32.totalorder (!%p143_p2), %s938_s13, 1 }
   0x6   : > { %146 = sbr.rel (%p143_p2) target bundleno = 275 (0x113), region = 28  ;;  %p172_p3 = scmp.lt.s32.totalorder (!%p143_p2), %s728_s21, 7 }
   0xb   : > { %v860_v0 = vld [vmem:[%s1058_s1 + $0x78] sm:$0xff]   ;;  %v864_v4 = vld [vmem:[%s1058_s1 + $0x70] sm:$0xff]   ;;  %v868_v8 = vld [vmem:[%s1058_s1 + $0x68] sm:$0xff]   ;;  %s1062_s21 = smov (!%p172_p3, %s728_s21), 7  ;;  %s1064_s13 = smov (!%p184_p4, %s938_s13), 1  ;;  %vm633_vm0 = vcmask 1040384  }
   0xc   : > { %v861_v1 = vld [vmem:[%s1058_s1 + $0xf8] sm:$0xff]   ;;  %796 = vmatprep.subr.bf16.mxu0 %v860_v0  ;;  %v865_v5 = vld [vmem:[%s1058_s1 + $0xf0] sm:$0xff]   ;;  %v869_v9 = vld [vmem:[%s1058_s1 + $0xe8] sm:$0xff]   ;;  %s780_s19 = sshll.u32 %s1062_s21, 4  ;;  %s732_s7 = sshll.u32 %s1062_s21, 2 }
   0xd   : > { %v862_v2 = vld [vmem:[%s1058_s1 + $0x38] sm:$0xff]   ;;  %824 = vmatprep.subr.bf16.mxu1 %v861_v1  ;;  %v866_v6 = vld [vmem:[%s1058_s1 + $0x30] sm:$0xff]   ;;  %v870_v10 = vld [vmem:[%s1058_s1 + $0x28] sm:$0xff]   ;;  %s176_s29 = scalar_lea.vmem %s1057_s0, %s780_s19  ;;  %s182_s10 = scalar_lea.vmem %s1059_s2, %s732_s7 }
   0xe   : > { %v863_v3 = vld [vmem:[%s1058_s1 + $0xb8] sm:$0xff]   ;;  %797 = vmatpush3.bf16.msra.mxu0 %v862_v2  ;;  %v867_v7 = vld [vmem:[%s1058_s1 + $0xb0] sm:$0xff]   ;;  %v871_v11 = vld [vmem:[%s1058_s1 + $0xa8] sm:$0xff]   ;;  %s733_s21 = sshll.u32 %s1064_s13, 1 }
   0xf   : > { %825 = vmatpush3.bf16.msra.mxu1 %v863_v3  ;;  %798 = vmatprep.subr.bf16.mxu0 %v864_v4  ;;  %v872_v12 = vld [vmem:[%s1058_s1 + $0x60] sm:$0xff]   ;;  %v876_v16 = vld [vmem:[%s1058_s1 + $0x58] sm:$0xff]   ;;  %v880_v20 = vld [vmem:[%s1058_s1 + $0x50] sm:$0xff]   ;;  %s187_s15 = scalar_lea.vmem %s1060_s3, %s733_s21 }
  0x10   : > { %826 = vmatprep.subr.bf16.mxu1 %v865_v5  ;;  %v873_v13 = vld [vmem:[%s1058_s1 + $0xe0] sm:$0xff]   ;;  %v877_v17 = vld [vmem:[%s1058_s1 + $0xd8] sm:$0xff]   ;;  %v881_v21 = vld [vmem:[%s1058_s1 + $0xd0] sm:$0xff]  }
  0x11   : > { %v874_v14 = vld [vmem:[%s1058_s1 + $0x20] sm:$0xff]   ;;  %v878_v18 = vld [vmem:[%s1058_s1 + $0x18] sm:$0xff]   ;;  %v882_v22 = vld [vmem:[%s1058_s1 + $0x10] sm:$0xff]  }
  0x12   : > { %799 = vmatpush3.bf16.msra.mxu0 %v866_v6  ;;  %v875_v15 = vld [vmem:[%s1058_s1 + $0xa0] sm:$0xff]   ;;  %v879_v19 = vld [vmem:[%s1058_s1 + $0x98] sm:$0xff]   ;;  %v883_v23 = vld [vmem:[%s1058_s1 + $0x90] sm:$0xff]  }
  0x13   : > { %827 = vmatpush3.bf16.msra.mxu1 %v867_v7  ;;  %800 = vmatprep.subr.bf16.mxu0 %v868_v8  ;;  %v884_v24 = vld [vmem:[%s1058_s1 + $0x48] sm:$0xff]   ;;  %v888_v28 = vld [vmem:[%s1058_s1 + $0x40] sm:$0xff]  }
  0x14   : > { %828 = vmatprep.subr.bf16.mxu1 %v869_v9  ;;  %v885_v25 = vld [vmem:[%s1058_s1 + $0xc8] sm:$0xff]   ;;  %v889_v29 = vld [vmem:[%s1058_s1 + $0xc0] sm:$0xff]  }
  0x15   : > { %v886_v26 = vld [vmem:[%s1058_s1 + $0x8] sm:$0xff]   ;;  %v890_v30 = vld [vmem:[%s1058_s1] sm:$0xff]  }
  0x16   : > { %801 = vmatpush3.bf16.msra.mxu0 %v870_v10  ;;  %v887_v27 = vld [vmem:[%s1058_s1 + $0x88] sm:$0xff]   ;;  %v891_v31 = vld [vmem:[%s1058_s1 + $0x80] sm:$0xff]  }
  0x17   : > { %829 = vmatpush3.bf16.msra.mxu1 %v871_v11  ;;  %802 = vmatprep.subr.bf16.mxu0 %v872_v12  ;;  %v892_v32 = vld [vmem:[%s176_s29] ss:$16 sps:$4 sm:$0xff]   ;;  %v894_v33 = vld [vmem:[%s176_s29 + $0x4] ss:$16 sps:$4 sm:$0xff]   ;;  %v895_v34 = vld [vmem:[%s176_s29 + $0x8] ss:$16 sps:$4 sm:$0xff]  }
  0x18   : > { %830 = vmatprep.subr.bf16.mxu1 %v873_v13  ;;  %v897_v35 = vld [vmem:[%s176_s29 + $0xc] ss:$16 sps:$4 sm:$0xff]   ;;  %525 = vmatprep.mubr.bf16.mxu0 %v894_v33  ;;  %v898_v36 = vld [vmem:[%s176_s29 + $0x24] ss:$16 sps:$4 sm:$0xff]   ;;  %v902_v38 = vld [vmem:[%s176_s29 + $0x20] ss:$16 sps:$4 sm:$0xff]  }
  0x19   : > { %574 = vmatprep.mubr.bf16.mxu1 %v897_v35  ;;  %v900_v37 = vld [vmem:[%s176_s29 + $0x2c] ss:$16 sps:$4 sm:$0xff]   ;;  %v903_v39 = vld [vmem:[%s176_s29 + $0x28] ss:$16 sps:$4 sm:$0xff]  }
  0x1a   : > { %803 = vmatpush3.bf16.msra.mxu0 %v874_v14 }
  0x1b   : > { %831 = vmatpush3.bf16.msra.mxu1 %v875_v15  ;;  %804 = vmatprep.subr.bf16.mxu0 %v876_v16 }
  0x1c   : > { %832 = vmatprep.subr.bf16.mxu1 %v877_v17 }
  0x1e   : > { %805 = vmatpush3.bf16.msra.mxu0 %v878_v18 }
  0x1f   : > { %833 = vmatpush3.bf16.msra.mxu1 %v879_v19  ;;  %806 = vmatprep.subr.bf16.mxu0 %v880_v20 }
  0x20   : > { %834 = vmatprep.subr.bf16.mxu1 %v881_v21 }
  0x22   : > { %807 = vmatpush3.bf16.msra.mxu0 %v882_v22 }
  0x23   : > { %835 = vmatpush3.bf16.msra.mxu1 %v883_v23  ;;  %808 = vmatprep.subr.bf16.mxu0 %v884_v24 }
  0x24   : > { %836 = vmatprep.subr.bf16.mxu1 %v885_v25 }
  0x26   : > { %809 = vmatpush3.bf16.msra.mxu0 %v886_v26 }
  0x27   : > { %837 = vmatpush3.bf16.msra.mxu1 %v887_v27  ;;  %810 = vmatprep.subr.bf16.mxu0 %v888_v28 }
  0x28   : > { %838 = vmatprep.subr.bf16.mxu1 %v889_v29 }
  0x2a   : > { %811 = vmatpush3.bf16.msra.mxu0 %v890_v30 }
  0x2b   : > { %839 = vmatpush3.bf16.msra.mxu1 %v891_v31 }
  0x2d   : > { %526 = vmatmul.mubr.bf16.vlgmr.msra.gmra.mxu0 %v892_v32 }
  0x2e   : > { %575 = vmatmul.mubr.bf16.vlgmr.msra.gmra.mxu1 %v895_v34  ;;  %533 = vmatprep.mubr.bf16.mxu0 %v898_v36 }
  0x2f   : > { %582 = vmatprep.mubr.bf16.mxu1 %v900_v37 }
  0x35   : > { %534 = vmatmul.mubr.bf16.gmra.mxu0 %v902_v38 }
  0x36   : > { %583 = vmatmul.mubr.bf16.gmra.mxu1 %v903_v39 }
  0xed   : > { %v812_v40 = vpop.f32.mrf.mxu0 }
  0xee   : > { %v840_v41 = vpop.f32.mrf.mxu1 }
  0xef   : > { %v813_v42 = vpop.f32.mrf.mxu0 }
  0xf0   : > { %v841_v43 = vpop.f32.mrf.mxu1  ;;  %v814_v46 = vadd.f32 %v813_v42, %v812_v40 }
  0xf1   : > { %v815_v44 = vpop.f32.mrf.mxu0  ;;  %v842_v47 = vadd.f32 %v841_v43, %v840_v41 }
  0xf2   : > { %v843_v45 = vpop.f32.mrf.mxu1 }
  0xf3   : > { %v816_v48 = vpop.f32.mrf.mxu0  ;;  %v577_v54 = vadd.f32 %v842_v47, %v814_v46 }
  0xf4   : > { %v817_v49 = vadd.f32 %v816_v48, %v815_v44  ;;  %v844_v50 = vpop.f32.mrf.mxu1 }
  0xf5   : > { %v845_v51 = vadd.f32 %v844_v50, %v843_v45  ;;  %v818_v52 = vpop.f32.mrf.mxu0  ;;  %v620_v4 = vmul.f32 %v577_v54, %v577_v54 }
  0xf6   : > { %v846_v53 = vpop.f32.mrf.mxu1 }
  0xf7   : > { %v580_v55 = vadd.f32 %v845_v51, %v817_v49  ;;  %v819_v56 = vpop.f32.mrf.mxu0 }
  0xf8   : > { %v820_v57 = vadd.f32 %v819_v56, %v818_v52  ;;  %v847_v58 = vpop.f32.mrf.mxu1 }
  0xf9   : > { %v788_v59 = vpack.c.bf16 %v580_v55, %v577_v54  ;;  %v848_v60 = vadd.f32 %v847_v58, %v846_v53  ;;  %v821_v61 = vpop.f32.mrf.mxu0  ;;  %v621_v63 = vmul.f32 %v580_v55, %v580_v55  ;;  %v611_v5 = vadd.f32 %v580_v55, %v577_v54 }
  0xfa   : > { %v849_v62 = vpop.f32.mrf.mxu1 }
  0xfb   : > { %789 = vst [vmem:[%s182_s10] sm:$0xff] %v788_v59   ;;  %v585_v0 = vadd.f32 %v848_v60, %v820_v57  ;;  %v822_v1 = vpop.f32.mrf.mxu0  ;;  %v624_v8 = vadd.f32 %v621_v63, %v620_v4 }
  0xfc   : > { %v823_v2 = vadd.f32 %v822_v1, %v821_v61  ;;  %v850_v3 = vpop.f32.mrf.mxu1 }
  0xfd   : > { %v622_v6 = vmul.f32 %v585_v0, %v585_v0  ;;  %v851_v7 = vadd.f32 %v850_v3, %v849_v62  ;;  %v612_v9 = vadd.f32 %v611_v5, %v585_v0 }
  0xff   : > { %v588_v10 = vadd.f32 %v851_v7, %v823_v2  ;;  %v625_v11 = vadd.f32 %v624_v8, %v622_v6 }
 0x101   : > { %v793_v12 = vpack.c.bf16 %v588_v10, %v585_v0  ;;  %v613_v13 = vadd.f32 %v612_v9, %v588_v10  ;;  %v623_v14 = vmul.f32 %v588_v10, %v588_v10 }
 0x103   : > { %795 = vst [vmem:[%s182_s10 + $0x8] sm:$0xff] %v793_v12   ;;  %v614_v15 = vrot.slane %v613_v13, 4  ;;  %v626_v16 = vadd.f32 %v625_v11, %v623_v14 }
 0x105   : > { %v615_v17 = vadd.f32 %v614_v15, %v613_v13  ;;  %v627_v18 = vrot.slane %v626_v16, 4 }
 0x107   : > { %v616_v19 = vrot.slane %v615_v17, 2  ;;  %v628_v20 = vadd.f32 %v627_v18, %v626_v16 }
 0x109   : > { %v617_v21 = vadd.f32 %v616_v19, %v615_v17  ;;  %v629_v22 = vrot.slane %v628_v20, 2 }
 0x10b   : > { %v618_v23 = vrot.slane %v617_v21, 1  ;;  %v630_v24 = vadd.f32 %v629_v22, %v628_v20 }
 0x10d   : > { %v631_v25 = vrot.slane %v630_v24, 1  ;;  %v619_v26 = vadd.f32 %v618_v23, %v617_v21 }
 0x10f   : > { %v632_v27 = vadd.f32 %v631_v25, %v630_v24 }
 0x111   : > { %v634_v28 = vsel %vm633_vm0, %v619_v26, %v632_v27 }
 0x112   : > { %635 = vst [vmem:[%s187_s15] sm:$0x3] %v634_v28 }
 0x113 PF: > { %s14_s12 = sadd.s32 1, %s910_s12  }
 0x114   : > { %p11_p5 = scmp.ge.s32.totalorder %s14_s12, 4  }
 0x116   :  { %13 = sbr.rel (!%p11_p5) target bundleno = 1 (0x1), region = 70 }

// kernel: discriminator_forward.15
= control target key start
LH: loop header
LB: loop body
LE: loop exit
PB: predicated region body
PF: predicated region fallthrough
CT: control target
= control target key end

     0   :  { %s473_s9 = smov 0   ;;  %s541_s0 = inlined_call_operand.vmem [shape: bf16[16,256], index: 0, kind: input, shape index: {}]   ;;  %s542_s1 = inlined_call_operand.vmem [shape: bf16[256,128], index: 1, kind: input, shape index: {}]   ;;  %s543_s2 = inlined_call_operand.vmem [shape: f32[16,128], index: 2, kind: output, shape index: {}]  }
   0x1 LB: > { %s373_s10 = sadd.s32 4294967295, %s456_s9   ;;  %p377_p0 = scmp.ge.s32.totalorder %s456_s9, 1  ;;  %s456_s9 = sphi %s473_s9, %s12_s9  }
   0x2   : > { %p112_p1 = scmp.lt.s32.totalorder %s456_s9, 3 }
   0x4   : > { %p113_p2 = pnand %p377_p0, %p112_p1 }
   0x5   : > { %p133_p3 = scmp.lt.s32.totalorder (!%p113_p2), %s373_s10, 1 }
   0x6   : > { %116 = sbr.rel (%p113_p2) target bundleno = 243 (0xf3), region = 28 }
   0xb   : > { %v432_v0 = vld [vmem:[%s542_s1 + $0x78] sm:$0xff]   ;;  %v434_v2 = vld [vmem:[%s542_s1 + $0x70] sm:$0xff]   ;;  %v436_v4 = vld [vmem:[%s542_s1 + $0x68] sm:$0xff]   ;;  %s545_s10 = smov (!%p133_p3, %s373_s10), 1 }
   0xc   : > { %v433_v1 = vld [vmem:[%s542_s1 + $0x38] sm:$0xff]   ;;  %402 = vmatprep.subr.bf16.mxu0 %v432_v0  ;;  %v435_v3 = vld [vmem:[%s542_s1 + $0x30] sm:$0xff]   ;;  %v437_v5 = vld [vmem:[%s542_s1 + $0x28] sm:$0xff]   ;;  %s401_s25 = sshll.u32 %s545_s10, 3 }
   0xd   : > { %403 = vmatpush3.bf16.msra.mxu0 %v433_v1  ;;  %v438_v6 = vld [vmem:[%s542_s1 + $0x60] sm:$0xff]   ;;  %v440_v8 = vld [vmem:[%s542_s1 + $0x58] sm:$0xff]   ;;  %s137_s4 = scalar_lea.vmem %s541_s0, %s401_s25  ;;  %v442_v10 = vld [vmem:[%s542_s1 + $0x50] sm:$0xff]   ;;  %s141_s22 = scalar_lea.vmem %s543_s2, %s401_s25 }
   0xe   : > { %404 = vmatprep.subr.bf16.mxu0 %v434_v2  ;;  %v439_v7 = vld [vmem:[%s542_s1 + $0x20] sm:$0xff]   ;;  %v441_v9 = vld [vmem:[%s542_s1 + $0x18] sm:$0xff]   ;;  %v443_v13 = vld [vmem:[%s542_s1 + $0x10] sm:$0xff]  }
   0xf   : > { %v143_v11 = vld [vmem:[%s137_s4] sm:$0xff]  ;;  %v444_v14 = vld [vmem:[%s542_s1 + $0x48] sm:$0xff]  }
  0x10   : > { %v382_v12 = vcombine.high %v143_v11, %v143_v11  ;;  %v445_v15 = vld [vmem:[%s542_s1 + $0x8] sm:$0xff]   ;;  %v446_v16 = vld [vmem:[%s542_s1 + $0x40] sm:$0xff]   ;;  %v381_v18 = vcombine.low %v143_v11, %v143_v11 }
  0x11   : > { %405 = vmatpush3.bf16.msra.mxu0 %v435_v3  ;;  %v447_v17 = vld [vmem:[%s542_s1] sm:$0xff]  }
  0x12   : > { %406 = vmatprep.subr.bf16.mxu0 %v436_v4  ;;  %311 = vmatprep.mubr.bf16.mxu0 %v382_v12 }
  0x15   : > { %407 = vmatpush3.bf16.msra.mxu0 %v437_v5 }
  0x16   : > { %408 = vmatprep.subr.bf16.mxu0 %v438_v6 }
  0x19   : > { %409 = vmatpush3.bf16.msra.mxu0 %v439_v7 }
  0x1a   : > { %410 = vmatprep.subr.bf16.mxu0 %v440_v8 }
  0x1d   : > { %411 = vmatpush3.bf16.msra.mxu0 %v441_v9 }
  0x1e   : > { %412 = vmatprep.subr.bf16.mxu0 %v442_v10 }
  0x21   : > { %413 = vmatpush3.bf16.msra.mxu0 %v443_v13 }
  0x22   : > { %414 = vmatprep.subr.bf16.mxu0 %v444_v14 }
  0x25   : > { %415 = vmatpush3.bf16.msra.mxu0 %v445_v15 }
  0x26   : > { %416 = vmatprep.subr.bf16.mxu0 %v446_v16 }
  0x29   : > { %417 = vmatpush3.bf16.msra.mxu0 %v447_v17 }
  0x2c   : > { %312 = vmatmul.mubr.bf16.vlgmr.msra.gmra.mxu0 %v381_v18 }
  0xec   : > { %v418_v19 = vpop.f32.mrf.mxu0 }
  0xee   : > { %v419_v20 = vpop.f32.mrf.mxu0 }
  0xef   : > { %v420_v21 = vadd.f32 %v419_v20, %v418_v19 }
  0xf0   : > { %v421_v22 = vpop.f32.mrf.mxu0 }
  0xf1   : > { %319 = vst [vmem:[%s141_s22] sm:$0xff] %v420_v21 }
  0xf2   : > { %v422_v23 = vpop.f32.mrf.mxu0 }
  0xf3 PF: > { %s12_s9 = sadd.s32 1, %s456_s9  }
  0xf4   : > { %p9_p4 = scmp.ge.s32.totalorder %s12_s9, 4  }
  0xf6   :  { %11 = sbr.rel (!%p9_p4) target bundleno = 1 (0x1), region = 58 }

</bundles_post_ra>
